<compile_context>
chip_gen: v6e
topology: v6e:2x2x1
jax: 0.10.0
libtpu: 0.0.40
codegen_flags: <defaults>
</compile_context>

<pallas_src>
import functools

import jax
import jax.numpy as jnp
from jax.experimental import pallas as pl
from jax.experimental.pallas import tpu as pltpu

HEAD_PAD = 128  # lane-dense padding for the packed fc_out_1/fc_out_2 head columns


def _round_up(n, m):
    return ((n + m - 1) // m) * m


# ----------------------------- fused kernel ----------------------------------

def attention_fused_kernel(x_ref,
                           w1c_ref, b1c_ref,
                           w2b_ref, b2c_ref,
                           aw1_ref, ab1_ref, aw2_ref, ab2_ref,
                           wattT_ref, batt_ref,
                           whead_ref, bhead_ref,
                           out_ref, *, H2):
    f32 = jnp.float32
    x = x_ref[...]                                                   # (bm, D) f32

    # Layer 1 of the three modality MLPs batched as ONE matmul (same input x).
    # bf16-stored weights are upcast on the VMEM->vreg path; MXU accumulates f32.
    h1 = jnp.maximum(
        jnp.dot(x, w1c_ref[...].astype(f32), preferred_element_type=f32)
        + b1c_ref[...], 0.0)                                         # (bm, 3*H1)

    # Layer 2 of the three modality MLPs as ONE block-diagonal matmul; this IS
    # multi_hidden1 = cat([audio_hidden, text_hidden, video_hidden], dim=1).
    mh1 = jnp.maximum(
        jnp.dot(h1, w2b_ref[...].astype(f32), preferred_element_type=f32)
        + b2c_ref[...], 0.0)                                         # (bm, 3*H2)

    # attention_mlp
    ah = jnp.maximum(
        jnp.dot(mh1, aw1_ref[...].astype(f32), preferred_element_type=f32)
        + ab1_ref[...], 0.0)                                         # (bm, H1)
    ah = jnp.maximum(
        jnp.dot(ah, aw2_ref[...].astype(f32), preferred_element_type=f32)
        + ab2_ref[...], 0.0)                                         # (bm, H2)

    # fc_att (output dim 3, no softmax) on the otherwise-idle MXU; keeps the
    # XLU free of lane reductions.
    att = (jnp.dot(ah, wattT_ref[...].astype(f32), preferred_element_type=f32)
           + batt_ref[...])                                          # (bm, 3)

    # fused_feat = matmul(stack([a,t,v], dim=2), att.unsqueeze(2)).squeeze()
    # -> per-modality scale + add, using 128-aligned lane slices of mh1.
    a_h = mh1[:, 0 * H2:1 * H2]
    t_h = mh1[:, 1 * H2:2 * H2]
    v_h = mh1[:, 2 * H2:3 * H2]
    fused = a_h * att[:, 0:1] + t_h * att[:, 1:2] + v_h * att[:, 2:3]   # (bm, H2)

    # Identity-augmented packed head: [ I_H2 | fc_out_1 | fc_out_2 | 0 pad ].
    # One matmul emits the whole lane-dense slab (fused | emos | vals | pad).
    out_ref[...] = (jnp.dot(fused, whead_ref[...].astype(f32),
                            preferred_element_type=f32) + bhead_ref[...])


# ------------------------------ param packing ---------------------------------

def prepare_params(p, out1, out2, weight_dtype=jnp.bfloat16):
    """Build the fused-kernel parameter layout (once, outside the kernel).

    Weight matrices are stored in `weight_dtype` (bf16 by default: halves the
    dominant HBM->VMEM weight DMA); biases stay f32; all in-kernel matmuls
    accumulate in f32.
    """
    H1 = p['a_w1'].shape[1]
    H2 = p['a_w2'].shape[1]
    f32 = jnp.float32
    wd = weight_dtype

    # Layer 1 of the three modality MLPs -> one (D, 3*H1) weight.
    w1_cat = jnp.concatenate([p['a_w1'], p['t_w1'], p['v_w1']], axis=1)
    b1_cat = jnp.concatenate([p['a_b1'], p['t_b1'], p['v_b1']], axis=1)

    # Layer 2 -> block-diagonal (3*H1, 3*H2) weight: one matmul produces
    # multi_hidden1 directly (no in-kernel lane concat).
    w2_blk = jnp.zeros((3 * H1, 3 * H2), f32)
    w2_blk = w2_blk.at[0 * H1:1 * H1, 0 * H2:1 * H2].set(p['a_w2'])
    w2_blk = w2_blk.at[1 * H1:2 * H1, 1 * H2:2 * H2].set(p['t_w2'])
    w2_blk = w2_blk.at[2 * H1:3 * H1, 2 * H2:3 * H2].set(p['v_w2'])
    b2_cat = jnp.concatenate([p['a_b2'], p['t_b2'], p['v_b2']], axis=1)

    # fc_att transposed to (H2, 3) so it runs on the MXU.
    att_wT = p['fc_att_w'].T

    # Identity-augmented packed head: columns [0,H2)=identity (fused passthrough),
    # [H2, H2+out1)=fc_out_1, [H2+out1, H2+out1+out2)=fc_out_2, rest exact zeros.
    w_head = jnp.zeros((H2, H2 + HEAD_PAD), f32)
    w_head = w_head.at[:, :H2].set(jnp.eye(H2, dtype=f32))
    w_head = w_head.at[:, H2:H2 + out1].set(p['fc_e_w'])
    w_head = w_head.at[:, H2 + out1:H2 + out1 + out2].set(p['fc_v_w'])
    b_head = jnp.zeros((1, H2 + HEAD_PAD), f32)
    b_head = b_head.at[:, H2:H2 + out1].set(p['fc_e_b'])
    b_head = b_head.at[:, H2 + out1:H2 + out1 + out2].set(p['fc_v_b'])

    return dict(
        w1_cat=w1_cat.astype(wd), b1_cat=b1_cat.astype(f32),
        w2_blk=w2_blk.astype(wd), b2_cat=b2_cat.astype(f32),
        att_w1=p['att_w1'].astype(wd), att_b1=p['att_b1'].astype(f32),
        att_w2=p['att_w2'].astype(wd), att_b2=p['att_b2'].astype(f32),
        att_wT=att_wT.astype(wd), fc_att_b=p['fc_att_b'].astype(f32),
        w_head=w_head.astype(wd), b_head=b_head.astype(f32),
    )


# ------------------------------ wrapper ----------------------------------------

def attention_forward(x, q, *, H2, out1, out2, block_b=128):
    """Attention(x, x, x) as called by TextClassification: one fused pallas_call
    gridded over batch tiles with VMEM-resident weights."""
    B, D = x.shape
    bm = min(block_b, _round_up(B, 8))          # f32 needs 8-row sublane tiles
    B_pad = _round_up(B, bm)
    if B_pad != B:
        x = jnp.pad(x, ((0, B_pad - B), (0, 0)))
    nb = B_pad // bm

    weights = [q['w1_cat'], q['b1_cat'], q['w2_blk'], q['b2_cat'],
               q['att_w1'], q['att_b1'], q['att_w2'], q['att_b2'],
               q['att_wT'], q['fc_att_b'], q['w_head'], q['b_head']]

    H1 = q['att_w1'].shape[1]
    flops = 2 * B_pad * (D * 3 * H1 + 3 * H1 * 3 * H2 + 3 * H2 * H1
                         + H1 * H2 + H2 * 3 + H2 * (H2 + HEAD_PAD))
    bytes_accessed = (sum(int(w.size) * w.dtype.itemsize for w in weights)
                      + int(x.size) * x.dtype.itemsize
                      + B_pad * (H2 + HEAD_PAD) * 4)

    grid_spec = pltpu.PrefetchScalarGridSpec(
        num_scalar_prefetch=0,
        grid=(nb,),
        in_specs=([pl.BlockSpec((bm, D), lambda i: (i, 0))]
                  # Weights: full-shape blocks, constant index_map -> VMEM-resident
                  # across the batch grid (no re-DMA per tile).
                  + [pl.BlockSpec(w.shape, lambda i: (0, 0)) for w in weights]),
        out_specs=pl.BlockSpec((bm, H2 + HEAD_PAD), lambda i: (i, 0)),
    )

    out = pl.pallas_call(
        functools.partial(attention_fused_kernel, H2=H2),
        out_shape=jax.ShapeDtypeStruct((B_pad, H2 + HEAD_PAD), jnp.float32),
        grid_spec=grid_spec,
        compiler_params=pltpu.CompilerParams(
            dimension_semantics=("parallel",)),      # v7x: split batch across TCs
        cost_estimate=pl.CostEstimate(flops=flops, transcendentals=0,
                                      bytes_accessed=bytes_accessed),
    )(x, *weights)

    fused = out[:B, :H2]
    emos = out[:B, H2:H2 + out1]
    vals = out[:B, H2 + out1:H2 + out1 + out2]
    return fused, emos, vals


# ------------------------ reference (plain JAX) --------------------------------

def ref_forward(x, p):
    def mlp(z, w1, b1, w2, b2):
        h = jnp.maximum(z @ w1 + b1, 0.0)
        return jnp.maximum(h @ w2 + b2, 0.0)

    with jax.default_matmul_precision('highest'):
        a_h = mlp(x, p['a_w1'], p['a_b1'], p['a_w2'], p['a_b2'])
        t_h = mlp(x, p['t_w1'], p['t_b1'], p['t_w2'], p['t_b2'])
        v_h = mlp(x, p['v_w1'], p['v_b1'], p['v_w2'], p['v_b2'])
        mh1 = jnp.concatenate([a_h, t_h, v_h], axis=1)
        ah = mlp(mh1, p['att_w1'], p['att_b1'], p['att_w2'], p['att_b2'])
        att = ah @ p['fc_att_w'].T + p['fc_att_b']                   # (B, 3)
        mh2 = jnp.stack([a_h, t_h, v_h], axis=2)                     # (B, H2, 3)
        fused = jnp.einsum('bhk,bk->bh', mh2, att)
        emos = fused @ p['fc_e_w'] + p['fc_e_b']
        vals = fused @ p['fc_v_w'] + p['fc_v_b']
    return fused, emos, vals


# ------------------------------- params ----------------------------------------

def init_params(key, D, H1, H2, out1, out2):
    ks = iter(jax.random.split(key, 24))
    g = lambda shape, s=0.1: (s * jax.random.normal(next(ks), shape)).astype(jnp.float32)
    p = {}
    for m in ('a', 't', 'v'):                         # audio / text / video MLPs
        p[f'{m}_w1'] = g((D, H1)); p[f'{m}_b1'] = g((1, H1))
        p[f'{m}_w2'] = g((H1, H2)); p[f'{m}_b2'] = g((1, H2))
    p['att_w1'] = g((3 * H2, H1)); p['att_b1'] = g((1, H1))
    p['att_w2'] = g((H1, H2)); p['att_b2'] = g((1, H2))
    p['fc_att_w'] = g((3, H2)); p['fc_att_b'] = g((1, 3))            # torch (out, in)
    p['fc_e_w'] = g((H2, out1)); p['fc_e_b'] = g((1, out1))          # fc_out_1
    p['fc_v_w'] = g((H2, out2)); p['fc_v_b'] = g((1, out2))          # fc_out_2
    return p


# -------------------------------- main ------------------------------------------

if __name__ == "__main__":
    B = 8                     # batch
    D = 768                   # BERT hidden_size (audio_dim == text_dim == video_dim)
    H1, H2 = 256, 128         # layers='256,128'
    out1, out2 = 6, 1         # output_dim1, output_dim2

    key = jax.random.PRNGKey(0)
    kp, kx = jax.random.split(key)
    params = init_params(kp, D, H1, H2, out1, out2)
    # Stand-in for the BertModel pooler_output (tanh-bounded like the real pooler).
    x = jnp.tanh(jax.random.normal(kx, (B, D), jnp.float32))

    q = prepare_params(params, out1, out2, weight_dtype=jnp.bfloat16)
    fused, emos, vals = jax.block_until_ready(
        attention_forward(x, q, H2=H2, out1=out1, out2=out2))

    assert fused.shape == (B, H2) and emos.shape == (B, out1) and vals.shape == (B, out2)

    # Strict check: reference run with the SAME bf16-rounded weights (isolates
    # kernel math from the deliberate bf16 weight quantization).
    p_bf = {k: (v if '_b' in k else v.astype(jnp.bfloat16).astype(jnp.float32))
            for k, v in params.items()}
    rf, re, rv = ref_forward(x, p_bf)
    assert jnp.allclose(fused, rf, rtol=2e-3, atol=2e-3)
    assert jnp.allclose(emos, re, rtol=2e-3, atol=2e-3)
    assert jnp.allclose(vals, rv, rtol=2e-3, atol=2e-3)

    # Loose sanity check vs the full-f32 reference (residual = bf16 weight quant).
    rf32, re32, rv32 = ref_forward(x, params)
    assert jnp.allclose(fused, rf32, rtol=5e-2, atol=5e-1)
    assert jnp.allclose(emos, re32, rtol=5e-2, atol=5e-1)
    assert jnp.allclose(vals, rv32, rtol=5e-2, atol=5e-1)

    print("KERNEL_OK")
</pallas_src>

<mosaic_0001>
module attributes {stable_mosaic.version = 11 : i64} {
  func.func @attention_fused_kernel(%arg0: i32, %arg1: memref<8x768xf32, #tpu.memory_space<vmem>>, %arg2: memref<768x768xbf16, #tpu.memory_space<vmem>>, %arg3: memref<1x768xf32, #tpu.memory_space<vmem>>, %arg4: memref<768x384xbf16, #tpu.memory_space<vmem>>, %arg5: memref<1x384xf32, #tpu.memory_space<vmem>>, %arg6: memref<384x256xbf16, #tpu.memory_space<vmem>>, %arg7: memref<1x256xf32, #tpu.memory_space<vmem>>, %arg8: memref<256x128xbf16, #tpu.memory_space<vmem>>, %arg9: memref<1x128xf32, #tpu.memory_space<vmem>>, %arg10: memref<128x3xbf16, #tpu.memory_space<vmem>>, %arg11: memref<1x3xf32, #tpu.memory_space<vmem>>, %arg12: memref<128x256xbf16, #tpu.memory_space<vmem>>, %arg13: memref<1x256xf32, #tpu.memory_space<vmem>>, %arg14: memref<8x256xf32, #tpu.memory_space<vmem>>) attributes {dimension_semantics = [#tpu.dimension_semantics<parallel>], iteration_bounds = array<i64: 1>, scalar_prefetch = 0 : i64, scratch_operands = 0 : i64, tpu.core_type = #tpu.core_type<tc>, window_params = [{transform_indices = @transform_0, window_bounds = array<i64: 8, 768>}, {pipeline_mode = #tpu.pipeline_mode<synchronous>, transform_indices = @transform_1, window_bounds = array<i64: 768, 768>}, {pipeline_mode = #tpu.pipeline_mode<synchronous>, transform_indices = @transform_2, window_bounds = array<i64: 1, 768>}, {pipeline_mode = #tpu.pipeline_mode<synchronous>, transform_indices = @transform_3, window_bounds = array<i64: 768, 384>}, {pipeline_mode = #tpu.pipeline_mode<synchronous>, transform_indices = @transform_4, window_bounds = array<i64: 1, 384>}, {pipeline_mode = #tpu.pipeline_mode<synchronous>, transform_indices = @transform_5, window_bounds = array<i64: 384, 256>}, {pipeline_mode = #tpu.pipeline_mode<synchronous>, transform_indices = @transform_6, window_bounds = array<i64: 1, 256>}, {pipeline_mode = #tpu.pipeline_mode<synchronous>, transform_indices = @transform_7, window_bounds = array<i64: 256, 128>}, {pipeline_mode = #tpu.pipeline_mode<synchronous>, transform_indices = @transform_8, window_bounds = array<i64: 1, 128>}, {pipeline_mode = #tpu.pipeline_mode<synchronous>, transform_indices = @transform_9, window_bounds = array<i64: 128, 3>}, {pipeline_mode = #tpu.pipeline_mode<synchronous>, transform_indices = @transform_10, window_bounds = array<i64: 1, 3>}, {pipeline_mode = #tpu.pipeline_mode<synchronous>, transform_indices = @transform_11, window_bounds = array<i64: 128, 256>}, {pipeline_mode = #tpu.pipeline_mode<synchronous>, transform_indices = @transform_12, window_bounds = array<i64: 1, 256>}, {transform_indices = @transform_13, window_bounds = array<i64: 8, 256>}]} {
    %c0 = arith.constant 0 : index
    %c0_0 = arith.constant 0 : index
    %0 = vector.load %arg1[%c0, %c0_0] : memref<8x768xf32, #tpu.memory_space<vmem>>, vector<8x768xf32>
    %c0_1 = arith.constant 0 : index
    %c0_2 = arith.constant 0 : index
    %1 = vector.load %arg2[%c0_1, %c0_2] : memref<768x768xbf16, #tpu.memory_space<vmem>>, vector<768x768xbf16>
    %2 = arith.extf %1 : vector<768x768xbf16> to vector<768x768xf32>
    %cst = arith.constant dense<0.000000e+00> : vector<8x768xf32>
    %3 = tpu.matmul %0, %2, %cst {dimension_numbers = #tpu.dot_dimension_numbers<[1], [0], [0], [1], [0, 0, 1, 1], [], []>} : vector<8x768xf32>, vector<768x768xf32>, vector<8x768xf32> -> vector<8x768xf32>
    %c0_3 = arith.constant 0 : index
    %c0_4 = arith.constant 0 : index
    %4 = vector.load %arg3[%c0_3, %c0_4] : memref<1x768xf32, #tpu.memory_space<vmem>>, vector<1x768xf32>
    %5 = vector.broadcast %4 : vector<1x768xf32> to vector<8x768xf32>
    %6 = arith.addf %3, %5 : vector<8x768xf32>
    %cst_5 = arith.constant 0.000000e+00 : f32
    %7 = vector.broadcast %cst_5 : f32 to vector<8x768xf32>
    %8 = arith.maximumf %6, %7 : vector<8x768xf32>
    %c0_6 = arith.constant 0 : index
    %c0_7 = arith.constant 0 : index
    %9 = vector.load %arg4[%c0_6, %c0_7] : memref<768x384xbf16, #tpu.memory_space<vmem>>, vector<768x384xbf16>
    %10 = arith.extf %9 : vector<768x384xbf16> to vector<768x384xf32>
    %cst_8 = arith.constant dense<0.000000e+00> : vector<8x384xf32>
    %11 = tpu.matmul %8, %10, %cst_8 {dimension_numbers = #tpu.dot_dimension_numbers<[1], [0], [0], [1], [0, 0, 1, 1], [], []>} : vector<8x768xf32>, vector<768x384xf32>, vector<8x384xf32> -> vector<8x384xf32>
    %c0_9 = arith.constant 0 : index
    %c0_10 = arith.constant 0 : index
    %12 = vector.load %arg5[%c0_9, %c0_10] : memref<1x384xf32, #tpu.memory_space<vmem>>, vector<1x384xf32>
    %13 = vector.broadcast %12 : vector<1x384xf32> to vector<8x384xf32>
    %14 = arith.addf %11, %13 : vector<8x384xf32>
    %cst_11 = arith.constant 0.000000e+00 : f32
    %15 = vector.broadcast %cst_11 : f32 to vector<8x384xf32>
    %16 = arith.maximumf %14, %15 : vector<8x384xf32>
    %c0_12 = arith.constant 0 : index
    %c0_13 = arith.constant 0 : index
    %17 = vector.load %arg6[%c0_12, %c0_13] : memref<384x256xbf16, #tpu.memory_space<vmem>>, vector<384x256xbf16>
    %18 = arith.extf %17 : vector<384x256xbf16> to vector<384x256xf32>
    %cst_14 = arith.constant dense<0.000000e+00> : vector<8x256xf32>
    %19 = tpu.matmul %16, %18, %cst_14 {dimension_numbers = #tpu.dot_dimension_numbers<[1], [0], [0], [1], [0, 0, 1, 1], [], []>} : vector<8x384xf32>, vector<384x256xf32>, vector<8x256xf32> -> vector<8x256xf32>
    %c0_15 = arith.constant 0 : index
    %c0_16 = arith.constant 0 : index
    %20 = vector.load %arg7[%c0_15, %c0_16] : memref<1x256xf32, #tpu.memory_space<vmem>>, vector<1x256xf32>
    %21 = vector.broadcast %20 : vector<1x256xf32> to vector<8x256xf32>
    %22 = arith.addf %19, %21 : vector<8x256xf32>
    %cst_17 = arith.constant 0.000000e+00 : f32
    %23 = vector.broadcast %cst_17 : f32 to vector<8x256xf32>
    %24 = arith.maximumf %22, %23 : vector<8x256xf32>
    %c0_18 = arith.constant 0 : index
    %c0_19 = arith.constant 0 : index
    %25 = vector.load %arg8[%c0_18, %c0_19] : memref<256x128xbf16, #tpu.memory_space<vmem>>, vector<256x128xbf16>
    %26 = arith.extf %25 : vector<256x128xbf16> to vector<256x128xf32>
    %cst_20 = arith.constant dense<0.000000e+00> : vector<8x128xf32>
    %27 = tpu.matmul %24, %26, %cst_20 {dimension_numbers = #tpu.dot_dimension_numbers<[1], [0], [0], [1], [0, 0, 1, 1], [], []>} : vector<8x256xf32>, vector<256x128xf32>, vector<8x128xf32> -> vector<8x128xf32>
    %c0_21 = arith.constant 0 : index
    %c0_22 = arith.constant 0 : index
    %28 = vector.load %arg9[%c0_21, %c0_22] : memref<1x128xf32, #tpu.memory_space<vmem>>, vector<1x128xf32>
    %29 = vector.broadcast %28 : vector<1x128xf32> to vector<8x128xf32>
    %30 = arith.addf %27, %29 : vector<8x128xf32>
    %cst_23 = arith.constant 0.000000e+00 : f32
    %31 = vector.broadcast %cst_23 : f32 to vector<8x128xf32>
    %32 = arith.maximumf %30, %31 : vector<8x128xf32>
    %c0_24 = arith.constant 0 : index
    %c0_25 = arith.constant 0 : index
    %33 = vector.load %arg10[%c0_24, %c0_25] : memref<128x3xbf16, #tpu.memory_space<vmem>>, vector<128x3xbf16>
    %34 = arith.extf %33 : vector<128x3xbf16> to vector<128x3xf32>
    %cst_26 = arith.constant dense<0.000000e+00> : vector<8x3xf32>
    %35 = tpu.matmul %32, %34, %cst_26 {dimension_numbers = #tpu.dot_dimension_numbers<[1], [0], [0], [1], [0, 0, 1, 1], [], []>} : vector<8x128xf32>, vector<128x3xf32>, vector<8x3xf32> -> vector<8x3xf32>
    %c0_27 = arith.constant 0 : index
    %c0_28 = arith.constant 0 : index
    %36 = vector.load %arg11[%c0_27, %c0_28] : memref<1x3xf32, #tpu.memory_space<vmem>>, vector<1x3xf32>
    %37 = vector.broadcast %36 : vector<1x3xf32> to vector<8x3xf32>
    %38 = arith.addf %35, %37 : vector<8x3xf32>
    %39 = vector.extract_strided_slice %16 {offsets = [0, 0], sizes = [8, 128], strides = [1, 1]} : vector<8x384xf32> to vector<8x128xf32>
    %40 = vector.extract_strided_slice %16 {offsets = [0, 128], sizes = [8, 128], strides = [1, 1]} : vector<8x384xf32> to vector<8x128xf32>
    %41 = vector.extract_strided_slice %16 {offsets = [0, 256], sizes = [8, 128], strides = [1, 1]} : vector<8x384xf32> to vector<8x128xf32>
    %42 = vector.extract_strided_slice %38 {offsets = [0, 0], sizes = [8, 1], strides = [1, 1]} : vector<8x3xf32> to vector<8x1xf32>
    %43 = vector.broadcast %42 : vector<8x1xf32> to vector<8x128xf32>
    %44 = arith.mulf %39, %43 : vector<8x128xf32>
    %45 = vector.extract_strided_slice %38 {offsets = [0, 1], sizes = [8, 1], strides = [1, 1]} : vector<8x3xf32> to vector<8x1xf32>
    %46 = vector.broadcast %45 : vector<8x1xf32> to vector<8x128xf32>
    %47 = arith.mulf %40, %46 : vector<8x128xf32>
    %48 = arith.addf %44, %47 : vector<8x128xf32>
    %49 = vector.extract_strided_slice %38 {offsets = [0, 2], sizes = [8, 1], strides = [1, 1]} : vector<8x3xf32> to vector<8x1xf32>
    %50 = vector.broadcast %49 : vector<8x1xf32> to vector<8x128xf32>
    %51 = arith.mulf %41, %50 : vector<8x128xf32>
    %52 = arith.addf %48, %51 : vector<8x128xf32>
    %c0_29 = arith.constant 0 : index
    %c0_30 = arith.constant 0 : index
    %53 = vector.load %arg12[%c0_29, %c0_30] : memref<128x256xbf16, #tpu.memory_space<vmem>>, vector<128x256xbf16>
    %54 = arith.extf %53 : vector<128x256xbf16> to vector<128x256xf32>
    %cst_31 = arith.constant dense<0.000000e+00> : vector<8x256xf32>
    %55 = tpu.matmul %52, %54, %cst_31 {dimension_numbers = #tpu.dot_dimension_numbers<[1], [0], [0], [1], [0, 0, 1, 1], [], []>} : vector<8x128xf32>, vector<128x256xf32>, vector<8x256xf32> -> vector<8x256xf32>
    %c0_32 = arith.constant 0 : index
    %c0_33 = arith.constant 0 : index
    %56 = vector.load %arg13[%c0_32, %c0_33] : memref<1x256xf32, #tpu.memory_space<vmem>>, vector<1x256xf32>
    %57 = vector.broadcast %56 : vector<1x256xf32> to vector<8x256xf32>
    %58 = arith.addf %55, %57 : vector<8x256xf32>
    %c0_34 = arith.constant 0 : index
    %c0_35 = arith.constant 0 : index
    %59 = vector.load %arg14[%c0_34, %c0_35] : memref<8x256xf32, #tpu.memory_space<vmem>>, vector<8x256xf32>
    tpu.vector_store %arg14[%c0_34, %c0_35], %58 {strides = array<i32>} : memref<8x256xf32, #tpu.memory_space<vmem>>, vector<8x256xf32>,
    return
  }
  func.func @transform_0(%arg0: i32) -> (i32, i32) {
    %c0_i32 = arith.constant 0 : i32
    %c0_i32_0 = arith.constant 0 : i32
    return %arg0, %c0_i32 : i32, i32
  }
  func.func @transform_1(%arg0: i32) -> (i32, i32) {
    %c0_i32 = arith.constant 0 : i32
    %c0_i32_0 = arith.constant 0 : i32
    %c0_i32_1 = arith.constant 0 : i32
    return %c0_i32, %c0_i32_0 : i32, i32
  }
  func.func @transform_2(%arg0: i32) -> (i32, i32) {
    %c0_i32 = arith.constant 0 : i32
    %c0_i32_0 = arith.constant 0 : i32
    %c0_i32_1 = arith.constant 0 : i32
    return %c0_i32, %c0_i32_0 : i32, i32
  }
  func.func @transform_3(%arg0: i32) -> (i32, i32) {
    %c0_i32 = arith.constant 0 : i32
    %c0_i32_0 = arith.constant 0 : i32
    %c0_i32_1 = arith.constant 0 : i32
    return %c0_i32, %c0_i32_0 : i32, i32
  }
  func.func @transform_4(%arg0: i32) -> (i32, i32) {
    %c0_i32 = arith.constant 0 : i32
    %c0_i32_0 = arith.constant 0 : i32
    %c0_i32_1 = arith.constant 0 : i32
    return %c0_i32, %c0_i32_0 : i32, i32
  }
  func.func @transform_5(%arg0: i32) -> (i32, i32) {
    %c0_i32 = arith.constant 0 : i32
    %c0_i32_0 = arith.constant 0 : i32
    %c0_i32_1 = arith.constant 0 : i32
    return %c0_i32, %c0_i32_0 : i32, i32
  }
  func.func @transform_6(%arg0: i32) -> (i32, i32) {
    %c0_i32 = arith.constant 0 : i32
    %c0_i32_0 = arith.constant 0 : i32
    %c0_i32_1 = arith.constant 0 : i32
    return %c0_i32, %c0_i32_0 : i32, i32
  }
  func.func @transform_7(%arg0: i32) -> (i32, i32) {
    %c0_i32 = arith.constant 0 : i32
    %c0_i32_0 = arith.constant 0 : i32
    %c0_i32_1 = arith.constant 0 : i32
    return %c0_i32, %c0_i32_0 : i32, i32
  }
  func.func @transform_8(%arg0: i32) -> (i32, i32) {
    %c0_i32 = arith.constant 0 : i32
    %c0_i32_0 = arith.constant 0 : i32
    %c0_i32_1 = arith.constant 0 : i32
    return %c0_i32, %c0_i32_0 : i32, i32
  }
  func.func @transform_9(%arg0: i32) -> (i32, i32) {
    %c0_i32 = arith.constant 0 : i32
    %c0_i32_0 = arith.constant 0 : i32
    %c0_i32_1 = arith.constant 0 : i32
    return %c0_i32, %c0_i32_0 : i32, i32
  }
  func.func @transform_10(%arg0: i32) -> (i32, i32) {
    %c0_i32 = arith.constant 0 : i32
    %c0_i32_0 = arith.constant 0 : i32
    %c0_i32_1 = arith.constant 0 : i32
    return %c0_i32, %c0_i32_0 : i32, i32
  }
  func.func @transform_11(%arg0: i32) -> (i32, i32) {
    %c0_i32 = arith.constant 0 : i32
    %c0_i32_0 = arith.constant 0 : i32
    %c0_i32_1 = arith.constant 0 : i32
    return %c0_i32, %c0_i32_0 : i32, i32
  }
  func.func @transform_12(%arg0: i32) -> (i32, i32) {
    %c0_i32 = arith.constant 0 : i32
    %c0_i32_0 = arith.constant 0 : i32
    %c0_i32_1 = arith.constant 0 : i32
    return %c0_i32, %c0_i32_0 : i32, i32
  }
  func.func @transform_13(%arg0: i32) -> (i32, i32) {
    %c0_i32 = arith.constant 0 : i32
    %c0_i32_0 = arith.constant 0 : i32
    return %arg0, %c0_i32 : i32, i32
  }
}

</mosaic_0001>

<bundles_post_ra>
// kernel: tpu_custom_call.1
= control target key start
LH: loop header
LB: loop body
LE: loop exit
PB: predicated region body
PF: predicated region fallthrough
CT: control target
= control target key end

     0   :  { %18 = vsyncpa [#allocation3], 0  ;;  %s4305_s0 = inlined_call_operand.hbm [shape: f32[8,768], index: 0, kind: input, shape index: {}]   ;;  %s4306_s1 = inlined_call_operand.hbm [shape: bf16[768,768], index: 1, kind: input, shape index: {}]   ;;  %s4307_s2 = inlined_call_operand.hbm [shape: f32[1,768], index: 2, kind: input, shape index: {}]   ;;  %s4308_s3 = inlined_call_operand.hbm [shape: bf16[768,384], index: 3, kind: input, shape index: {}]   ;;  %s4309_s4 = inlined_call_operand.hbm [shape: f32[1,384], index: 4, kind: input, shape index: {}]   ;;  %s4310_s5 = inlined_call_operand.hbm [shape: bf16[384,256], index: 5, kind: input, shape index: {}]   ;;  %s4311_s6 = inlined_call_operand.hbm [shape: f32[1,256], index: 6, kind: input, shape index: {}]   ;;  %s4312_s7 = inlined_call_operand.hbm [shape: bf16[256,128], index: 7, kind: input, shape index: {}]   ;;  %s4313_s8 = inlined_call_operand.hbm [shape: f32[1,128], index: 8, kind: input, shape index: {}]   ;;  %s4314_s9 = inlined_call_operand.vmem [shape: bf16[128,3], index: 9, kind: input, shape index: {}]   ;;  %s4315_s10 = inlined_call_operand.hbm [shape: f32[1,3], index: 10, kind: input, shape index: {}]   ;;  %s4316_s11 = inlined_call_operand.hbm [shape: bf16[128,256], index: 11, kind: input, shape index: {}]   ;;  %s4317_s12 = inlined_call_operand.hbm [shape: f32[1,256], index: 12, kind: input, shape index: {}]   ;;  %s4318_s13 = inlined_call_operand.hbm [shape: f32[8,256], index: 13, kind: output, shape index: {}]  }
   0x1   :  { %19 = vsyncpa [#allocation6], 0 }
   0x2   :  { %20 = vsyncpa [#allocation9], 0 }
   0x3   :  { %21 = vsyncpa [#allocation12], 0 }
   0x4   :  { %22 = vsyncpa [#allocation15], 0 }
   0x5   :  { %23 = vsyncpa [#allocation18], 0 }
   0x6   :  { %24 = vsyncpa [#allocation21], 0 }
   0x7   :  { %25 = vsyncpa [#allocation4], 0  ;;  %s4012_s25 = smov [#allocation5]  }
   0x8   :  { %s41_s26 = sshll.u32 %s4012_s25, 4  ;;  %s42_s26 = int_to_ptr.vmem [resolvable:$true] %s41_s26 }
   0x9   :  { %s3744_s27 = scalar_lea.vmem %s42_s26, 36864  ;;  %p3749_p1 = scmp.lt.s32.totalorder %s42_s26, %s42_s26 }
   0xa   :  { %p3745_p0 = scmp.ne.s32.totalorder %s42_s26, %s3744_s27  ;;  %p3750_p2 = scmp.lt.s32.totalorder %s3744_s27, %s3744_s27 }
   0xc   :  { %p3751_p3 = por %p3750_p2, %p3749_p1 }
   0xe   :  { %p3752_p4 = pnand %p3751_p3, %p3745_p0 }
  0x10   :  { %3755 = shalt.err (!%p3752_p4)
}
  0x11   :  { %s4013_s28 = smov 384   ;;  %s4014_s29 = smov 24  }
  0x12   :  { %47 = dma.hbm_to_vmem [thread:$0]  %s4306_s1, 36864, %s42_s26, [#allocation6], %s4013_s28, %s4013_s28, %s4014_s29  }
  0x13   :  { %s4015_s15 = smov [#allocation8]  }
  0x14   :  { %s63_s16 = sshll.u32 %s4015_s15, 4  ;;  %s64_s16 = int_to_ptr.vmem [resolvable:$true] %s63_s16 }
  0x15   :  { %s3764_s17 = scalar_lea.vmem %s64_s16, 18432  ;;  %p3769_p6 = scmp.lt.s32.totalorder %s64_s16, %s64_s16 }
  0x16   :  { %p3765_p5 = scmp.ne.s32.totalorder %s64_s16, %s3764_s17  ;;  %p3770_p7 = scmp.lt.s32.totalorder %s3764_s17, %s3764_s17 }
  0x18   :  { %p3771_p8 = por %p3770_p7, %p3769_p6 }
  0x1a   :  { %p3772_p9 = pnand %p3771_p8, %p3765_p5 }
  0x1c   :  { %3775 = shalt.err (!%p3772_p9)
}
  0x1d   :  { %s4016_s18 = smov 192   ;;  %s4017_s19 = smov 12  }
  0x1e   :  { %69 = dma.hbm_to_vmem [thread:$0]  %s4308_s3, 18432, %s64_s16, [#allocation9], %s4016_s18, %s4016_s18, %s4017_s19  }
  0x1f   :  { %s4018_s22 = smov [#allocation11]  }
  0x20   :  { %s85_s23 = sshll.u32 %s4018_s22, 4  ;;  %s86_s23 = int_to_ptr.vmem [resolvable:$true] %s85_s23 }
  0x21   :  { %s3784_s1 = scalar_lea.vmem %s86_s23, 6144  ;;  %p3789_p11 = scmp.lt.s32.totalorder %s86_s23, %s86_s23 }
  0x22   :  { %p3785_p10 = scmp.ne.s32.totalorder %s86_s23, %s3784_s1  ;;  %p3790_p12 = scmp.lt.s32.totalorder %s3784_s1, %s3784_s1 }
  0x24   :  { %p3791_p13 = por %p3790_p12, %p3789_p11 }
  0x26   :  { %p3792_p0 = pnand %p3791_p13, %p3785_p10 }
  0x28   :  { %3795 = shalt.err (!%p3792_p0)
}
  0x29   :  { %s4019_s24 = smov 128   ;;  %s4020_s25 = smov 8  }
  0x2a   :  { %91 = dma.hbm_to_vmem [thread:$0]  %s4310_s5, 6144, %s86_s23, [#allocation12], %s4019_s24, %s4019_s24, %s4020_s25  }
  0x2b   :  { %s4021_s3 = smov [#allocation14]  }
  0x2c   :  { %s107_s28 = sshll.u32 %s4021_s3, 4  ;;  %s108_s28 = int_to_ptr.vmem [resolvable:$true] %s107_s28 }
  0x2d   :  { %s3804_s29 = scalar_lea.vmem %s108_s28, 2048  ;;  %p3809_p2 = scmp.lt.s32.totalorder %s108_s28, %s108_s28 }
  0x2e   :  { %p3805_p1 = scmp.ne.s32.totalorder %s108_s28, %s3804_s29  ;;  %p3810_p3 = scmp.lt.s32.totalorder %s3804_s29, %s3804_s29 }
  0x30   :  { %p3811_p4 = por %p3810_p3, %p3809_p2 }
  0x32   :  { %p3812_p5 = pnand %p3811_p4, %p3805_p1 }
  0x34   :  { %3815 = shalt.err (!%p3812_p5)
}
  0x35   :  { %s4022_s30 = smov 64   ;;  %s4023_s14 = smov 4  }
  0x36   :  { %113 = dma.hbm_to_vmem [thread:$0]  %s4312_s7, 2048, %s108_s28, [#allocation15], %s4022_s30, %s4022_s30, %s4023_s14  }
  0x37   :  { %s4024_s17 = smov [#allocation17]   ;;  %s4025_s19 = smov [#allocation2]  }
  0x38   :  { %s132_s18 = sshll.u32 %s4024_s17, 4  ;;  %s32_s5 = sshll.u32 %s4025_s19, 4  ;;  %s133_s18 = int_to_ptr.vmem [resolvable:$true] %s132_s18  ;;  %s33_s5 = int_to_ptr.vmem [resolvable:$true] %s32_s5 }
  0x39   :  { %s3824_s20 = scalar_lea.vmem %s133_s18, 16  ;;  %s3828_s21 = scalar_lea.vmem %s133_s18, 32 }
  0x3a   :  { %p3825_p6 = scmp.ne.s32.totalorder %s133_s18, %s3824_s20  ;;  %p3829_p7 = scmp.lt.s32.totalorder %s133_s18, %s133_s18 }
  0x3b   :  { %p3830_p8 = scmp.lt.s32.totalorder %s3828_s21, %s3824_s20 }
  0x3d   :  { %p3831_p9 = por %p3830_p8, %p3829_p7 }
  0x3f   :  { %p3832_p10 = pnand %p3831_p9, %p3825_p6 }
  0x41   :  { %3835 = shalt.err (!%p3832_p10)
}
  0x42   :  { %135 = dma.hbm_to_vmem [thread:$0]  %s4315_s10, 16, %s133_s18, [#allocation18]  }
  0x43   :  { %s3844_s1 = scalar_lea.vmem %s33_s5, 768  ;;  %p3849_p12 = scmp.lt.s32.totalorder %s33_s5, %s33_s5 }
  0x44   :  { %p3845_p11 = scmp.ne.s32.totalorder %s33_s5, %s3844_s1  ;;  %p3850_p13 = scmp.lt.s32.totalorder %s3844_s1, %s3844_s1 }
  0x46   :  { %p3851_p0 = por %p3850_p13, %p3849_p12 }
  0x48   :  { %p3852_p1 = pnand %p3851_p0, %p3845_p11 }
  0x4a   :  { %3855 = shalt.err (!%p3852_p1)
}
  0x4b   :  { %35 = dma.hbm_to_vmem [thread:$0]  %s4305_s0, 768, %s33_s5, [#allocation3]  }
  0x4c   :  { %s4026_s27 = smov [#allocation7]   ;;  %s4027_s28 = smov [#allocation10]  }
  0x4d   :  { %s54_s3 = sshll.u32 %s4026_s27, 4  ;;  %s76_s29 = sshll.u32 %s4027_s28, 4  ;;  %s55_s3 = int_to_ptr.vmem [resolvable:$true] %s54_s3  ;;  %s77_s29 = int_to_ptr.vmem [resolvable:$true] %s76_s29 }
  0x4e   :  { %s3864_s30 = scalar_lea.vmem %s55_s3, 96  ;;  %p3869_p3 = scmp.lt.s32.totalorder %s55_s3, %s55_s3 }
  0x4f   :  { %p3865_p2 = scmp.ne.s32.totalorder %s55_s3, %s3864_s30  ;;  %p3870_p4 = scmp.lt.s32.totalorder %s3864_s30, %s3864_s30 }
  0x51   :  { %p3871_p5 = por %p3870_p4, %p3869_p3 }
  0x53   :  { %p3872_p6 = pnand %p3871_p5, %p3865_p2 }
  0x55   :  { %3875 = shalt.err (!%p3872_p6)
}
  0x56   :  { %57 = dma.hbm_to_vmem [thread:$0]  %s4307_s2, 96, %s55_s3, [#allocation6]  }
  0x57   :  { %s3884_s15 = scalar_lea.vmem %s77_s29, 48  ;;  %s3888_s0 = scalar_lea.vmem %s77_s29, 64 }
  0x58   :  { %p3885_p7 = scmp.ne.s32.totalorder %s77_s29, %s3884_s15  ;;  %p3889_p8 = scmp.lt.s32.totalorder %s77_s29, %s77_s29 }
  0x59   :  { %p3890_p9 = scmp.lt.s32.totalorder %s3888_s0, %s3884_s15 }
  0x5b   :  { %p3891_p10 = por %p3890_p9, %p3889_p8 }
  0x5d   :  { %p3892_p11 = pnand %p3891_p10, %p3885_p7 }
  0x5f   :  { %3895 = shalt.err (!%p3892_p11)
}
  0x60   :  { %79 = dma.hbm_to_vmem [thread:$0]  %s4309_s4, 48, %s77_s29, [#allocation9]  }
  0x61   :  { %s4028_s18 = smov [#allocation13]   ;;  %s4029_s5 = smov [#allocation16]  }
  0x62   :  { %s98_s19 = sshll.u32 %s4028_s18, 4  ;;  %s120_s20 = sshll.u32 %s4029_s5, 4  ;;  %s99_s19 = int_to_ptr.vmem [resolvable:$true] %s98_s19  ;;  %s121_s20 = int_to_ptr.vmem [resolvable:$true] %s120_s20 }
  0x63   :  { %s3904_s21 = scalar_lea.vmem %s99_s19, 32  ;;  %p3909_p13 = scmp.lt.s32.totalorder %s99_s19, %s99_s19 }
  0x64   :  { %p3905_p12 = scmp.ne.s32.totalorder %s99_s19, %s3904_s21  ;;  %p3910_p0 = scmp.lt.s32.totalorder %s3904_s21, %s3904_s21 }
  0x66   :  { %p3911_p1 = por %p3910_p0, %p3909_p13 }
  0x68   :  { %p3912_p2 = pnand %p3911_p1, %p3905_p12 }
  0x6a   :  { %3915 = shalt.err (!%p3912_p2)
}
  0x6b   :  { %101 = dma.hbm_to_vmem [thread:$0]  %s4311_s6, 32, %s99_s19, [#allocation12]  }
  0x6c   :  { %s3924_s23 = scalar_lea.vmem %s121_s20, 16  ;;  %s3928_s4 = scalar_lea.vmem %s121_s20, 32 }
  0x6d   :  { %p3925_p3 = scmp.ne.s32.totalorder %s121_s20, %s3924_s23  ;;  %p3929_p4 = scmp.lt.s32.totalorder %s121_s20, %s121_s20 }
  0x6e   :  { %p3930_p5 = scmp.lt.s32.totalorder %s3928_s4, %s3924_s23 }
  0x70   :  { %p3931_p6 = por %p3930_p5, %p3929_p4 }
  0x72   :  { %p3932_p7 = pnand %p3931_p6, %p3925_p3 }
  0x74   :  { %3935 = shalt.err (!%p3932_p7)
}
  0x75   :  { %123 = dma.hbm_to_vmem [thread:$0]  %s4313_s8, 16, %s121_s20, [#allocation15]  }
  0x76   :  { %s4030_s26 = smov [#allocation19]   ;;  %s4031_s3 = smov [#allocation20]  }
  0x77   :  { %s141_s27 = sshll.u32 %s4030_s26, 4  ;;  %s154_s28 = sshll.u32 %s4031_s3, 4  ;;  %s142_s27 = int_to_ptr.vmem [resolvable:$true] %s141_s27  ;;  %s155_s28 = int_to_ptr.vmem [resolvable:$true] %s154_s28 }
  0x78   :  { %s3944_s29 = scalar_lea.vmem %s142_s27, 2048  ;;  %p3949_p9 = scmp.lt.s32.totalorder %s142_s27, %s142_s27 }
  0x79   :  { %p3945_p8 = scmp.ne.s32.totalorder %s142_s27, %s3944_s29  ;;  %p3950_p10 = scmp.lt.s32.totalorder %s3944_s29, %s3944_s29 }
  0x7b   :  { %p3951_p11 = por %p3950_p10, %p3949_p9 }
  0x7d   :  { %p3952_p12 = pnand %p3951_p11, %p3945_p8 }
  0x7f   :  { %3955 = shalt.err (!%p3952_p12)
}
  0x80   :  { %147 = dma.hbm_to_vmem [thread:$0]  %s4316_s11, 2048, %s142_s27, [#allocation18], %s4019_s24, %s4019_s24, %s4020_s25  }
  0x81   :  { %s3964_s8 = scalar_lea.vmem %s155_s28, 32  ;;  %p3969_p0 = scmp.lt.s32.totalorder %s155_s28, %s155_s28 }
  0x82   :  { %p3965_p13 = scmp.ne.s32.totalorder %s155_s28, %s3964_s8  ;;  %p3970_p1 = scmp.lt.s32.totalorder %s3964_s8, %s3964_s8 }
  0x84   :  { %p3971_p2 = por %p3970_p1, %p3969_p0 }
  0x86   :  { %p3972_p3 = pnand %p3971_p2, %p3965_p13 }
  0x88   :  { %3975 = shalt.err (!%p3972_p3)
}
  0x89   :  { %157 = dma.hbm_to_vmem [thread:$0]  %s4317_s12, 32, %s155_s28, [#allocation21]  }
  0x8a   :  { %3996 = dma.done.wait [#allocation3], 768  }
  0x8b   :  { %3997 = vsyncadd [#allocation3], 4294966528 }
  0x8c   :  { %3998 = dma.done.wait [#allocation6], 36960  }
  0x8d   :  { %3999 = vsyncadd [#allocation6], 4294930336 }
  0x8e   :  { %4000 = dma.done.wait [#allocation9], 18480  }
  0x8f   :  { %4001 = vsyncadd [#allocation9], 4294948816 }
  0x90   :  { %4002 = dma.done.wait [#allocation12], 6176  }
  0x91   :  { %4003 = vsyncadd [#allocation12], 4294961120 }
  0x92   :  { %4004 = dma.done.wait [#allocation15], 2064  }
  0x93   :  { %4005 = vsyncadd [#allocation15], 4294965232 }
  0x94   :  { %4006 = dma.done.wait [#allocation18], 2064  }
  0x95   :  { %4007 = vsyncadd [#allocation18], 4294965232 }
  0x96   :  { %4008 = dma.done.wait [#allocation21], 32  }
  0x97   :  { %4009 = vsyncadd [#allocation21], 4294967264  ;;  %v245_v0 = vld [vmem:[#allocation5 + $0x168] sm:$0xff]  ;;  %v242_v1 = vld [vmem:[#allocation5 + $0x150] sm:$0xff]  ;;  %vm4033_vm0 = vmmov 0  }
  0x98   :  { %v341_v2 = vld [vmem:[#allocation5 + $0x468] sm:$0xff]  ;;  %v579_v3 = vunpack.c.h.bf16 %v245_v0  ;;  %v578_v4 = vunpack.c.l.bf16 %v245_v0  ;;  %v573_v5 = vunpack.c.h.bf16 %v242_v1  ;;  %v239_v7 = vld [vmem:[#allocation5 + $0x138] sm:$0xff]  ;;  %v338_v8 = vld [vmem:[#allocation5 + $0x450] sm:$0xff]  ;;  %v572_v9 = vunpack.c.l.bf16 %v242_v1 }
  0x99   :  { %v771_v6 = vunpack.c.h.bf16 %v341_v2  ;;  %v770_v10 = vunpack.c.l.bf16 %v341_v2  ;;  %v765_v11 = vunpack.c.h.bf16 %v338_v8  ;;  %v236_v12 = vld [vmem:[#allocation5 + $0x120] sm:$0xff]  ;;  %v335_v13 = vld [vmem:[#allocation5 + $0x438] sm:$0xff]  ;;  %v567_v15 = vunpack.c.h.bf16 %v239_v7  ;;  %v233_v20 = vld [vmem:[#allocation5 + $0x108] sm:$0xff] }
  0x9a   :  { %v332_v14 = vld [vmem:[#allocation5 + $0x420] sm:$0xff]  ;;  %1096 = vmatprep.subr.mxu0 %v579_v3  ;;  %v764_v16 = vunpack.c.l.bf16 %v338_v8  ;;  %v759_v17 = vunpack.c.h.bf16 %v335_v13  ;;  %v566_v18 = vunpack.c.l.bf16 %v239_v7  ;;  %v758_v19 = vunpack.c.l.bf16 %v335_v13  ;;  %v329_v21 = vld [vmem:[#allocation5 + $0x408] sm:$0xff]  ;;  %v230_v26 = vld [vmem:[#allocation5 + $0xf0] sm:$0xff] }
  0x9b   :  { %1167 = vmatprep.subr.mxu1 %v771_v6  ;;  %1097 = vmatpush1.msra.mxu0 %v578_v4  ;;  %v561_v22 = vunpack.c.h.bf16 %v236_v12  ;;  %v753_v23 = vunpack.c.h.bf16 %v332_v14  ;;  %v560_v24 = vunpack.c.l.bf16 %v236_v12  ;;  %v752_v25 = vunpack.c.l.bf16 %v332_v14  ;;  %v326_v27 = vld [vmem:[#allocation5 + $0x3f0] sm:$0xff]  ;;  %v227_v32 = vld [vmem:[#allocation5 + $0xd8] sm:$0xff]  ;;  %v224_v38 = vld [vmem:[#allocation5 + $0xc0] sm:$0xff] }
  0x9c   :  { %1168 = vmatpush1.msra.mxu1 %v770_v10  ;;  %1098 = vmatprep.subr.mxu0 %v573_v5  ;;  %v555_v28 = vunpack.c.h.bf16 %v233_v20  ;;  %v747_v29 = vunpack.c.h.bf16 %v329_v21  ;;  %v554_v30 = vunpack.c.l.bf16 %v233_v20  ;;  %v746_v31 = vunpack.c.l.bf16 %v329_v21  ;;  %v323_v33 = vld [vmem:[#allocation5 + $0x3d8] sm:$0xff]  ;;  %v320_v39 = vld [vmem:[#allocation5 + $0x3c0] sm:$0xff]  ;;  %v221_v44 = vld [vmem:[#allocation5 + $0xa8] sm:$0xff] }
  0x9d   :  { %1169 = vmatprep.subr.mxu1 %v765_v11  ;;  %1099 = vmatpush1.msra.mxu0 %v572_v9  ;;  %v549_v34 = vunpack.c.h.bf16 %v230_v26  ;;  %v741_v35 = vunpack.c.h.bf16 %v326_v27  ;;  %v548_v36 = vunpack.c.l.bf16 %v230_v26  ;;  %v740_v37 = vunpack.c.l.bf16 %v326_v27  ;;  %v317_v45 = vld [vmem:[#allocation5 + $0x3a8] sm:$0xff]  ;;  %v218_v50 = vld [vmem:[#allocation5 + $0x90] sm:$0xff]  ;;  %v215_v56 = vld [vmem:[#allocation5 + $0x78] sm:$0xff] }
  0x9e   :  { %1170 = vmatpush1.msra.mxu1 %v764_v16  ;;  %1100 = vmatprep.subr.mxu0 %v567_v15  ;;  %v543_v40 = vunpack.c.h.bf16 %v227_v32  ;;  %v735_v41 = vunpack.c.h.bf16 %v323_v33  ;;  %v542_v42 = vunpack.c.l.bf16 %v227_v32  ;;  %v734_v43 = vunpack.c.l.bf16 %v323_v33  ;;  %v314_v51 = vld [vmem:[#allocation5 + $0x390] sm:$0xff]  ;;  %v311_v57 = vld [vmem:[#allocation5 + $0x378] sm:$0xff]  ;;  %v212_v62 = vld [vmem:[#allocation5 + $0x60] sm:$0xff] }
  0x9f   :  { %1171 = vmatprep.subr.mxu1 %v759_v17  ;;  %1101 = vmatpush1.msra.mxu0 %v566_v18  ;;  %v537_v46 = vunpack.c.h.bf16 %v224_v38  ;;  %v729_v47 = vunpack.c.h.bf16 %v320_v39  ;;  %v536_v48 = vunpack.c.l.bf16 %v224_v38  ;;  %v728_v49 = vunpack.c.l.bf16 %v320_v39  ;;  %v308_v63 = vld [vmem:[#allocation5 + $0x360] sm:$0xff]  ;;  %v209_v4 = vld [vmem:[#allocation5 + $0x48] sm:$0xff]  ;;  %v206_v10 = vld [vmem:[#allocation5 + $0x30] sm:$0xff] }
  0xa0   :  { %1172 = vmatpush1.msra.mxu1 %v758_v19  ;;  %1102 = vmatprep.subr.mxu0 %v561_v22  ;;  %v531_v52 = vunpack.c.h.bf16 %v221_v44  ;;  %v723_v53 = vunpack.c.h.bf16 %v317_v45  ;;  %v530_v54 = vunpack.c.l.bf16 %v221_v44  ;;  %v722_v55 = vunpack.c.l.bf16 %v317_v45  ;;  %v305_v5 = vld [vmem:[#allocation5 + $0x348] sm:$0xff]  ;;  %v302_v11 = vld [vmem:[#allocation5 + $0x330] sm:$0xff]  ;;  %v203_v16 = vld [vmem:[#allocation5 + $0x18] sm:$0xff] }
  0xa1   :  { %1173 = vmatprep.subr.mxu1 %v753_v23  ;;  %1103 = vmatpush1.msra.mxu0 %v560_v24  ;;  %v525_v58 = vunpack.c.h.bf16 %v218_v50  ;;  %v717_v59 = vunpack.c.h.bf16 %v314_v51  ;;  %v524_v60 = vunpack.c.l.bf16 %v218_v50  ;;  %v716_v61 = vunpack.c.l.bf16 %v314_v51  ;;  %v299_v17 = vld [vmem:[#allocation5 + $0x318] sm:$0xff]  ;;  %v200_v22 = vld [vmem:[#allocation5] sm:$0xff] }
  0xa2   :  { %1174 = vmatpush1.msra.mxu1 %v752_v25  ;;  %1104 = vmatprep.subr.mxu0 %v555_v28  ;;  %v519_v0 = vunpack.c.h.bf16 %v215_v56  ;;  %v711_v1 = vunpack.c.h.bf16 %v311_v57  ;;  %v518_v2 = vunpack.c.l.bf16 %v215_v56  ;;  %v710_v3 = vunpack.c.l.bf16 %v311_v57  ;;  %v296_v23 = vld [vmem:[#allocation5 + $0x300] sm:$0xff]  ;;  %v293_v28 = vld [vmem:[#allocation5 + $0x2e8] sm:$0xff] }
  0xa3   :  { %1175 = vmatprep.subr.mxu1 %v747_v29  ;;  %1105 = vmatpush1.msra.mxu0 %v554_v30  ;;  %v513_v6 = vunpack.c.h.bf16 %v212_v62  ;;  %v705_v7 = vunpack.c.h.bf16 %v308_v63  ;;  %v512_v8 = vunpack.c.l.bf16 %v212_v62  ;;  %v704_v9 = vunpack.c.l.bf16 %v308_v63  ;;  %v389_v29 = vld [vmem:[#allocation5 + $0x5e8] sm:$0xff] }
  0xa4   :  { %1176 = vmatpush1.msra.mxu1 %v746_v31  ;;  %1106 = vmatprep.subr.mxu0 %v549_v34  ;;  %v507_v12 = vunpack.c.h.bf16 %v209_v4  ;;  %v699_v13 = vunpack.c.h.bf16 %v305_v5  ;;  %v506_v14 = vunpack.c.l.bf16 %v209_v4  ;;  %v698_v15 = vunpack.c.l.bf16 %v305_v5  ;;  %v290_v34 = vld [vmem:[#allocation5 + $0x2d0] sm:$0xff] }
  0xa5   :  { %1177 = vmatprep.subr.mxu1 %v741_v35  ;;  %1107 = vmatpush1.msra.mxu0 %v548_v36  ;;  %v501_v18 = vunpack.c.h.bf16 %v206_v10  ;;  %v693_v19 = vunpack.c.h.bf16 %v302_v11  ;;  %v500_v20 = vunpack.c.l.bf16 %v206_v10  ;;  %v692_v21 = vunpack.c.l.bf16 %v302_v11  ;;  %v386_v35 = vld [vmem:[#allocation5 + $0x5d0] sm:$0xff] }
  0xa6   :  { %1178 = vmatpush1.msra.mxu1 %v740_v37  ;;  %1108 = vmatprep.subr.mxu0 %v543_v40  ;;  %v495_v24 = vunpack.c.h.bf16 %v203_v16  ;;  %v687_v25 = vunpack.c.h.bf16 %v299_v17  ;;  %v494_v26 = vunpack.c.l.bf16 %v203_v16  ;;  %v686_v27 = vunpack.c.l.bf16 %v299_v17  ;;  %v287_v40 = vld [vmem:[#allocation5 + $0x2b8] sm:$0xff] }
  0xa7   :  { %1179 = vmatprep.subr.mxu1 %v735_v41  ;;  %1109 = vmatpush1.msra.mxu0 %v542_v42  ;;  %v489_v30 = vunpack.c.h.bf16 %v200_v22  ;;  %v681_v31 = vunpack.c.h.bf16 %v296_v23  ;;  %v488_v32 = vunpack.c.l.bf16 %v200_v22  ;;  %v680_v33 = vunpack.c.l.bf16 %v296_v23  ;;  %v383_v41 = vld [vmem:[#allocation5 + $0x5b8] sm:$0xff] }
  0xa8   :  { %1180 = vmatpush1.msra.mxu1 %v734_v43  ;;  %1110 = vmatprep.subr.mxu0 %v537_v46  ;;  %v675_v36 = vunpack.c.h.bf16 %v293_v28  ;;  %v867_v37 = vunpack.c.h.bf16 %v389_v29  ;;  %v674_v38 = vunpack.c.l.bf16 %v293_v28  ;;  %v866_v39 = vunpack.c.l.bf16 %v389_v29  ;;  %v284_v46 = vld [vmem:[#allocation5 + $0x2a0] sm:$0xff] }
  0xa9   :  { %1181 = vmatprep.subr.mxu1 %v729_v47  ;;  %1111 = vmatpush1.msra.mxu0 %v536_v48  ;;  %v669_v42 = vunpack.c.h.bf16 %v290_v34  ;;  %v861_v43 = vunpack.c.h.bf16 %v386_v35  ;;  %v668_v44 = vunpack.c.l.bf16 %v290_v34  ;;  %v860_v45 = vunpack.c.l.bf16 %v386_v35  ;;  %v380_v47 = vld [vmem:[#allocation5 + $0x5a0] sm:$0xff] }
  0xaa   :  { %1182 = vmatpush1.msra.mxu1 %v728_v49  ;;  %1112 = vmatprep.subr.mxu0 %v531_v52  ;;  %v663_v48 = vunpack.c.h.bf16 %v287_v40  ;;  %v855_v49 = vunpack.c.h.bf16 %v383_v41  ;;  %v662_v50 = vunpack.c.l.bf16 %v287_v40  ;;  %v854_v51 = vunpack.c.l.bf16 %v383_v41  ;;  %v281_v52 = vld [vmem:[#allocation5 + $0x288] sm:$0xff] }
  0xab   :  { %1183 = vmatprep.subr.mxu1 %v723_v53  ;;  %1113 = vmatpush1.msra.mxu0 %v530_v54  ;;  %v377_v53 = vld [vmem:[#allocation5 + $0x588] sm:$0xff]  ;;  %v657_v54 = vunpack.c.h.bf16 %v284_v46  ;;  %v656_v56 = vunpack.c.l.bf16 %v284_v46  ;;  %v848_v57 = vunpack.c.l.bf16 %v380_v47  ;;  %v650_v62 = vunpack.c.l.bf16 %v281_v52 }
  0xac   :  { %1184 = vmatpush1.msra.mxu1 %v722_v55  ;;  %1114 = vmatprep.subr.mxu0 %v525_v58  ;;  %v849_v55 = vunpack.c.h.bf16 %v380_v47  ;;  %v278_v58 = vld [vmem:[#allocation5 + $0x270] sm:$0xff]  ;;  %v842_v63 = vunpack.c.l.bf16 %v377_v53 }
  0xad   :  { %1185 = vmatprep.subr.mxu1 %v717_v59  ;;  %1115 = vmatpush1.msra.mxu0 %v524_v60  ;;  %v374_v59 = vld [vmem:[#allocation5 + $0x570] sm:$0xff]  ;;  %v651_v60 = vunpack.c.h.bf16 %v281_v52  ;;  %v644_v4 = vunpack.c.l.bf16 %v278_v58 }
  0xae   :  { %1186 = vmatpush1.msra.mxu1 %v716_v61  ;;  %1116 = vmatprep.subr.mxu0 %v519_v0  ;;  %v843_v61 = vunpack.c.h.bf16 %v377_v53  ;;  %v275_v0 = vld [vmem:[#allocation5 + $0x258] sm:$0xff]  ;;  %v836_v5 = vunpack.c.l.bf16 %v374_v59 }
  0xaf   :  { %1187 = vmatprep.subr.mxu1 %v711_v1  ;;  %1117 = vmatpush1.msra.mxu0 %v518_v2  ;;  %v371_v1 = vld [vmem:[#allocation5 + $0x558] sm:$0xff]  ;;  %v645_v2 = vunpack.c.h.bf16 %v278_v58  ;;  %v638_v10 = vunpack.c.l.bf16 %v275_v0 }
  0xb0   :  { %1188 = vmatpush1.msra.mxu1 %v710_v3  ;;  %1118 = vmatprep.subr.mxu0 %v513_v6  ;;  %v837_v3 = vunpack.c.h.bf16 %v374_v59  ;;  %v272_v6 = vld [vmem:[#allocation5 + $0x240] sm:$0xff]  ;;  %v830_v11 = vunpack.c.l.bf16 %v371_v1  ;;  %v437_v59 = vld [vmem:[#allocation5 + $0x768] sm:$0xff] }
  0xb1   :  { %1189 = vmatprep.subr.mxu1 %v705_v7  ;;  %1119 = vmatpush1.msra.mxu0 %v512_v8  ;;  %v368_v7 = vld [vmem:[#allocation5 + $0x540] sm:$0xff]  ;;  %v639_v8 = vunpack.c.h.bf16 %v275_v0  ;;  %v632_v16 = vunpack.c.l.bf16 %v272_v6 }
  0xb2   :  { %1190 = vmatpush1.msra.mxu1 %v704_v9  ;;  %1120 = vmatprep.subr.mxu0 %v507_v12  ;;  %v831_v9 = vunpack.c.h.bf16 %v371_v1  ;;  %v269_v12 = vld [vmem:[#allocation5 + $0x228] sm:$0xff]  ;;  %v824_v17 = vunpack.c.l.bf16 %v368_v7  ;;  %v963_v1 = vunpack.c.h.bf16 %v437_v59 }
  0xb3   :  { %1191 = vmatprep.subr.mxu1 %v699_v13  ;;  %1121 = vmatpush1.msra.mxu0 %v506_v14  ;;  %v365_v13 = vld [vmem:[#allocation5 + $0x528] sm:$0xff]  ;;  %v633_v14 = vunpack.c.h.bf16 %v272_v6  ;;  %v626_v22 = vunpack.c.l.bf16 %v269_v12  ;;  %v962_v6 = vunpack.c.l.bf16 %v437_v59 }
  0xb4   :  { %1192 = vmatpush1.msra.mxu1 %v698_v15  ;;  %1122 = vmatprep.subr.mxu0 %v501_v18  ;;  %v825_v15 = vunpack.c.h.bf16 %v368_v7  ;;  %v266_v18 = vld [vmem:[#allocation5 + $0x210] sm:$0xff]  ;;  %v818_v23 = vunpack.c.l.bf16 %v365_v13  ;;  %v197_v7 = vld [vmem:[#allocation2 + $0x18] sm:$0xff] }
  0xb5   :  { %1193 = vmatprep.subr.mxu1 %v693_v19  ;;  %1123 = vmatpush1.msra.mxu0 %v500_v20  ;;  %v362_v19 = vld [vmem:[#allocation5 + $0x510] sm:$0xff]  ;;  %v627_v20 = vunpack.c.h.bf16 %v269_v12  ;;  %v620_v28 = vunpack.c.l.bf16 %v266_v18 }
  0xb6   :  { %1194 = vmatpush1.msra.mxu1 %v692_v21  ;;  %1124 = vmatprep.subr.mxu0 %v495_v24  ;;  %v819_v21 = vunpack.c.h.bf16 %v365_v13  ;;  %v263_v24 = vld [vmem:[#allocation5 + $0x1f8] sm:$0xff]  ;;  %v812_v29 = vunpack.c.l.bf16 %v362_v19 }
  0xb7   :  { %1195 = vmatprep.subr.mxu1 %v687_v25  ;;  %1125 = vmatpush1.msra.mxu0 %v494_v26  ;;  %v359_v25 = vld [vmem:[#allocation5 + $0x4f8] sm:$0xff]  ;;  %v621_v26 = vunpack.c.h.bf16 %v266_v18  ;;  %v614_v34 = vunpack.c.l.bf16 %v263_v24 }
  0xb8   :  { %1196 = vmatpush1.msra.mxu1 %v686_v27  ;;  %1126 = vmatprep.subr.mxu0 %v489_v30  ;;  %v813_v27 = vunpack.c.h.bf16 %v362_v19  ;;  %v260_v30 = vld [vmem:[#allocation5 + $0x1e0] sm:$0xff]  ;;  %v806_v35 = vunpack.c.l.bf16 %v359_v25 }
  0xb9   :  { %1197 = vmatprep.subr.mxu1 %v681_v31  ;;  %1127 = vmatpush1.msra.mxu0 %v488_v32  ;;  %v356_v31 = vld [vmem:[#allocation5 + $0x4e0] sm:$0xff]  ;;  %v615_v32 = vunpack.c.h.bf16 %v263_v24  ;;  %v608_v40 = vunpack.c.l.bf16 %v260_v30 }
  0xba   :  { %1198 = vmatpush1.msra.mxu1 %v680_v33  ;;  %1128 = vmatprep.subr.mxu0 %v675_v36  ;;  %v807_v33 = vunpack.c.h.bf16 %v359_v25  ;;  %v257_v36 = vld [vmem:[#allocation5 + $0x1c8] sm:$0xff]  ;;  %v800_v41 = vunpack.c.l.bf16 %v356_v31 }
  0xbb   :  { %1199 = vmatprep.subr.mxu1 %v867_v37  ;;  %1129 = vmatpush2.msra.mxu0 %v674_v38  ;;  %v353_v37 = vld [vmem:[#allocation5 + $0x4c8] sm:$0xff]  ;;  %v609_v38 = vunpack.c.h.bf16 %v260_v30  ;;  %v602_v46 = vunpack.c.l.bf16 %v257_v36 }
  0xbc   :  { %1200 = vmatpush2.msra.mxu1 %v866_v39  ;;  %1130 = vmatprep.subr.mxu0 %v669_v42  ;;  %v801_v39 = vunpack.c.h.bf16 %v356_v31  ;;  %v254_v42 = vld [vmem:[#allocation5 + $0x1b0] sm:$0xff]  ;;  %v794_v47 = vunpack.c.l.bf16 %v353_v37 }
  0xbd   :  { %1201 = vmatprep.subr.mxu1 %v861_v43  ;;  %1131 = vmatpush2.msra.mxu0 %v668_v44  ;;  %v350_v43 = vld [vmem:[#allocation5 + $0x4b0] sm:$0xff]  ;;  %v603_v44 = vunpack.c.h.bf16 %v257_v36  ;;  %v596_v52 = vunpack.c.l.bf16 %v254_v42 }
  0xbe   :  { %1202 = vmatpush2.msra.mxu1 %v860_v45  ;;  %1132 = vmatprep.subr.mxu0 %v663_v48  ;;  %v795_v45 = vunpack.c.h.bf16 %v353_v37  ;;  %v251_v48 = vld [vmem:[#allocation5 + $0x198] sm:$0xff]  ;;  %v788_v53 = vunpack.c.l.bf16 %v350_v43 }
  0xbf   :  { %1203 = vmatprep.subr.mxu1 %v855_v49  ;;  %1133 = vmatpush2.msra.mxu0 %v662_v50  ;;  %v347_v49 = vld [vmem:[#allocation5 + $0x498] sm:$0xff]  ;;  %v597_v50 = vunpack.c.h.bf16 %v254_v42  ;;  %v590_v58 = vunpack.c.l.bf16 %v251_v48 }
  0xc0   :  { %1204 = vmatpush2.msra.mxu1 %v854_v51  ;;  %1134 = vmatprep.subr.mxu0 %v657_v54  ;;  %v789_v51 = vunpack.c.h.bf16 %v350_v43  ;;  %v248_v54 = vld [vmem:[#allocation5 + $0x180] sm:$0xff] }
  0xc1   :  { %1205 = vmatprep.subr.mxu1 %v849_v55  ;;  %1135 = vmatpush2.msra.mxu0 %v656_v56  ;;  %v591_v55 = vunpack.c.h.bf16 %v251_v48  ;;  %v783_v56 = vunpack.c.h.bf16 %v347_v49 }
  0xc2   :  { %1206 = vmatpush2.msra.mxu1 %v848_v57  ;;  %1136 = vmatprep.subr.mxu0 %v651_v60  ;;  %v344_v57 = vld [vmem:[#allocation5 + $0x480] sm:$0xff]  ;;  %v585_v60 = vunpack.c.h.bf16 %v248_v54 }
  0xc3   :  { %1207 = vmatprep.subr.mxu1 %v843_v61  ;;  %1137 = vmatpush2.msra.mxu0 %v650_v62  ;;  %v4150_v61 = vld [vmem:[#allocation2 + $0x8] sm:$0xff]  ;;  %v782_v62 = vunpack.c.l.bf16 %v347_v49  ;;  %v777_v0 = vunpack.c.h.bf16 %v344_v57 }
  0xc4   :  { %1208 = vmatpush2.msra.mxu1 %v842_v63  ;;  %1138 = vmatprep.subr.mxu0 %v645_v2  ;;  %v584_v63 = vunpack.c.l.bf16 %v248_v54  ;;  %v434_v2 = vld [vmem:[#allocation5 + $0x750] sm:$0xff] }
  0xc5   :  { %1209 = vmatprep.subr.mxu1 %v837_v3  ;;  %1139 = vmatpush2.msra.mxu0 %v644_v4  ;;  %v246_v3 = vld [vmem:[#allocation5 + $0x170] sm:$0xff]  ;;  %v956_v13 = vunpack.c.l.bf16 %v434_v2 }
  0xc6   :  { %1210 = vmatpush2.msra.mxu1 %v836_v5  ;;  %1140 = vmatprep.subr.mxu0 %v639_v8  ;;  %v4153_v4 = vld [vmem:[#allocation2] sm:$0xff]  ;;  %v776_v5 = vunpack.c.l.bf16 %v344_v57  ;;  %v431_v8 = vld [vmem:[#allocation5 + $0x738] sm:$0xff]  ;;  %v581_v12 = vunpack.c.h.bf16 %v246_v3 }
  0xc7   :  { %1211 = vmatprep.subr.mxu1 %v831_v9  ;;  %1141 = vmatpush2.msra.mxu0 %v638_v10  ;;  %v243_v9 = vld [vmem:[#allocation5 + $0x158] sm:$0xff]  ;;  %v196_v10 = vld [vmem:[#allocation2 + $0x10] sm:$0xff]  ;;  %v950_v19 = vunpack.c.l.bf16 %v431_v8 }
  0xc8   :  { %1212 = vmatpush2.msra.mxu1 %v830_v11  ;;  %1142 = vmatprep.subr.mxu0 %v633_v14  ;;  %v957_v11 = vunpack.c.h.bf16 %v434_v2  ;;  %v580_v14 = vunpack.c.l.bf16 %v246_v3  ;;  %v575_v18 = vunpack.c.h.bf16 %v243_v9  ;;  %v407_v57 = vld [vmem:[#allocation5 + $0x678] sm:$0xff] }
  0xc9   :  { %1213 = vmatprep.subr.mxu1 %v825_v15  ;;  %1143 = vmatpush2.msra.mxu0 %v632_v16  ;;  %v428_v15 = vld [vmem:[#allocation5 + $0x720] sm:$0xff]  ;;  %v903_v2 = vunpack.c.h.bf16 %v407_v57 }
  0xca   :  { %1214 = vmatpush2.msra.mxu1 %v824_v17  ;;  %1144 = vmatprep.subr.mxu0 %v627_v20  ;;  %v240_v16 = vld [vmem:[#allocation5 + $0x140] sm:$0xff]  ;;  %v951_v17 = vunpack.c.h.bf16 %v431_v8  ;;  %v574_v20 = vunpack.c.l.bf16 %v243_v9  ;;  %v944_v25 = vunpack.c.l.bf16 %v428_v15  ;;  %v213_v8 = vld [vmem:[#allocation5 + $0x68] sm:$0xff] }
  0xcb   :  { %1215 = vmatprep.subr.mxu1 %v819_v21  ;;  %1145 = vmatpush2.msra.mxu0 %v626_v22  ;;  %v425_v21 = vld [vmem:[#allocation5 + $0x708] sm:$0xff]  ;;  %v569_v24 = vunpack.c.h.bf16 %v240_v16 }
  0xcc   :  { %1216 = vmatpush2.msra.mxu1 %v818_v23  ;;  %1146 = vmatprep.subr.mxu0 %v621_v26  ;;  %v237_v22 = vld [vmem:[#allocation5 + $0x128] sm:$0xff]  ;;  %v945_v23 = vunpack.c.h.bf16 %v428_v15  ;;  %v568_v26 = vunpack.c.l.bf16 %v240_v16  ;;  %v938_v31 = vunpack.c.l.bf16 %v425_v21  ;;  %v515_v16 = vunpack.c.h.bf16 %v213_v8 }
  0xcd   :  { %1217 = vmatprep.subr.mxu1 %v813_v27  ;;  %1147 = vmatpush2.msra.mxu0 %v620_v28  ;;  %v422_v27 = vld [vmem:[#allocation5 + $0x6f0] sm:$0xff]  ;;  %v563_v30 = vunpack.c.h.bf16 %v237_v22 }
  0xce   :  { %1218 = vmatpush2.msra.mxu1 %v812_v29  ;;  %1148 = vmatprep.subr.mxu0 %v615_v32  ;;  %v234_v28 = vld [vmem:[#allocation5 + $0x110] sm:$0xff]  ;;  %v939_v29 = vunpack.c.h.bf16 %v425_v21  ;;  %v562_v32 = vunpack.c.l.bf16 %v237_v22  ;;  %v932_v37 = vunpack.c.l.bf16 %v422_v27 }
  0xcf   :  { %1219 = vmatprep.subr.mxu1 %v807_v33  ;;  %1149 = vmatpush2.msra.mxu0 %v614_v34  ;;  %v419_v33 = vld [vmem:[#allocation5 + $0x6d8] sm:$0xff]  ;;  %v557_v36 = vunpack.c.h.bf16 %v234_v28 }
  0xd0   :  { %1220 = vmatpush2.msra.mxu1 %v806_v35  ;;  %1150 = vmatprep.subr.mxu0 %v609_v38  ;;  %v231_v34 = vld [vmem:[#allocation5 + $0xf8] sm:$0xff]  ;;  %v933_v35 = vunpack.c.h.bf16 %v422_v27  ;;  %v556_v38 = vunpack.c.l.bf16 %v234_v28  ;;  %v926_v43 = vunpack.c.l.bf16 %v419_v33 }
  0xd1   :  { %1221 = vmatprep.subr.mxu1 %v801_v39  ;;  %1151 = vmatpush2.msra.mxu0 %v608_v40  ;;  %v416_v39 = vld [vmem:[#allocation5 + $0x6c0] sm:$0xff]  ;;  %v551_v42 = vunpack.c.h.bf16 %v231_v34 }
  0xd2   :  { %1222 = vmatpush2.msra.mxu1 %v800_v41  ;;  %1152 = vmatprep.subr.mxu0 %v603_v44  ;;  %v228_v40 = vld [vmem:[#allocation5 + $0xe0] sm:$0xff]  ;;  %v927_v41 = vunpack.c.h.bf16 %v419_v33  ;;  %v550_v44 = vunpack.c.l.bf16 %v231_v34  ;;  %v920_v49 = vunpack.c.l.bf16 %v416_v39 }
  0xd3   :  { %1223 = vmatprep.subr.mxu1 %v795_v45  ;;  %1153 = vmatpush2.msra.mxu0 %v602_v46  ;;  %v413_v45 = vld [vmem:[#allocation5 + $0x6a8] sm:$0xff]  ;;  %v545_v48 = vunpack.c.h.bf16 %v228_v40 }
  0xd4   :  { %1224 = vmatpush2.msra.mxu1 %v794_v47  ;;  %1154 = vmatprep.subr.mxu0 %v597_v50  ;;  %v225_v46 = vld [vmem:[#allocation5 + $0xc8] sm:$0xff]  ;;  %v921_v47 = vunpack.c.h.bf16 %v416_v39  ;;  %v544_v50 = vunpack.c.l.bf16 %v228_v40 }
  0xd5   :  { %1225 = vmatprep.subr.mxu1 %v789_v51  ;;  %1155 = vmatpush2.msra.mxu0 %v596_v52  ;;  %v410_v51 = vld [vmem:[#allocation5 + $0x690] sm:$0xff]  ;;  %v539_v54 = vunpack.c.h.bf16 %v225_v46 }
  0xd6   :  { %1226 = vmatpush2.msra.mxu1 %v788_v53  ;;  %1156 = vmatprep.subr.mxu0 %v591_v55  ;;  %v222_v52 = vld [vmem:[#allocation5 + $0xb0] sm:$0xff]  ;;  %v915_v53 = vunpack.c.h.bf16 %v413_v45  ;;  %v914_v55 = vunpack.c.l.bf16 %v413_v45  ;;  %v909_v59 = vunpack.c.h.bf16 %v410_v51 }
  0xd7   :  { %1227 = vmatprep.subr.mxu1 %v783_v56  ;;  %1157 = vmatpush2.msra.mxu0 %v590_v58  ;;  %v538_v56 = vunpack.c.l.bf16 %v225_v46  ;;  %v219_v58 = vld [vmem:[#allocation5 + $0x98] sm:$0xff] }
  0xd8   :  { %1160 = vmatprep.mubr.f32.mxu0 %v4150_v61  ;;  %1158 = vmatprep.subr.mxu0 %v585_v60  ;;  %v533_v60 = vunpack.c.h.bf16 %v222_v52  ;;  %v527_v3 = vunpack.c.h.bf16 %v219_v58 }
  0xd9   :  { %1228 = vmatpush2.msra.mxu1 %v782_v62  ;;  %1159 = vmatpush2.msra.mxu0 %v584_v63  ;;  %v908_v62 = vunpack.c.l.bf16 %v410_v51  ;;  %v532_v63 = vunpack.c.l.bf16 %v222_v52 }
  0xda   :  { %1229 = vmatprep.subr.mxu1 %v777_v0  ;;  %1161 = vmatmul.mubr.f32.vlgmr.msra.gmra.mxu0 %v4153_v4  ;;  %v404_v0 = vld [vmem:[#allocation5 + $0x660] sm:$0xff] }
  0xdb   :  { %1238 = vmatprep.subr.mxu0 %v963_v1  ;;  %1230 = vmatpush2.msra.mxu1 %v776_v5  ;;  %v216_v1 = vld [vmem:[#allocation5 + $0x80] sm:$0xff]  ;;  %v902_v5 = vunpack.c.l.bf16 %v407_v57  ;;  %v897_v9 = vunpack.c.h.bf16 %v404_v0 }
  0xdc   :  { %1231 = vmatprep.mubr.f32.mxu1 %v197_v7  ;;  %1239 = vmatpush1.msra.mxu0 %v962_v6  ;;  %v526_v6 = vunpack.c.l.bf16 %v219_v58  ;;  %v401_v7 = vld [vmem:[#allocation5 + $0x648] sm:$0xff] }
  0xdd   :  { %1232 = vmatmul.mubr.f32.vlgmr.msra.gmra.mxu1 %v196_v10  ;;  %1240 = vmatprep.subr.mxu0 %v957_v11  ;;  %v521_v10 = vunpack.c.h.bf16 %v216_v1  ;;  %v896_v11 = vunpack.c.l.bf16 %v404_v0  ;;  %v891_v15 = vunpack.c.h.bf16 %v401_v7 }
  0xde   :  { %1309 = vmatprep.subr.mxu1 %v581_v12  ;;  %1241 = vmatpush1.msra.mxu0 %v956_v13  ;;  %v520_v12 = vunpack.c.l.bf16 %v216_v1  ;;  %v398_v13 = vld [vmem:[#allocation5 + $0x630] sm:$0xff] }
  0xdf   :  { %1310 = vmatpush1.msra.mxu1 %v580_v14  ;;  %1242 = vmatprep.subr.mxu0 %v951_v17  ;;  %v210_v14 = vld [vmem:[#allocation5 + $0x50] sm:$0xff]  ;;  %v890_v17 = vunpack.c.l.bf16 %v401_v7  ;;  %v885_v21 = vunpack.c.h.bf16 %v398_v13 }
  0xe0   :  { %1311 = vmatprep.subr.mxu1 %v575_v18  ;;  %1243 = vmatpush1.msra.mxu0 %v950_v19  ;;  %v514_v18 = vunpack.c.l.bf16 %v213_v8  ;;  %v395_v19 = vld [vmem:[#allocation5 + $0x618] sm:$0xff]  ;;  %v509_v22 = vunpack.c.h.bf16 %v210_v14 }
  0xe1   :  { %1312 = vmatpush1.msra.mxu1 %v574_v20  ;;  %1244 = vmatprep.subr.mxu0 %v945_v23  ;;  %v207_v20 = vld [vmem:[#allocation5 + $0x38] sm:$0xff]  ;;  %v884_v23 = vunpack.c.l.bf16 %v398_v13  ;;  %v879_v27 = vunpack.c.h.bf16 %v395_v19 }
  0xe2   :  { %1313 = vmatprep.subr.mxu1 %v569_v24  ;;  %1245 = vmatpush1.msra.mxu0 %v944_v25  ;;  %v508_v24 = vunpack.c.l.bf16 %v210_v14  ;;  %v392_v25 = vld [vmem:[#allocation5 + $0x600] sm:$0xff]  ;;  %v503_v28 = vunpack.c.h.bf16 %v207_v20 }
  0xe3   :  { %1314 = vmatpush1.msra.mxu1 %v568_v26  ;;  %1246 = vmatprep.subr.mxu0 %v939_v29  ;;  %v204_v26 = vld [vmem:[#allocation5 + $0x20] sm:$0xff]  ;;  %v878_v29 = vunpack.c.l.bf16 %v395_v19  ;;  %v873_v33 = vunpack.c.h.bf16 %v392_v25 }
  0xe4   :  { %1315 = vmatprep.subr.mxu1 %v563_v30  ;;  %1247 = vmatpush1.msra.mxu0 %v938_v31  ;;  %v502_v30 = vunpack.c.l.bf16 %v207_v20  ;;  %v485_v31 = vld [vmem:[#allocation5 + $0x8e8] sm:$0xff]  ;;  %v497_v34 = vunpack.c.h.bf16 %v204_v26 }
  0xe5   :  { %1316 = vmatpush1.msra.mxu1 %v562_v32  ;;  %1248 = vmatprep.subr.mxu0 %v933_v35  ;;  %v201_v32 = vld [vmem:[#allocation5 + $0x8] sm:$0xff]  ;;  %v872_v35 = vunpack.c.l.bf16 %v392_v25  ;;  %v1059_v39 = vunpack.c.h.bf16 %v485_v31 }
  0xe6   :  { %1317 = vmatprep.subr.mxu1 %v557_v36  ;;  %1249 = vmatpush1.msra.mxu0 %v932_v37  ;;  %v496_v36 = vunpack.c.l.bf16 %v204_v26  ;;  %v482_v37 = vld [vmem:[#allocation5 + $0x8d0] sm:$0xff]  ;;  %v491_v40 = vunpack.c.h.bf16 %v201_v32 }
  0xe7   :  { %1318 = vmatpush1.msra.mxu1 %v556_v38  ;;  %1250 = vmatprep.subr.mxu0 %v927_v41  ;;  %v294_v38 = vld [vmem:[#allocation5 + $0x2f0] sm:$0xff]  ;;  %v1058_v41 = vunpack.c.l.bf16 %v485_v31  ;;  %v1053_v45 = vunpack.c.h.bf16 %v482_v37 }
  0xe8   :  { %1319 = vmatprep.subr.mxu1 %v551_v42  ;;  %1251 = vmatpush1.msra.mxu0 %v926_v43  ;;  %v490_v42 = vunpack.c.l.bf16 %v201_v32  ;;  %v479_v43 = vld [vmem:[#allocation5 + $0x8b8] sm:$0xff]  ;;  %v677_v46 = vunpack.c.h.bf16 %v294_v38 }
  0xe9   :  { %1320 = vmatpush1.msra.mxu1 %v550_v44  ;;  %1252 = vmatprep.subr.mxu0 %v921_v47  ;;  %v291_v44 = vld [vmem:[#allocation5 + $0x2d8] sm:$0xff]  ;;  %v1052_v47 = vunpack.c.l.bf16 %v482_v37  ;;  %v1047_v51 = vunpack.c.h.bf16 %v479_v43 }
  0xea   :  { %1321 = vmatprep.subr.mxu1 %v545_v48  ;;  %1253 = vmatpush1.msra.mxu0 %v920_v49  ;;  %v676_v48 = vunpack.c.l.bf16 %v294_v38  ;;  %v476_v49 = vld [vmem:[#allocation5 + $0x8a0] sm:$0xff]  ;;  %v671_v52 = vunpack.c.h.bf16 %v291_v44 }
  0xeb   :  { %1322 = vmatpush1.msra.mxu1 %v544_v50  ;;  %1254 = vmatprep.subr.mxu0 %v915_v53  ;;  %v288_v50 = vld [vmem:[#allocation5 + $0x2c0] sm:$0xff]  ;;  %v1046_v53 = vunpack.c.l.bf16 %v479_v43  ;;  %v1041_v57 = vunpack.c.h.bf16 %v476_v49 }
  0xec   :  { %1323 = vmatprep.subr.mxu1 %v539_v54  ;;  %1255 = vmatpush1.msra.mxu0 %v914_v55  ;;  %v670_v54 = vunpack.c.l.bf16 %v291_v44  ;;  %v473_v55 = vld [vmem:[#allocation5 + $0x888] sm:$0xff]  ;;  %v665_v58 = vunpack.c.h.bf16 %v288_v50 }
  0xed   :  { %1324 = vmatpush1.msra.mxu1 %v538_v56  ;;  %1256 = vmatprep.subr.mxu0 %v909_v59  ;;  %v285_v56 = vld [vmem:[#allocation5 + $0x2a8] sm:$0xff]  ;;  %v1040_v59 = vunpack.c.l.bf16 %v476_v49  ;;  %v1035_v0 = vunpack.c.h.bf16 %v473_v55 }
  0xee   :  { %1325 = vmatprep.subr.mxu1 %v533_v60  ;;  %1257 = vmatpush1.msra.mxu0 %v908_v62  ;;  %v664_v60 = vunpack.c.l.bf16 %v288_v50  ;;  %v470_v62 = vld [vmem:[#allocation5 + $0x870] sm:$0xff]  ;;  %v659_v1 = vunpack.c.h.bf16 %v285_v56 }
  0xef   :  { %1326 = vmatpush1.msra.mxu1 %v532_v63  ;;  %1258 = vmatprep.subr.mxu0 %v903_v2  ;;  %v282_v63 = vld [vmem:[#allocation5 + $0x290] sm:$0xff]  ;;  %v1034_v2 = vunpack.c.l.bf16 %v473_v55  ;;  %v1029_v7 = vunpack.c.h.bf16 %v470_v62 }
  0xf0   :  { %1327 = vmatprep.subr.mxu1 %v527_v3  ;;  %1259 = vmatpush1.msra.mxu0 %v902_v5  ;;  %v658_v3 = vunpack.c.l.bf16 %v285_v56  ;;  %v467_v5 = vld [vmem:[#allocation5 + $0x858] sm:$0xff]  ;;  %v653_v8 = vunpack.c.h.bf16 %v282_v63 }
  0xf1   :  { %1328 = vmatpush1.msra.mxu1 %v526_v6  ;;  %1260 = vmatprep.subr.mxu0 %v897_v9  ;;  %v279_v6 = vld [vmem:[#allocation5 + $0x278] sm:$0xff]  ;;  %v1028_v9 = vunpack.c.l.bf16 %v470_v62  ;;  %v1023_v13 = vunpack.c.h.bf16 %v467_v5 }
  0xf2   :  { %1329 = vmatprep.subr.mxu1 %v521_v10  ;;  %1261 = vmatpush1.msra.mxu0 %v896_v11  ;;  %v652_v10 = vunpack.c.l.bf16 %v282_v63  ;;  %v464_v11 = vld [vmem:[#allocation5 + $0x840] sm:$0xff]  ;;  %v647_v14 = vunpack.c.h.bf16 %v279_v6 }
  0xf3   :  { %1330 = vmatpush1.msra.mxu1 %v520_v12  ;;  %1262 = vmatprep.subr.mxu0 %v891_v15  ;;  %v276_v12 = vld [vmem:[#allocation5 + $0x260] sm:$0xff]  ;;  %v1022_v15 = vunpack.c.l.bf16 %v467_v5  ;;  %v1017_v19 = vunpack.c.h.bf16 %v464_v11  ;;  %v249_v5 = vld [vmem:[#allocation5 + $0x188] sm:$0xff] }
  0xf4   :  { %1331 = vmatprep.subr.mxu1 %v515_v16  ;;  %1263 = vmatpush1.msra.mxu0 %v890_v17  ;;  %v646_v16 = vunpack.c.l.bf16 %v279_v6  ;;  %v461_v17 = vld [vmem:[#allocation5 + $0x828] sm:$0xff]  ;;  %v641_v20 = vunpack.c.h.bf16 %v276_v12  ;;  %v342_v6 = vld [vmem:[#allocation5 + $0x470] sm:$0xff] }
  0xf5   :  { %1332 = vmatpush1.msra.mxu1 %v514_v18  ;;  %1264 = vmatprep.subr.mxu0 %v885_v21  ;;  %v273_v18 = vld [vmem:[#allocation5 + $0x248] sm:$0xff]  ;;  %v1016_v21 = vunpack.c.l.bf16 %v464_v11  ;;  %v1011_v25 = vunpack.c.h.bf16 %v461_v17  ;;  %v4158_v11 = vld [vmem:[#allocation2 + $0x20] sm:$0xff] }
  0xf6   :  { %1333 = vmatprep.subr.mxu1 %v509_v22  ;;  %1265 = vmatpush1.msra.mxu0 %v884_v23  ;;  %v640_v22 = vunpack.c.l.bf16 %v276_v12  ;;  %v458_v23 = vld [vmem:[#allocation5 + $0x810] sm:$0xff]  ;;  %v635_v26 = vunpack.c.h.bf16 %v273_v18  ;;  %v587_v12 = vunpack.c.h.bf16 %v249_v5 }
  0xf7   :  { %1334 = vmatpush1.msra.mxu1 %v508_v24  ;;  %1266 = vmatprep.subr.mxu0 %v879_v27  ;;  %v270_v24 = vld [vmem:[#allocation5 + $0x230] sm:$0xff]  ;;  %v1010_v27 = vunpack.c.l.bf16 %v461_v17  ;;  %v1005_v31 = vunpack.c.h.bf16 %v458_v23 }
  0xf8   :  { %1335 = vmatprep.subr.mxu1 %v503_v28  ;;  %1267 = vmatpush1.msra.mxu0 %v878_v29  ;;  %v634_v28 = vunpack.c.l.bf16 %v273_v18  ;;  %v455_v29 = vld [vmem:[#allocation5 + $0x7f8] sm:$0xff]  ;;  %v629_v32 = vunpack.c.h.bf16 %v270_v24  ;;  %v336_v18 = vld [vmem:[#allocation5 + $0x440] sm:$0xff] }
  0xf9   :  { %1336 = vmatpush1.msra.mxu1 %v502_v30  ;;  %1268 = vmatprep.subr.mxu0 %v873_v33  ;;  %v267_v30 = vld [vmem:[#allocation5 + $0x218] sm:$0xff]  ;;  %v1004_v33 = vunpack.c.l.bf16 %v458_v23  ;;  %v999_v37 = vunpack.c.h.bf16 %v455_v29  ;;  %v333_v23 = vld [vmem:[#allocation5 + $0x428] sm:$0xff] }
  0xfa   :  { %1337 = vmatprep.subr.mxu1 %v497_v34  ;;  %1269 = vmatpush1.msra.mxu0 %v872_v35  ;;  %v628_v34 = vunpack.c.l.bf16 %v270_v24  ;;  %v452_v35 = vld [vmem:[#allocation5 + $0x7e0] sm:$0xff]  ;;  %v623_v38 = vunpack.c.h.bf16 %v267_v30 }
  0xfb   :  { %1338 = vmatpush1.msra.mxu1 %v496_v36  ;;  %1270 = vmatprep.subr.mxu0 %v1059_v39  ;;  %v264_v36 = vld [vmem:[#allocation5 + $0x200] sm:$0xff]  ;;  %v998_v39 = vunpack.c.l.bf16 %v455_v29  ;;  %v993_v43 = vunpack.c.h.bf16 %v452_v35  ;;  %v330_v29 = vld [vmem:[#allocation5 + $0x410] sm:$0xff] }
  0xfc   :  { %1339 = vmatprep.subr.mxu1 %v491_v40  ;;  %1271 = vmatpush2.msra.mxu0 %v1058_v41  ;;  %v622_v40 = vunpack.c.l.bf16 %v267_v30  ;;  %v449_v41 = vld [vmem:[#allocation5 + $0x7c8] sm:$0xff]  ;;  %v617_v44 = vunpack.c.h.bf16 %v264_v36  ;;  %v432_v24 = vld [vmem:[#allocation5 + $0x740] sm:$0xff] }
  0xfd   :  { %1340 = vmatpush1.msra.mxu1 %v490_v42  ;;  %1272 = vmatprep.subr.mxu0 %v1053_v45  ;;  %v261_v42 = vld [vmem:[#allocation5 + $0x1e8] sm:$0xff]  ;;  %v992_v45 = vunpack.c.l.bf16 %v452_v35  ;;  %v987_v49 = vunpack.c.h.bf16 %v449_v41  ;;  %v327_v35 = vld [vmem:[#allocation5 + $0x3f8] sm:$0xff] }
  0xfe   :  { %1341 = vmatprep.subr.mxu1 %v677_v46  ;;  %1273 = vmatpush2.msra.mxu0 %v1052_v47  ;;  %v616_v46 = vunpack.c.l.bf16 %v264_v36  ;;  %v446_v47 = vld [vmem:[#allocation5 + $0x7b0] sm:$0xff]  ;;  %v611_v50 = vunpack.c.h.bf16 %v261_v42  ;;  %v429_v30 = vld [vmem:[#allocation5 + $0x728] sm:$0xff] }
  0xff   :  { %1342 = vmatpush2.msra.mxu1 %v676_v48  ;;  %1274 = vmatprep.subr.mxu0 %v1047_v51  ;;  %v258_v48 = vld [vmem:[#allocation5 + $0x1d0] sm:$0xff]  ;;  %v986_v51 = vunpack.c.l.bf16 %v449_v41  ;;  %v981_v55 = vunpack.c.h.bf16 %v446_v47  ;;  %v423_v41 = vld [vmem:[#allocation5 + $0x6f8] sm:$0xff] }
 0x100   :  { %1343 = vmatprep.subr.mxu1 %v671_v52  ;;  %1275 = vmatpush2.msra.mxu0 %v1046_v53  ;;  %v610_v52 = vunpack.c.l.bf16 %v261_v42  ;;  %v443_v53 = vld [vmem:[#allocation5 + $0x798] sm:$0xff]  ;;  %v605_v56 = vunpack.c.h.bf16 %v258_v48  ;;  %v426_v36 = vld [vmem:[#allocation5 + $0x710] sm:$0xff] }
 0x101   :  { %1344 = vmatpush2.msra.mxu1 %v670_v54  ;;  %1276 = vmatprep.subr.mxu0 %v1041_v57  ;;  %v255_v54 = vld [vmem:[#allocation5 + $0x1b8] sm:$0xff]  ;;  %v980_v57 = vunpack.c.l.bf16 %v446_v47  ;;  %v975_v62 = vunpack.c.h.bf16 %v443_v53  ;;  %v941_v42 = vunpack.c.h.bf16 %v426_v36 }
 0x102   :  { %1345 = vmatprep.subr.mxu1 %v665_v58  ;;  %1277 = vmatpush2.msra.mxu0 %v1040_v59  ;;  %v604_v58 = vunpack.c.l.bf16 %v258_v48  ;;  %v440_v59 = vld [vmem:[#allocation5 + $0x780] sm:$0xff]  ;;  %v599_v63 = vunpack.c.h.bf16 %v255_v54  ;;  %v935_v48 = vunpack.c.h.bf16 %v423_v41 }
 0x103   :  { %1346 = vmatpush2.msra.mxu1 %v664_v60  ;;  %1278 = vmatprep.subr.mxu0 %v1035_v0  ;;  %v252_v60 = vld [vmem:[#allocation5 + $0x1a0] sm:$0xff]  ;;  %v974_v0 = vunpack.c.l.bf16 %v443_v53 }
 0x104   :  { %1347 = vmatprep.subr.mxu1 %v659_v1  ;;  %1279 = vmatpush2.msra.mxu0 %v1034_v2  ;;  %v598_v1 = vunpack.c.l.bf16 %v255_v54  ;;  %v969_v2 = vunpack.c.h.bf16 %v440_v59 }
 0x105   :  { %1348 = vmatpush2.msra.mxu1 %v658_v3  ;;  %1280 = vmatprep.subr.mxu0 %v1029_v7  ;;  %v593_v3 = vunpack.c.h.bf16 %v252_v60  ;;  %v968_v7 = vunpack.c.l.bf16 %v440_v59 }
 0x106   :  { %1349 = vmatprep.subr.mxu1 %v653_v8  ;;  %1281 = vmatpush2.msra.mxu0 %v1028_v9  ;;  %v592_v8 = vunpack.c.l.bf16 %v252_v60  ;;  %v4156_v9 = vld [vmem:[#allocation2 + $0x28] sm:$0xff] }
 0x107   :  { %1350 = vmatpush2.msra.mxu1 %v652_v10  ;;  %1282 = vmatprep.subr.mxu0 %v1023_v13  ;;  %v339_v10 = vld [vmem:[#allocation5 + $0x458] sm:$0xff]  ;;  %v773_v13 = vunpack.c.h.bf16 %v342_v6 }
 0x108   :  { %1351 = vmatprep.subr.mxu1 %v647_v14  ;;  %1283 = vmatpush2.msra.mxu0 %v1022_v15  ;;  %v438_v14 = vld [vmem:[#allocation5 + $0x770] sm:$0xff]  ;;  %v586_v15 = vunpack.c.l.bf16 %v249_v5  ;;  %v767_v17 = vunpack.c.h.bf16 %v339_v10 }
 0x109   :  { %1352 = vmatpush2.msra.mxu1 %v646_v16  ;;  %1284 = vmatprep.subr.mxu0 %v1017_v19  ;;  %v772_v16 = vunpack.c.l.bf16 %v342_v6  ;;  %v435_v19 = vld [vmem:[#allocation5 + $0x758] sm:$0xff] }
 0x10a   :  { %1353 = vmatprep.subr.mxu1 %v641_v20  ;;  %1285 = vmatpush2.msra.mxu0 %v1016_v21  ;;  %v965_v20 = vunpack.c.h.bf16 %v438_v14  ;;  %v766_v21 = vunpack.c.l.bf16 %v339_v10 }
 0x10b   :  { %1354 = vmatpush2.msra.mxu1 %v640_v22  ;;  %1286 = vmatprep.subr.mxu0 %v1011_v25  ;;  %v964_v22 = vunpack.c.l.bf16 %v438_v14  ;;  %v761_v25 = vunpack.c.h.bf16 %v336_v18 }
 0x10c   :  { %1355 = vmatprep.subr.mxu1 %v635_v26  ;;  %1287 = vmatpush2.msra.mxu0 %v1010_v27  ;;  %v959_v26 = vunpack.c.h.bf16 %v435_v19  ;;  %v760_v27 = vunpack.c.l.bf16 %v336_v18 }
 0x10d   :  { %1356 = vmatpush2.msra.mxu1 %v634_v28  ;;  %1288 = vmatprep.subr.mxu0 %v1005_v31  ;;  %v958_v28 = vunpack.c.l.bf16 %v435_v19  ;;  %v755_v31 = vunpack.c.h.bf16 %v333_v23 }
 0x10e   :  { %1357 = vmatprep.subr.mxu1 %v629_v32  ;;  %1289 = vmatpush2.msra.mxu0 %v1004_v33  ;;  %v953_v32 = vunpack.c.h.bf16 %v432_v24  ;;  %v754_v33 = vunpack.c.l.bf16 %v333_v23 }
 0x10f   :  { %1358 = vmatpush2.msra.mxu1 %v628_v34  ;;  %1290 = vmatprep.subr.mxu0 %v999_v37  ;;  %v952_v34 = vunpack.c.l.bf16 %v432_v24  ;;  %v749_v37 = vunpack.c.h.bf16 %v330_v29 }
 0x110   :  { %1359 = vmatprep.subr.mxu1 %v623_v38  ;;  %1291 = vmatpush2.msra.mxu0 %v998_v39  ;;  %v748_v38 = vunpack.c.l.bf16 %v330_v29  ;;  %v946_v39 = vunpack.c.l.bf16 %v429_v30 }
 0x111   :  { %1360 = vmatpush2.msra.mxu1 %v622_v40  ;;  %1292 = vmatprep.subr.mxu0 %v993_v43  ;;  %v324_v40 = vld [vmem:[#allocation5 + $0x3e0] sm:$0xff]  ;;  %v742_v43 = vunpack.c.l.bf16 %v327_v35 }
 0x112   :  { %1361 = vmatprep.subr.mxu1 %v617_v44  ;;  %1293 = vmatpush2.msra.mxu0 %v992_v45  ;;  %v940_v44 = vunpack.c.l.bf16 %v426_v36  ;;  %v321_v45 = vld [vmem:[#allocation5 + $0x3c8] sm:$0xff]  ;;  %v737_v47 = vunpack.c.h.bf16 %v324_v40 }
 0x113   :  { %1362 = vmatpush2.msra.mxu1 %v616_v46  ;;  %1294 = vmatprep.subr.mxu0 %v987_v49  ;;  %v420_v46 = vld [vmem:[#allocation5 + $0x6e0] sm:$0xff]  ;;  %v736_v49 = vunpack.c.l.bf16 %v324_v40  ;;  %v731_v53 = vunpack.c.h.bf16 %v321_v45 }
 0x114   :  { %1363 = vmatprep.subr.mxu1 %v611_v50  ;;  %1295 = vmatpush2.msra.mxu0 %v986_v51  ;;  %v934_v50 = vunpack.c.l.bf16 %v423_v41  ;;  %v318_v51 = vld [vmem:[#allocation5 + $0x3b0] sm:$0xff]  ;;  %v929_v54 = vunpack.c.h.bf16 %v420_v46 }
 0x115   :  { %1364 = vmatpush2.msra.mxu1 %v610_v52  ;;  %1296 = vmatprep.subr.mxu0 %v981_v55  ;;  %v417_v52 = vld [vmem:[#allocation5 + $0x6c8] sm:$0xff]  ;;  %v730_v55 = vunpack.c.l.bf16 %v321_v45  ;;  %v725_v59 = vunpack.c.h.bf16 %v318_v51 }
 0x116   :  { %1365 = vmatprep.subr.mxu1 %v605_v56  ;;  %1297 = vmatpush2.msra.mxu0 %v980_v57  ;;  %v928_v56 = vunpack.c.l.bf16 %v420_v46  ;;  %v315_v57 = vld [vmem:[#allocation5 + $0x398] sm:$0xff]  ;;  %v923_v60 = vunpack.c.h.bf16 %v417_v52 }
 0x117   :  { %1366 = vmatpush2.msra.mxu1 %v604_v58  ;;  %1298 = vmatprep.subr.mxu0 %v975_v62  ;;  %v414_v58 = vld [vmem:[#allocation5 + $0x6b0] sm:$0xff]  ;;  %v724_v62 = vunpack.c.l.bf16 %v318_v51  ;;  %v718_v5 = vunpack.c.l.bf16 %v315_v57 }
 0x118   :  { %1367 = vmatprep.subr.mxu1 %v599_v63  ;;  %1299 = vmatpush2.msra.mxu0 %v974_v0  ;;  %v922_v63 = vunpack.c.l.bf16 %v417_v52  ;;  %v312_v0 = vld [vmem:[#allocation5 + $0x380] sm:$0xff]  ;;  %v916_v6 = vunpack.c.l.bf16 %v414_v58 }
 0x119   :  { %1368 = vmatpush2.msra.mxu1 %v598_v1  ;;  %1300 = vmatprep.subr.mxu0 %v969_v2  ;;  %v411_v1 = vld [vmem:[#allocation5 + $0x698] sm:$0xff]  ;;  %v719_v2 = vunpack.c.h.bf16 %v315_v57  ;;  %v713_v10 = vunpack.c.h.bf16 %v312_v0 }
 0x11a   :  { %1369 = vmatprep.subr.mxu1 %v593_v3  ;;  %1301 = vmatpush2.msra.mxu0 %v968_v7  ;;  %v917_v3 = vunpack.c.h.bf16 %v414_v58  ;;  %v309_v7 = vld [vmem:[#allocation5 + $0x368] sm:$0xff]  ;;  %v910_v14 = vunpack.c.l.bf16 %v411_v1 }
 0x11b   :  { %1302 = vmatprep.mubr.f32.mxu0 %v4156_v9  ;;  %1370 = vmatpush2.msra.mxu1 %v592_v8  ;;  %v408_v8 = vld [vmem:[#allocation5 + $0x680] sm:$0xff]  ;;  %v706_v19 = vunpack.c.l.bf16 %v309_v7 }
 0x11c   :  { %1303 = vmatmul.mubr.f32.vlgmr.msra.gmra.mxu0 %v4158_v11  ;;  %1371 = vmatprep.subr.mxu1 %v587_v12  ;;  %v911_v12 = vunpack.c.h.bf16 %v411_v1  ;;  %v905_v18 = vunpack.c.h.bf16 %v408_v8 }
 0x11d   :  { %1380 = vmatprep.subr.mxu0 %v773_v13  ;;  %1372 = vmatpush2.msra.mxu1 %v586_v15  ;;  %v712_v13 = vunpack.c.l.bf16 %v312_v0  ;;  %v306_v15 = vld [vmem:[#allocation5 + $0x350] sm:$0xff] }
 0x11e   :  { %1381 = vmatpush1.msra.mxu0 %v772_v16  ;;  %1373 = vmatprep.mubr.f32.mxu1 %v4150_v61  ;;  %v947_v61 = vunpack.c.h.bf16 %v429_v30  ;;  %v405_v16 = vld [vmem:[#allocation5 + $0x668] sm:$0xff]  ;;  %v701_v23 = vunpack.c.h.bf16 %v306_v15 }
 0x11f   :  { %1382 = vmatprep.subr.mxu0 %v767_v17  ;;  %1451 = vmatprep.subr.mxu1 %v965_v20  ;;  %v707_v17 = vunpack.c.h.bf16 %v309_v7  ;;  %v904_v20 = vunpack.c.l.bf16 %v408_v8  ;;  %v899_v24 = vunpack.c.h.bf16 %v405_v16 }
 0x120   :  { %1374 = vmatmul.mubr.f32.vlgmr.msra.gmra.mxu1 %v4153_v4  ;;  %1383 = vmatpush1.msra.mxu0 %v766_v21  ;;  %v743_v4 = vunpack.c.h.bf16 %v327_v35  ;;  %v303_v21 = vld [vmem:[#allocation5 + $0x338] sm:$0xff] }
 0x121   :  { %1452 = vmatpush1.msra.mxu1 %v964_v22  ;;  %1384 = vmatprep.subr.mxu0 %v761_v25  ;;  %v402_v22 = vld [vmem:[#allocation5 + $0x650] sm:$0xff]  ;;  %v700_v25 = vunpack.c.l.bf16 %v306_v15  ;;  %v695_v29 = vunpack.c.h.bf16 %v303_v21 }
 0x122   :  { %1453 = vmatprep.subr.mxu1 %v959_v26  ;;  %1385 = vmatpush1.msra.mxu0 %v760_v27  ;;  %v898_v26 = vunpack.c.l.bf16 %v405_v16  ;;  %v300_v27 = vld [vmem:[#allocation5 + $0x320] sm:$0xff]  ;;  %v893_v30 = vunpack.c.h.bf16 %v402_v22 }
 0x123   :  { %1454 = vmatpush1.msra.mxu1 %v958_v28  ;;  %1386 = vmatprep.subr.mxu0 %v755_v31  ;;  %v399_v28 = vld [vmem:[#allocation5 + $0x638] sm:$0xff]  ;;  %v694_v31 = vunpack.c.l.bf16 %v303_v21  ;;  %v689_v35 = vunpack.c.h.bf16 %v300_v27 }
 0x124   :  { %1455 = vmatprep.subr.mxu1 %v953_v32  ;;  %1387 = vmatpush1.msra.mxu0 %v754_v33  ;;  %v892_v32 = vunpack.c.l.bf16 %v402_v22  ;;  %v297_v33 = vld [vmem:[#allocation5 + $0x308] sm:$0xff]  ;;  %v887_v36 = vunpack.c.h.bf16 %v399_v28 }
 0x125   :  { %1456 = vmatpush1.msra.mxu1 %v952_v34  ;;  %1388 = vmatprep.subr.mxu0 %v749_v37  ;;  %v396_v34 = vld [vmem:[#allocation5 + $0x620] sm:$0xff]  ;;  %v688_v37 = vunpack.c.l.bf16 %v300_v27  ;;  %v683_v40 = vunpack.c.h.bf16 %v297_v33 }
 0x126   :  { %1457 = vmatprep.subr.mxu1 %v947_v61  ;;  %1389 = vmatpush1.msra.mxu0 %v748_v38  ;;  %v886_v61 = vunpack.c.l.bf16 %v399_v28  ;;  %v390_v38 = vld [vmem:[#allocation5 + $0x5f0] sm:$0xff]  ;;  %v881_v41 = vunpack.c.h.bf16 %v396_v34 }
 0x127   :  { %1458 = vmatpush1.msra.mxu1 %v946_v39  ;;  %1390 = vmatprep.subr.mxu0 %v743_v4  ;;  %v393_v39 = vld [vmem:[#allocation5 + $0x608] sm:$0xff]  ;;  %v682_v4 = vunpack.c.l.bf16 %v297_v33  ;;  %v869_v45 = vunpack.c.h.bf16 %v390_v38 }
 0x128   :  { %1459 = vmatprep.subr.mxu1 %v941_v42  ;;  %1391 = vmatpush1.msra.mxu0 %v742_v43  ;;  %v880_v42 = vunpack.c.l.bf16 %v396_v34  ;;  %v387_v43 = vld [vmem:[#allocation5 + $0x5d8] sm:$0xff]  ;;  %v875_v46 = vunpack.c.h.bf16 %v393_v39 }
 0x129   :  { %1460 = vmatpush1.msra.mxu1 %v940_v44  ;;  %1392 = vmatprep.subr.mxu0 %v737_v47  ;;  %v486_v44 = vld [vmem:[#allocation5 + $0x8f0] sm:$0xff]  ;;  %v868_v47 = vunpack.c.l.bf16 %v390_v38  ;;  %v863_v51 = vunpack.c.h.bf16 %v387_v43 }
 0x12a   :  { %1461 = vmatprep.subr.mxu1 %v935_v48  ;;  %1393 = vmatpush1.msra.mxu0 %v736_v49  ;;  %v874_v48 = vunpack.c.l.bf16 %v393_v39  ;;  %v384_v49 = vld [vmem:[#allocation5 + $0x5c0] sm:$0xff]  ;;  %v1061_v52 = vunpack.c.h.bf16 %v486_v44 }
 0x12b   :  { %1462 = vmatpush1.msra.mxu1 %v934_v50  ;;  %1394 = vmatprep.subr.mxu0 %v731_v53  ;;  %v483_v50 = vld [vmem:[#allocation5 + $0x8d8] sm:$0xff]  ;;  %v862_v53 = vunpack.c.l.bf16 %v387_v43  ;;  %v857_v57 = vunpack.c.h.bf16 %v384_v49 }
 0x12c   :  { %1463 = vmatprep.subr.mxu1 %v929_v54  ;;  %1395 = vmatpush1.msra.mxu0 %v730_v55  ;;  %v1060_v54 = vunpack.c.l.bf16 %v486_v44  ;;  %v381_v55 = vld [vmem:[#allocation5 + $0x5a8] sm:$0xff]  ;;  %v1055_v58 = vunpack.c.h.bf16 %v483_v50 }
 0x12d   :  { %1464 = vmatpush1.msra.mxu1 %v928_v56  ;;  %1396 = vmatprep.subr.mxu0 %v725_v59  ;;  %v480_v56 = vld [vmem:[#allocation5 + $0x8c0] sm:$0xff]  ;;  %v856_v59 = vunpack.c.l.bf16 %v384_v49  ;;  %v851_v0 = vunpack.c.h.bf16 %v381_v55 }
 0x12e   :  { %1465 = vmatprep.subr.mxu1 %v923_v60  ;;  %1397 = vmatpush1.msra.mxu0 %v724_v62  ;;  %v1054_v60 = vunpack.c.l.bf16 %v483_v50  ;;  %v378_v62 = vld [vmem:[#allocation5 + $0x590] sm:$0xff]  ;;  %v1049_v1 = vunpack.c.h.bf16 %v480_v56 }
 0x12f   :  { %1466 = vmatpush1.msra.mxu1 %v922_v63  ;;  %1398 = vmatprep.subr.mxu0 %v719_v2  ;;  %v477_v63 = vld [vmem:[#allocation5 + $0x8a8] sm:$0xff]  ;;  %v850_v2 = vunpack.c.l.bf16 %v381_v55  ;;  %v845_v7 = vunpack.c.h.bf16 %v378_v62 }
 0x130   :  { %1467 = vmatprep.subr.mxu1 %v917_v3  ;;  %1399 = vmatpush1.msra.mxu0 %v718_v5  ;;  %v1048_v3 = vunpack.c.l.bf16 %v480_v56  ;;  %v375_v5 = vld [vmem:[#allocation5 + $0x578] sm:$0xff]  ;;  %v1043_v8 = vunpack.c.h.bf16 %v477_v63 }
 0x131   :  { %1468 = vmatpush1.msra.mxu1 %v916_v6  ;;  %1400 = vmatprep.subr.mxu0 %v713_v10  ;;  %v474_v6 = vld [vmem:[#allocation5 + $0x890] sm:$0xff]  ;;  %v844_v10 = vunpack.c.l.bf16 %v378_v62  ;;  %v839_v15 = vunpack.c.h.bf16 %v375_v5 }
 0x132   :  { %1469 = vmatprep.subr.mxu1 %v911_v12  ;;  %1401 = vmatpush1.msra.mxu0 %v712_v13  ;;  %v1042_v12 = vunpack.c.l.bf16 %v477_v63  ;;  %v372_v13 = vld [vmem:[#allocation5 + $0x560] sm:$0xff]  ;;  %v1037_v16 = vunpack.c.h.bf16 %v474_v6 }
 0x133   :  { %1470 = vmatpush1.msra.mxu1 %v910_v14  ;;  %1402 = vmatprep.subr.mxu0 %v707_v17  ;;  %v471_v14 = vld [vmem:[#allocation5 + $0x878] sm:$0xff]  ;;  %v838_v17 = vunpack.c.l.bf16 %v375_v5  ;;  %v833_v21 = vunpack.c.h.bf16 %v372_v13 }
 0x134   :  { %1471 = vmatprep.subr.mxu1 %v905_v18  ;;  %1403 = vmatpush1.msra.mxu0 %v706_v19  ;;  %v1036_v18 = vunpack.c.l.bf16 %v474_v6  ;;  %v369_v19 = vld [vmem:[#allocation5 + $0x548] sm:$0xff]  ;;  %v1031_v22 = vunpack.c.h.bf16 %v471_v14 }
 0x135   :  { %1472 = vmatpush1.msra.mxu1 %v904_v20  ;;  %1404 = vmatprep.subr.mxu0 %v701_v23  ;;  %v468_v20 = vld [vmem:[#allocation5 + $0x860] sm:$0xff]  ;;  %v832_v23 = vunpack.c.l.bf16 %v372_v13  ;;  %v827_v27 = vunpack.c.h.bf16 %v369_v19  ;;  %v441_v13 = vld [vmem:[#allocation5 + $0x788] sm:$0xff] }
 0x136   :  { %1473 = vmatprep.subr.mxu1 %v899_v24  ;;  %1405 = vmatpush1.msra.mxu0 %v700_v25  ;;  %v1030_v24 = vunpack.c.l.bf16 %v471_v14  ;;  %v366_v25 = vld [vmem:[#allocation5 + $0x530] sm:$0xff]  ;;  %v1025_v28 = vunpack.c.h.bf16 %v468_v20  ;;  %v247_v14 = vld [vmem:[#allocation5 + $0x178] sm:$0xff] }
 0x137   :  { %1474 = vmatpush1.msra.mxu1 %v898_v26  ;;  %1406 = vmatprep.subr.mxu0 %v695_v29  ;;  %v465_v26 = vld [vmem:[#allocation5 + $0x848] sm:$0xff]  ;;  %v826_v29 = vunpack.c.l.bf16 %v369_v19  ;;  %v821_v33 = vunpack.c.h.bf16 %v366_v25  ;;  %v244_v19 = vld [vmem:[#allocation5 + $0x160] sm:$0xff] }
 0x138   :  { %1475 = vmatprep.subr.mxu1 %v893_v30  ;;  %1407 = vmatpush1.msra.mxu0 %v694_v31  ;;  %v1024_v30 = vunpack.c.l.bf16 %v468_v20  ;;  %v363_v31 = vld [vmem:[#allocation5 + $0x518] sm:$0xff]  ;;  %v1019_v34 = vunpack.c.h.bf16 %v465_v26 }
 0x139   :  { %1476 = vmatpush1.msra.mxu1 %v892_v32  ;;  %1408 = vmatprep.subr.mxu0 %v689_v35  ;;  %v462_v32 = vld [vmem:[#allocation5 + $0x830] sm:$0xff]  ;;  %v820_v35 = vunpack.c.l.bf16 %v366_v25  ;;  %v815_v38 = vunpack.c.h.bf16 %v363_v31  ;;  %v343_v20 = vld [vmem:[#allocation5 + $0x478] sm:$0xff]  ;;  %v340_v25 = vld [vmem:[#allocation5 + $0x460] sm:$0xff] }
 0x13a   :  { %1477 = vmatprep.subr.mxu1 %v887_v36  ;;  %1409 = vmatpush1.msra.mxu0 %v688_v37  ;;  %v1018_v36 = vunpack.c.l.bf16 %v465_v26  ;;  %v360_v37 = vld [vmem:[#allocation5 + $0x500] sm:$0xff]  ;;  %v1013_v39 = vunpack.c.h.bf16 %v462_v32 }
 0x13b   :  { %1478 = vmatpush1.msra.mxu1 %v886_v61  ;;  %1410 = vmatprep.subr.mxu0 %v683_v40  ;;  %v459_v61 = vld [vmem:[#allocation5 + $0x818] sm:$0xff]  ;;  %v814_v40 = vunpack.c.l.bf16 %v363_v31  ;;  %v809_v43 = vunpack.c.h.bf16 %v360_v37  ;;  %v4167_v26 = vld [vmem:[#allocation2 + $0x10] sm:$0xff]  ;;  %v238_v31 = vld [vmem:[#allocation5 + $0x130] sm:$0xff] }
 0x13c   :  { %1479 = vmatprep.subr.mxu1 %v881_v41  ;;  %1411 = vmatpush1.msra.mxu0 %v682_v4  ;;  %v1012_v41 = vunpack.c.l.bf16 %v462_v32  ;;  %v357_v4 = vld [vmem:[#allocation5 + $0x4e8] sm:$0xff]  ;;  %v1007_v44 = vunpack.c.h.bf16 %v459_v61 }
 0x13d   :  { %1480 = vmatpush1.msra.mxu1 %v880_v42  ;;  %1412 = vmatprep.subr.mxu0 %v869_v45  ;;  %v456_v42 = vld [vmem:[#allocation5 + $0x800] sm:$0xff]  ;;  %v808_v45 = vunpack.c.l.bf16 %v360_v37  ;;  %v803_v49 = vunpack.c.h.bf16 %v357_v4  ;;  %v337_v32 = vld [vmem:[#allocation5 + $0x448] sm:$0xff]  ;;  %v235_v37 = vld [vmem:[#allocation5 + $0x118] sm:$0xff] }
 0x13e   :  { %1481 = vmatprep.subr.mxu1 %v875_v46  ;;  %1413 = vmatpush2.msra.mxu0 %v868_v47  ;;  %v1006_v46 = vunpack.c.l.bf16 %v459_v61  ;;  %v354_v47 = vld [vmem:[#allocation5 + $0x4d0] sm:$0xff]  ;;  %v1001_v50 = vunpack.c.h.bf16 %v456_v42 }
 0x13f   :  { %1482 = vmatpush1.msra.mxu1 %v874_v48  ;;  %1414 = vmatprep.subr.mxu0 %v863_v51  ;;  %v453_v48 = vld [vmem:[#allocation5 + $0x7e8] sm:$0xff]  ;;  %v802_v51 = vunpack.c.l.bf16 %v357_v4  ;;  %v797_v55 = vunpack.c.h.bf16 %v354_v47  ;;  %v334_v61 = vld [vmem:[#allocation5 + $0x430] sm:$0xff]  ;;  %v232_v4 = vld [vmem:[#allocation5 + $0x100] sm:$0xff] }
 0x140   :  { %1483 = vmatprep.subr.mxu1 %v1061_v52  ;;  %1415 = vmatpush2.msra.mxu0 %v862_v53  ;;  %v1000_v52 = vunpack.c.l.bf16 %v456_v42  ;;  %v351_v53 = vld [vmem:[#allocation5 + $0x4b8] sm:$0xff]  ;;  %v995_v56 = vunpack.c.h.bf16 %v453_v48 }
 0x141   :  { %1484 = vmatpush2.msra.mxu1 %v1060_v54  ;;  %1416 = vmatprep.subr.mxu0 %v857_v57  ;;  %v450_v54 = vld [vmem:[#allocation5 + $0x7d0] sm:$0xff]  ;;  %v796_v57 = vunpack.c.l.bf16 %v354_v47  ;;  %v791_v62 = vunpack.c.h.bf16 %v351_v53  ;;  %v331_v42 = vld [vmem:[#allocation5 + $0x418] sm:$0xff]  ;;  %v553_v47 = vunpack.c.h.bf16 %v232_v4 }
 0x142   :  { %1485 = vmatprep.subr.mxu1 %v1055_v58  ;;  %1417 = vmatpush2.msra.mxu0 %v856_v59  ;;  %v994_v58 = vunpack.c.l.bf16 %v453_v48  ;;  %v348_v59 = vld [vmem:[#allocation5 + $0x4a0] sm:$0xff]  ;;  %v989_v63 = vunpack.c.h.bf16 %v450_v54  ;;  %v751_v48 = vunpack.c.h.bf16 %v331_v42 }
 0x143   :  { %1486 = vmatpush2.msra.mxu1 %v1054_v60  ;;  %1418 = vmatprep.subr.mxu0 %v851_v0  ;;  %v447_v60 = vld [vmem:[#allocation5 + $0x7b8] sm:$0xff]  ;;  %v790_v0 = vunpack.c.l.bf16 %v351_v53  ;;  %v785_v5 = vunpack.c.h.bf16 %v348_v59 }
 0x144   :  { %1487 = vmatprep.subr.mxu1 %v1049_v1  ;;  %1419 = vmatpush2.msra.mxu0 %v850_v2  ;;  %v988_v1 = vunpack.c.l.bf16 %v450_v54  ;;  %v345_v2 = vld [vmem:[#allocation5 + $0x488] sm:$0xff]  ;;  %v983_v6 = vunpack.c.h.bf16 %v447_v60 }
 0x145   :  { %1488 = vmatpush2.msra.mxu1 %v1048_v3  ;;  %1420 = vmatprep.subr.mxu0 %v845_v7  ;;  %v444_v3 = vld [vmem:[#allocation5 + $0x7a0] sm:$0xff]  ;;  %v784_v7 = vunpack.c.l.bf16 %v348_v59 }
 0x146   :  { %1489 = vmatprep.subr.mxu1 %v1043_v8  ;;  %1421 = vmatpush2.msra.mxu0 %v844_v10  ;;  %v982_v8 = vunpack.c.l.bf16 %v447_v60  ;;  %v779_v10 = vunpack.c.h.bf16 %v345_v2 }
 0x147   :  { %1490 = vmatpush2.msra.mxu1 %v1042_v12  ;;  %1422 = vmatprep.subr.mxu0 %v839_v15  ;;  %v977_v12 = vunpack.c.h.bf16 %v444_v3  ;;  %v778_v15 = vunpack.c.l.bf16 %v345_v2 }
 0x148   :  { %1491 = vmatprep.subr.mxu1 %v1037_v16  ;;  %1423 = vmatpush2.msra.mxu0 %v838_v17  ;;  %v976_v16 = vunpack.c.l.bf16 %v444_v3  ;;  %v971_v17 = vunpack.c.h.bf16 %v441_v13 }
 0x149   :  { %1492 = vmatpush2.msra.mxu1 %v1036_v18  ;;  %1424 = vmatprep.subr.mxu0 %v833_v21  ;;  %v583_v18 = vunpack.c.h.bf16 %v247_v14  ;;  %v970_v21 = vunpack.c.l.bf16 %v441_v13 }
 0x14a   :  { %1493 = vmatprep.subr.mxu1 %v1031_v22  ;;  %1425 = vmatpush2.msra.mxu0 %v832_v23  ;;  %v4164_v22 = vld [vmem:[#allocation2 + $0x18] sm:$0xff]  ;;  %v582_v23 = vunpack.c.l.bf16 %v247_v14 }
 0x14b   :  { %1494 = vmatpush2.msra.mxu1 %v1030_v24  ;;  %1426 = vmatprep.subr.mxu0 %v827_v27  ;;  %v241_v24 = vld [vmem:[#allocation5 + $0x148] sm:$0xff]  ;;  %v577_v27 = vunpack.c.h.bf16 %v244_v19 }
 0x14c   :  { %1495 = vmatprep.subr.mxu1 %v1025_v28  ;;  %1427 = vmatpush2.msra.mxu0 %v826_v29  ;;  %v775_v28 = vunpack.c.h.bf16 %v343_v20  ;;  %v576_v29 = vunpack.c.l.bf16 %v244_v19 }
 0x14d   :  { %1496 = vmatpush2.msra.mxu1 %v1024_v30  ;;  %1428 = vmatprep.subr.mxu0 %v821_v33  ;;  %v774_v30 = vunpack.c.l.bf16 %v343_v20  ;;  %v571_v33 = vunpack.c.h.bf16 %v241_v24 }
 0x14e   :  { %1497 = vmatprep.subr.mxu1 %v1019_v34  ;;  %1429 = vmatpush2.msra.mxu0 %v820_v35  ;;  %v769_v34 = vunpack.c.h.bf16 %v340_v25  ;;  %v570_v35 = vunpack.c.l.bf16 %v241_v24 }
 0x14f   :  { %1498 = vmatpush2.msra.mxu1 %v1018_v36  ;;  %1430 = vmatprep.subr.mxu0 %v815_v38  ;;  %v768_v36 = vunpack.c.l.bf16 %v340_v25  ;;  %v565_v38 = vunpack.c.h.bf16 %v238_v31 }
 0x150   :  { %1499 = vmatprep.subr.mxu1 %v1013_v39  ;;  %1431 = vmatpush2.msra.mxu0 %v814_v40  ;;  %v763_v39 = vunpack.c.h.bf16 %v337_v32  ;;  %v564_v40 = vunpack.c.l.bf16 %v238_v31 }
 0x151   :  { %1500 = vmatpush2.msra.mxu1 %v1012_v41  ;;  %1432 = vmatprep.subr.mxu0 %v809_v43  ;;  %v762_v41 = vunpack.c.l.bf16 %v337_v32  ;;  %v757_v43 = vunpack.c.h.bf16 %v334_v61 }
 0x152   :  { %1501 = vmatprep.subr.mxu1 %v1007_v44  ;;  %1433 = vmatpush2.msra.mxu0 %v808_v45  ;;  %v756_v44 = vunpack.c.l.bf16 %v334_v61  ;;  %v229_v45 = vld [vmem:[#allocation5 + $0xe8] sm:$0xff] }
 0x153   :  { %1502 = vmatpush2.msra.mxu1 %v1006_v46  ;;  %1434 = vmatprep.subr.mxu0 %v803_v49  ;;  %v328_v46 = vld [vmem:[#allocation5 + $0x400] sm:$0xff]  ;;  %v552_v49 = vunpack.c.l.bf16 %v232_v4  ;;  %v547_v53 = vunpack.c.h.bf16 %v229_v45 }
 0x154   :  { %1503 = vmatprep.subr.mxu1 %v1001_v50  ;;  %1435 = vmatpush2.msra.mxu0 %v802_v51  ;;  %v750_v50 = vunpack.c.l.bf16 %v331_v42  ;;  %v226_v51 = vld [vmem:[#allocation5 + $0xd0] sm:$0xff]  ;;  %v745_v54 = vunpack.c.h.bf16 %v328_v46 }
 0x155   :  { %1504 = vmatpush2.msra.mxu1 %v1000_v52  ;;  %1436 = vmatprep.subr.mxu0 %v797_v55  ;;  %v325_v52 = vld [vmem:[#allocation5 + $0x3e8] sm:$0xff]  ;;  %v546_v55 = vunpack.c.l.bf16 %v229_v45  ;;  %v541_v59 = vunpack.c.h.bf16 %v226_v51 }
 0x156   :  { %1505 = vmatprep.subr.mxu1 %v995_v56  ;;  %1437 = vmatpush2.msra.mxu0 %v796_v57  ;;  %v744_v56 = vunpack.c.l.bf16 %v328_v46  ;;  %v223_v57 = vld [vmem:[#allocation5 + $0xb8] sm:$0xff]  ;;  %v739_v60 = vunpack.c.h.bf16 %v325_v52 }
 0x157   :  { %1506 = vmatpush2.msra.mxu1 %v994_v58  ;;  %1438 = vmatprep.subr.mxu0 %v791_v62  ;;  %v322_v58 = vld [vmem:[#allocation5 + $0x3d0] sm:$0xff]  ;;  %v540_v62 = vunpack.c.l.bf16 %v226_v51  ;;  %v535_v2 = vunpack.c.h.bf16 %v223_v57 }
 0x158   :  { %1507 = vmatprep.subr.mxu1 %v989_v63  ;;  %1439 = vmatpush2.msra.mxu0 %v790_v0  ;;  %v738_v63 = vunpack.c.l.bf16 %v325_v52  ;;  %v220_v0 = vld [vmem:[#allocation5 + $0xa0] sm:$0xff]  ;;  %v733_v3 = vunpack.c.h.bf16 %v322_v58 }
 0x159   :  { %1508 = vmatpush2.msra.mxu1 %v988_v1  ;;  %1440 = vmatprep.subr.mxu0 %v785_v5  ;;  %v319_v1 = vld [vmem:[#allocation5 + $0x3b8] sm:$0xff]  ;;  %v534_v5 = vunpack.c.l.bf16 %v223_v57  ;;  %v528_v13 = vunpack.c.l.bf16 %v220_v0 }
 0x15a   :  { %1509 = vmatprep.subr.mxu1 %v983_v6  ;;  %1441 = vmatpush2.msra.mxu0 %v784_v7  ;;  %v732_v6 = vunpack.c.l.bf16 %v322_v58  ;;  %v217_v7 = vld [vmem:[#allocation5 + $0x88] sm:$0xff]  ;;  %v726_v14 = vunpack.c.l.bf16 %v319_v1 }
 0x15b   :  { %1510 = vmatpush2.msra.mxu1 %v982_v8  ;;  %1442 = vmatprep.subr.mxu0 %v779_v10  ;;  %v316_v8 = vld [vmem:[#allocation5 + $0x3a0] sm:$0xff]  ;;  %v529_v10 = vunpack.c.h.bf16 %v220_v0  ;;  %v522_v19 = vunpack.c.l.bf16 %v217_v7 }
 0x15c   :  { %1511 = vmatprep.subr.mxu1 %v977_v12  ;;  %1443 = vmatpush2.msra.mxu0 %v778_v15  ;;  %v727_v12 = vunpack.c.h.bf16 %v319_v1  ;;  %v214_v15 = vld [vmem:[#allocation5 + $0x70] sm:$0xff]  ;;  %v720_v20 = vunpack.c.l.bf16 %v316_v8 }
 0x15d   :  { %1444 = vmatprep.mubr.f32.mxu0 %v4164_v22  ;;  %1512 = vmatpush2.msra.mxu1 %v976_v16  ;;  %v313_v16 = vld [vmem:[#allocation5 + $0x388] sm:$0xff]  ;;  %v517_v24 = vunpack.c.h.bf16 %v214_v15 }
 0x15e   :  { %1445 = vmatmul.mubr.f32.vlgmr.msra.gmra.mxu0 %v4167_v26  ;;  %1513 = vmatprep.subr.mxu1 %v971_v17  ;;  %v523_v17 = vunpack.c.h.bf16 %v217_v7  ;;  %v715_v25 = vunpack.c.h.bf16 %v313_v16 }
 0x15f   :  { %1522 = vmatprep.subr.mxu0 %v583_v18  ;;  %1514 = vmatpush2.msra.mxu1 %v970_v21  ;;  %v721_v18 = vunpack.c.h.bf16 %v316_v8  ;;  %v211_v21 = vld [vmem:[#allocation5 + $0x58] sm:$0xff] }
 0x160   :  { %1515 = vmatprep.mubr.f32.mxu1 %v4156_v9  ;;  %1523 = vmatpush1.msra.mxu0 %v582_v23  ;;  %v559_v9 = vunpack.c.h.bf16 %v235_v37  ;;  %v310_v23 = vld [vmem:[#allocation5 + $0x370] sm:$0xff]  ;;  %v511_v31 = vunpack.c.h.bf16 %v211_v21 }
 0x161   :  { %1516 = vmatmul.mubr.f32.vlgmr.msra.gmra.mxu1 %v4158_v11  ;;  %1524 = vmatprep.subr.mxu0 %v577_v27  ;;  %v558_v11 = vunpack.c.l.bf16 %v235_v37  ;;  %v516_v27 = vunpack.c.l.bf16 %v214_v15  ;;  %v709_v32 = vunpack.c.h.bf16 %v310_v23 }
 0x162   :  { %1593 = vmatprep.subr.mxu1 %v775_v28  ;;  %1525 = vmatpush1.msra.mxu0 %v576_v29  ;;  %v714_v28 = vunpack.c.l.bf16 %v313_v16  ;;  %v208_v29 = vld [vmem:[#allocation5 + $0x40] sm:$0xff] }
 0x163   :  { %1594 = vmatpush1.msra.mxu1 %v774_v30  ;;  %1526 = vmatprep.subr.mxu0 %v571_v33  ;;  %v307_v30 = vld [vmem:[#allocation5 + $0x358] sm:$0xff]  ;;  %v510_v33 = vunpack.c.l.bf16 %v211_v21  ;;  %v505_v37 = vunpack.c.h.bf16 %v208_v29 }
 0x164   :  { %1595 = vmatprep.subr.mxu1 %v769_v34  ;;  %1527 = vmatpush1.msra.mxu0 %v570_v35  ;;  %v708_v34 = vunpack.c.l.bf16 %v310_v23  ;;  %v205_v35 = vld [vmem:[#allocation5 + $0x28] sm:$0xff]  ;;  %v703_v61 = vunpack.c.h.bf16 %v307_v30 }
 0x165   :  { %1596 = vmatpush1.msra.mxu1 %v768_v36  ;;  %1528 = vmatprep.subr.mxu0 %v565_v38  ;;  %v304_v36 = vld [vmem:[#allocation5 + $0x340] sm:$0xff]  ;;  %v504_v38 = vunpack.c.l.bf16 %v208_v29  ;;  %v499_v4 = vunpack.c.h.bf16 %v205_v35 }
 0x166   :  { %1597 = vmatprep.subr.mxu1 %v763_v39  ;;  %1529 = vmatpush1.msra.mxu0 %v564_v40  ;;  %v702_v39 = vunpack.c.l.bf16 %v307_v30  ;;  %v202_v40 = vld [vmem:[#allocation5 + $0x10] sm:$0xff]  ;;  %v697_v42 = vunpack.c.h.bf16 %v304_v36 }
 0x167   :  { %1598 = vmatpush1.msra.mxu1 %v762_v41  ;;  %1530 = vmatprep.subr.mxu0 %v559_v9  ;;  %v301_v41 = vld [vmem:[#allocation5 + $0x328] sm:$0xff]  ;;  %v498_v9 = vunpack.c.l.bf16 %v205_v35  ;;  %v493_v45 = vunpack.c.h.bf16 %v202_v40 }
 0x168   :  { %1599 = vmatprep.subr.mxu1 %v757_v43  ;;  %1531 = vmatpush1.msra.mxu0 %v558_v11  ;;  %v696_v43 = vunpack.c.l.bf16 %v304_v36  ;;  %v295_v11 = vld [vmem:[#allocation5 + $0x2f8] sm:$0xff]  ;;  %v691_v46 = vunpack.c.h.bf16 %v301_v41 }
 0x169   :  { %1600 = vmatpush1.msra.mxu1 %v756_v44  ;;  %1532 = vmatprep.subr.mxu0 %v553_v47  ;;  %v298_v44 = vld [vmem:[#allocation5 + $0x310] sm:$0xff]  ;;  %v492_v47 = vunpack.c.l.bf16 %v202_v40  ;;  %v679_v51 = vunpack.c.h.bf16 %v295_v11 }
 0x16a   :  { %1601 = vmatprep.subr.mxu1 %v751_v48  ;;  %1533 = vmatpush1.msra.mxu0 %v552_v49  ;;  %v690_v48 = vunpack.c.l.bf16 %v301_v41  ;;  %v292_v49 = vld [vmem:[#allocation5 + $0x2e0] sm:$0xff]  ;;  %v685_v52 = vunpack.c.h.bf16 %v298_v44 }
 0x16b   :  { %1602 = vmatpush1.msra.mxu1 %v750_v50  ;;  %1534 = vmatprep.subr.mxu0 %v547_v53  ;;  %v391_v50 = vld [vmem:[#allocation5 + $0x5f8] sm:$0xff]  ;;  %v678_v53 = vunpack.c.l.bf16 %v295_v11  ;;  %v673_v57 = vunpack.c.h.bf16 %v292_v49 }
 0x16c   :  { %1603 = vmatprep.subr.mxu1 %v745_v54  ;;  %1535 = vmatpush1.msra.mxu0 %v546_v55  ;;  %v684_v54 = vunpack.c.l.bf16 %v298_v44  ;;  %v289_v55 = vld [vmem:[#allocation5 + $0x2c8] sm:$0xff]  ;;  %v871_v58 = vunpack.c.h.bf16 %v391_v50 }
 0x16d   :  { %1604 = vmatpush1.msra.mxu1 %v744_v56  ;;  %1536 = vmatprep.subr.mxu0 %v541_v59  ;;  %v388_v56 = vld [vmem:[#allocation5 + $0x5e0] sm:$0xff]  ;;  %v672_v59 = vunpack.c.l.bf16 %v292_v49  ;;  %v667_v0 = vunpack.c.h.bf16 %v289_v55 }
 0x16e   :  { %1605 = vmatprep.subr.mxu1 %v739_v60  ;;  %1537 = vmatpush1.msra.mxu0 %v540_v62  ;;  %v870_v60 = vunpack.c.l.bf16 %v391_v50  ;;  %v286_v62 = vld [vmem:[#allocation5 + $0x2b0] sm:$0xff]  ;;  %v865_v1 = vunpack.c.h.bf16 %v388_v56 }
 0x16f   :  { %1606 = vmatpush1.msra.mxu1 %v738_v63  ;;  %1538 = vmatprep.subr.mxu0 %v535_v2  ;;  %v385_v63 = vld [vmem:[#allocation5 + $0x5c8] sm:$0xff]  ;;  %v666_v2 = vunpack.c.l.bf16 %v289_v55  ;;  %v661_v7 = vunpack.c.h.bf16 %v286_v62 }
 0x170   :  { %1607 = vmatprep.subr.mxu1 %v733_v3  ;;  %1539 = vmatpush1.msra.mxu0 %v534_v5  ;;  %v864_v3 = vunpack.c.l.bf16 %v388_v56  ;;  %v283_v5 = vld [vmem:[#allocation5 + $0x298] sm:$0xff]  ;;  %v859_v8 = vunpack.c.h.bf16 %v385_v63 }
 0x171   :  { %1608 = vmatpush1.msra.mxu1 %v732_v6  ;;  %1540 = vmatprep.subr.mxu0 %v529_v10  ;;  %v382_v6 = vld [vmem:[#allocation5 + $0x5b0] sm:$0xff]  ;;  %v660_v10 = vunpack.c.l.bf16 %v286_v62  ;;  %v655_v15 = vunpack.c.h.bf16 %v283_v5 }
 0x172   :  { %1609 = vmatprep.subr.mxu1 %v727_v12  ;;  %1541 = vmatpush1.msra.mxu0 %v528_v13  ;;  %v858_v12 = vunpack.c.l.bf16 %v385_v63  ;;  %v280_v13 = vld [vmem:[#allocation5 + $0x280] sm:$0xff]  ;;  %v853_v16 = vunpack.c.h.bf16 %v382_v6 }
 0x173   :  { %1610 = vmatpush1.msra.mxu1 %v726_v14  ;;  %1542 = vmatprep.subr.mxu0 %v523_v17  ;;  %v379_v14 = vld [vmem:[#allocation5 + $0x598] sm:$0xff]  ;;  %v654_v17 = vunpack.c.l.bf16 %v283_v5  ;;  %v649_v21 = vunpack.c.h.bf16 %v280_v13 }
 0x174   :  { %1611 = vmatprep.subr.mxu1 %v721_v18  ;;  %1543 = vmatpush1.msra.mxu0 %v522_v19  ;;  %v852_v18 = vunpack.c.l.bf16 %v382_v6  ;;  %v277_v19 = vld [vmem:[#allocation5 + $0x268] sm:$0xff]  ;;  %v847_v23 = vunpack.c.h.bf16 %v379_v14 }
 0x175   :  { %1612 = vmatpush1.msra.mxu1 %v720_v20  ;;  %1544 = vmatprep.subr.mxu0 %v517_v24  ;;  %v376_v20 = vld [vmem:[#allocation5 + $0x580] sm:$0xff]  ;;  %v648_v24 = vunpack.c.l.bf16 %v280_v13  ;;  %v643_v29 = vunpack.c.h.bf16 %v277_v19 }
 0x176   :  { %1613 = vmatprep.subr.mxu1 %v715_v25  ;;  %1545 = vmatpush1.msra.mxu0 %v516_v27  ;;  %v846_v25 = vunpack.c.l.bf16 %v379_v14  ;;  %v274_v27 = vld [vmem:[#allocation5 + $0x250] sm:$0xff]  ;;  %v841_v30 = vunpack.c.h.bf16 %v376_v20 }
 0x177   :  { %1614 = vmatpush1.msra.mxu1 %v714_v28  ;;  %1546 = vmatprep.subr.mxu0 %v511_v31  ;;  %v373_v28 = vld [vmem:[#allocation5 + $0x568] sm:$0xff]  ;;  %v642_v31 = vunpack.c.l.bf16 %v277_v19  ;;  %v637_v35 = vunpack.c.h.bf16 %v274_v27  ;;  %v346_v19 = vld [vmem:[#allocation5 + $0x490] sm:$0xff] }
 0x178   :  { %1615 = vmatprep.subr.mxu1 %v709_v32  ;;  %1547 = vmatpush1.msra.mxu0 %v510_v33  ;;  %v840_v32 = vunpack.c.l.bf16 %v376_v20  ;;  %v271_v33 = vld [vmem:[#allocation5 + $0x238] sm:$0xff]  ;;  %v835_v36 = vunpack.c.h.bf16 %v373_v28 }
 0x179   :  { %1616 = vmatpush1.msra.mxu1 %v708_v34  ;;  %1548 = vmatprep.subr.mxu0 %v505_v37  ;;  %v370_v34 = vld [vmem:[#allocation5 + $0x550] sm:$0xff]  ;;  %v636_v37 = vunpack.c.l.bf16 %v274_v27  ;;  %v631_v40 = vunpack.c.h.bf16 %v271_v33  ;;  %v439_v20 = vld [vmem:[#allocation5 + $0x778] sm:$0xff]  ;;  %v436_v27 = vld [vmem:[#allocation5 + $0x760] sm:$0xff] }
 0x17a   :  { %1617 = vmatprep.subr.mxu1 %v703_v61  ;;  %1549 = vmatpush1.msra.mxu0 %v504_v38  ;;  %v834_v61 = vunpack.c.l.bf16 %v373_v28  ;;  %v268_v38 = vld [vmem:[#allocation5 + $0x220] sm:$0xff]  ;;  %v829_v41 = vunpack.c.h.bf16 %v370_v34 }
 0x17b   :  { %1618 = vmatpush1.msra.mxu1 %v702_v39  ;;  %1550 = vmatprep.subr.mxu0 %v499_v4  ;;  %v367_v39 = vld [vmem:[#allocation5 + $0x538] sm:$0xff]  ;;  %v630_v4 = vunpack.c.l.bf16 %v271_v33  ;;  %v625_v11 = vunpack.c.h.bf16 %v268_v38  ;;  %v1769_v33 = vld [vmem:[#allocation8 + $0xa8] sm:$0xff] }
 0x17c   :  { %1619 = vmatprep.subr.mxu1 %v697_v42  ;;  %1551 = vmatpush1.msra.mxu0 %v498_v9  ;;  %v828_v42 = vunpack.c.l.bf16 %v370_v34  ;;  %v265_v9 = vld [vmem:[#allocation5 + $0x208] sm:$0xff]  ;;  %v823_v44 = vunpack.c.h.bf16 %v367_v39  ;;  %v1771_v28 = vld [vmem:[#allocation8 + $0xb4] sm:$0xff]  ;;  %v3732_v34 = vld [vmem:[#allocation2] sm:$0xff] }
 0x17d   :  { %1620 = vmatpush1.msra.mxu1 %v696_v43  ;;  %1552 = vmatprep.subr.mxu0 %v493_v45  ;;  %v364_v43 = vld [vmem:[#allocation5 + $0x520] sm:$0xff]  ;;  %v624_v45 = vunpack.c.l.bf16 %v268_v38  ;;  %v619_v49 = vunpack.c.h.bf16 %v265_v9  ;;  %v1978_v38 = vunpack.c.l.bf16 %v1771_v28 }
 0x17e   :  { %1621 = vmatprep.subr.mxu1 %v691_v46  ;;  %1553 = vmatpush1.msra.mxu0 %v492_v47  ;;  %v822_v46 = vunpack.c.l.bf16 %v367_v39  ;;  %v262_v47 = vld [vmem:[#allocation5 + $0x1f0] sm:$0xff]  ;;  %v817_v50 = vunpack.c.h.bf16 %v364_v43  ;;  %v1767_v39 = vld [vmem:[#allocation8 + $0x9c] sm:$0xff] }
 0x17f   :  { %1622 = vmatpush1.msra.mxu1 %v690_v48  ;;  %1554 = vmatprep.subr.mxu0 %v679_v51  ;;  %v361_v48 = vld [vmem:[#allocation5 + $0x508] sm:$0xff]  ;;  %v618_v51 = vunpack.c.l.bf16 %v265_v9  ;;  %v613_v55 = vunpack.c.h.bf16 %v262_v47  ;;  %v1975_v9 = vunpack.c.l.bf16 %v1769_v33 }
 0x180   :  { %1623 = vmatprep.subr.mxu1 %v685_v52  ;;  %1555 = vmatpush2.msra.mxu0 %v678_v53  ;;  %v816_v52 = vunpack.c.l.bf16 %v364_v43  ;;  %v259_v53 = vld [vmem:[#allocation5 + $0x1d8] sm:$0xff]  ;;  %v811_v56 = vunpack.c.h.bf16 %v361_v48 }
 0x181   :  { %1624 = vmatpush1.msra.mxu1 %v684_v54  ;;  %1556 = vmatprep.subr.mxu0 %v673_v57  ;;  %v358_v54 = vld [vmem:[#allocation5 + $0x4f0] sm:$0xff]  ;;  %v612_v57 = vunpack.c.l.bf16 %v262_v47  ;;  %v607_v62 = vunpack.c.h.bf16 %v259_v53  ;;  %v1972_v47 = vunpack.c.l.bf16 %v1767_v39 }
 0x182   :  { %1625 = vmatprep.subr.mxu1 %v871_v58  ;;  %1557 = vmatpush2.msra.mxu0 %v672_v59  ;;  %v810_v58 = vunpack.c.l.bf16 %v361_v48  ;;  %v256_v59 = vld [vmem:[#allocation5 + $0x1c0] sm:$0xff]  ;;  %v805_v63 = vunpack.c.h.bf16 %v358_v54  ;;  %v1765_v43 = vld [vmem:[#allocation8 + $0x90] sm:$0xff]  ;;  %v1763_v48 = vld [vmem:[#allocation8 + $0x84] sm:$0xff] }
 0x183   :  { %1626 = vmatpush2.msra.mxu1 %v870_v60  ;;  %1558 = vmatprep.subr.mxu0 %v667_v0  ;;  %v355_v60 = vld [vmem:[#allocation5 + $0x4d8] sm:$0xff]  ;;  %v606_v0 = vunpack.c.l.bf16 %v259_v53  ;;  %v601_v5 = vunpack.c.h.bf16 %v256_v59 }
 0x184   :  { %1627 = vmatprep.subr.mxu1 %v865_v1  ;;  %1559 = vmatpush2.msra.mxu0 %v666_v2  ;;  %v804_v1 = vunpack.c.l.bf16 %v358_v54  ;;  %v253_v2 = vld [vmem:[#allocation5 + $0x1a8] sm:$0xff]  ;;  %v799_v6 = vunpack.c.h.bf16 %v355_v60  ;;  %v1967_v54 = vunpack.c.h.bf16 %v1763_v48 }
 0x185   :  { %1628 = vmatpush2.msra.mxu1 %v864_v3  ;;  %1560 = vmatprep.subr.mxu0 %v661_v7  ;;  %v352_v3 = vld [vmem:[#allocation5 + $0x4c0] sm:$0xff]  ;;  %v600_v7 = vunpack.c.l.bf16 %v256_v59  ;;  %v595_v13 = vunpack.c.h.bf16 %v253_v2 }
 0x186   :  { %1629 = vmatprep.subr.mxu1 %v859_v8  ;;  %1561 = vmatpush2.msra.mxu0 %v660_v10  ;;  %v798_v8 = vunpack.c.l.bf16 %v355_v60  ;;  %v250_v10 = vld [vmem:[#allocation5 + $0x190] sm:$0xff]  ;;  %v793_v14 = vunpack.c.h.bf16 %v352_v3 }
 0x187   :  { %1630 = vmatpush2.msra.mxu1 %v858_v12  ;;  %1562 = vmatprep.subr.mxu0 %v655_v15  ;;  %v349_v12 = vld [vmem:[#allocation5 + $0x4a8] sm:$0xff]  ;;  %v594_v15 = vunpack.c.l.bf16 %v253_v2 }
 0x188   :  { %1631 = vmatprep.subr.mxu1 %v853_v16  ;;  %1563 = vmatpush2.msra.mxu0 %v654_v17  ;;  %v792_v16 = vunpack.c.l.bf16 %v352_v3  ;;  %v589_v17 = vunpack.c.h.bf16 %v250_v10 }
 0x189   :  { %1632 = vmatpush2.msra.mxu1 %v852_v18  ;;  %1564 = vmatprep.subr.mxu0 %v649_v21  ;;  %v787_v18 = vunpack.c.h.bf16 %v349_v12  ;;  %v588_v21 = vunpack.c.l.bf16 %v250_v10 }
 0x18a   :  { %1633 = vmatprep.subr.mxu1 %v847_v23  ;;  %1565 = vmatpush2.msra.mxu0 %v648_v24  ;;  %v786_v23 = vunpack.c.l.bf16 %v349_v12  ;;  %v781_v24 = vunpack.c.h.bf16 %v346_v19 }
 0x18b   :  { %1634 = vmatpush2.msra.mxu1 %v846_v25  ;;  %1566 = vmatprep.subr.mxu0 %v643_v29  ;;  %v967_v25 = vunpack.c.h.bf16 %v439_v20  ;;  %v780_v29 = vunpack.c.l.bf16 %v346_v19 }
 0x18c   :  { %1635 = vmatprep.subr.mxu1 %v841_v30  ;;  %1567 = vmatpush2.msra.mxu0 %v642_v31  ;;  %v3731_v30 = vld [vmem:[#allocation2 + $0x8] sm:$0xff]  ;;  %v966_v31 = vunpack.c.l.bf16 %v439_v20  ;;  %v406_v20 = vld [vmem:[#allocation5 + $0x670] sm:$0xff] }
 0x18d   :  { %1636 = vmatpush2.msra.mxu1 %v840_v32  ;;  %1568 = vmatprep.subr.mxu0 %v637_v35  ;;  %v433_v32 = vld [vmem:[#allocation5 + $0x748] sm:$0xff]  ;;  %v961_v35 = vunpack.c.h.bf16 %v436_v27 }
 0x18e   :  { %1637 = vmatprep.subr.mxu1 %v835_v36  ;;  %1569 = vmatpush2.msra.mxu0 %v636_v37  ;;  %v1979_v36 = vunpack.c.h.bf16 %v1771_v28  ;;  %v960_v37 = vunpack.c.l.bf16 %v436_v27  ;;  %v403_v28 = vld [vmem:[#allocation5 + $0x658] sm:$0xff] }
 0x18f   :  { %1638 = vmatpush2.msra.mxu1 %v834_v61  ;;  %1570 = vmatprep.subr.mxu0 %v631_v40  ;;  %v430_v61 = vld [vmem:[#allocation5 + $0x730] sm:$0xff]  ;;  %v955_v40 = vunpack.c.h.bf16 %v433_v32 }
 0x190   :  { %1639 = vmatprep.subr.mxu1 %v829_v41  ;;  %1571 = vmatpush2.msra.mxu0 %v630_v4  ;;  %v1976_v41 = vunpack.c.h.bf16 %v1769_v33  ;;  %v954_v4 = vunpack.c.l.bf16 %v433_v32  ;;  %v900_v33 = vunpack.c.l.bf16 %v406_v20 }
 0x191   :  { %1640 = vmatpush2.msra.mxu1 %v828_v42  ;;  %1572 = vmatprep.subr.mxu0 %v625_v11  ;;  %v427_v42 = vld [vmem:[#allocation5 + $0x718] sm:$0xff]  ;;  %v949_v11 = vunpack.c.h.bf16 %v430_v61 }
 0x192   :  { %1641 = vmatprep.subr.mxu1 %v823_v44  ;;  %1573 = vmatpush2.msra.mxu0 %v624_v45  ;;  %v1973_v44 = vunpack.c.h.bf16 %v1767_v39  ;;  %v948_v45 = vunpack.c.l.bf16 %v430_v61  ;;  %v397_v39 = vld [vmem:[#allocation5 + $0x628] sm:$0xff] }
 0x193   :  { %1642 = vmatpush2.msra.mxu1 %v822_v46  ;;  %1574 = vmatprep.subr.mxu0 %v619_v49  ;;  %v424_v46 = vld [vmem:[#allocation5 + $0x700] sm:$0xff]  ;;  %v1970_v49 = vunpack.c.h.bf16 %v1765_v43 }
 0x194   :  { %1643 = vmatprep.subr.mxu1 %v817_v50  ;;  %1575 = vmatpush2.msra.mxu0 %v618_v51  ;;  %v421_v50 = vld [vmem:[#allocation5 + $0x6e8] sm:$0xff]  ;;  %v1969_v51 = vunpack.c.l.bf16 %v1765_v43  ;;  %v937_v53 = vunpack.c.h.bf16 %v424_v46  ;;  %v394_v43 = vld [vmem:[#allocation5 + $0x610] sm:$0xff] }
 0x195   :  { %1644 = vmatpush2.msra.mxu1 %v816_v52  ;;  %1576 = vmatprep.subr.mxu0 %v613_v55  ;;  %v1761_v52 = vld [vmem:[#allocation8 + $0x78] sm:$0xff]  ;;  %v936_v55 = vunpack.c.l.bf16 %v424_v46  ;;  %v931_v59 = vunpack.c.h.bf16 %v421_v50 }
 0x196   :  { %1645 = vmatprep.subr.mxu1 %v811_v56  ;;  %1577 = vmatpush2.msra.mxu0 %v612_v57  ;;  %v418_v56 = vld [vmem:[#allocation5 + $0x6d0] sm:$0xff]  ;;  %v1966_v57 = vunpack.c.l.bf16 %v1763_v48  ;;  %v1964_v60 = vunpack.c.h.bf16 %v1761_v52  ;;  %v487_v48 = vld [vmem:[#allocation5 + $0x8f8] sm:$0xff] }
 0x197   :  { %1646 = vmatpush2.msra.mxu1 %v810_v58  ;;  %1578 = vmatprep.subr.mxu0 %v607_v62  ;;  %v1759_v58 = vld [vmem:[#allocation8 + $0x6c] sm:$0xff]  ;;  %v930_v62 = vunpack.c.l.bf16 %v421_v50  ;;  %v925_v2 = vunpack.c.h.bf16 %v418_v56 }
 0x198   :  { %1647 = vmatprep.subr.mxu1 %v805_v63  ;;  %1579 = vmatpush2.msra.mxu0 %v606_v0  ;;  %v415_v63 = vld [vmem:[#allocation5 + $0x6b8] sm:$0xff]  ;;  %v1963_v0 = vunpack.c.l.bf16 %v1761_v52  ;;  %v1961_v3 = vunpack.c.h.bf16 %v1759_v58  ;;  %v484_v52 = vld [vmem:[#allocation5 + $0x8e0] sm:$0xff] }
 0x199   :  { %1648 = vmatpush2.msra.mxu1 %v804_v1  ;;  %1580 = vmatprep.subr.mxu0 %v601_v5  ;;  %v1757_v1 = vld [vmem:[#allocation8 + $0x60] sm:$0xff]  ;;  %v924_v5 = vunpack.c.l.bf16 %v418_v56  ;;  %v919_v10 = vunpack.c.h.bf16 %v415_v63 }
 0x19a   :  { %1649 = vmatprep.subr.mxu1 %v799_v6  ;;  %1581 = vmatpush2.msra.mxu0 %v600_v7  ;;  %v412_v6 = vld [vmem:[#allocation5 + $0x6a0] sm:$0xff]  ;;  %v1960_v7 = vunpack.c.l.bf16 %v1759_v58  ;;  %v1958_v12 = vunpack.c.h.bf16 %v1757_v1  ;;  %v481_v58 = vld [vmem:[#allocation5 + $0x8c8] sm:$0xff] }
 0x19b   :  { %1650 = vmatpush2.msra.mxu1 %v798_v8  ;;  %1582 = vmatprep.subr.mxu0 %v595_v13  ;;  %v1755_v8 = vld [vmem:[#allocation8 + $0x54] sm:$0xff]  ;;  %v918_v13 = vunpack.c.l.bf16 %v415_v63  ;;  %v912_v19 = vunpack.c.l.bf16 %v412_v6 }
 0x19c   :  { %1651 = vmatprep.subr.mxu1 %v793_v14  ;;  %1583 = vmatpush2.msra.mxu0 %v594_v15  ;;  %v409_v14 = vld [vmem:[#allocation5 + $0x688] sm:$0xff]  ;;  %v1957_v15 = vunpack.c.l.bf16 %v1757_v1  ;;  %v478_v1 = vld [vmem:[#allocation5 + $0x8b0] sm:$0xff] }
 0x19d   :  { %1652 = vmatpush2.msra.mxu1 %v792_v16  ;;  %1584 = vmatprep.subr.mxu0 %v589_v17  ;;  %v1753_v16 = vld [vmem:[#allocation8 + $0x48] sm:$0xff]  ;;  %v913_v17 = vunpack.c.h.bf16 %v412_v6  ;;  %v906_v27 = vunpack.c.l.bf16 %v409_v14 }
 0x19e   :  { %1653 = vmatprep.subr.mxu1 %v787_v18  ;;  %1585 = vmatpush2.msra.mxu0 %v588_v21  ;;  %v1955_v18 = vunpack.c.h.bf16 %v1755_v8  ;;  %v1954_v21 = vunpack.c.l.bf16 %v1755_v8  ;;  %v475_v8 = vld [vmem:[#allocation5 + $0x898] sm:$0xff] }
 0x19f   :  { %1586 = vmatprep.mubr.f32.mxu0 %v3731_v30  ;;  %1654 = vmatpush2.msra.mxu1 %v786_v23  ;;  %v1751_v23 = vld [vmem:[#allocation8 + $0x3c] sm:$0xff]  ;;  %v1749_v30 = vld [vmem:[#allocation8 + $0x30] sm:$0xff] }
 0x1a0   :  { %1587 = vmatmul.mubr.f32.vlgmr.msra.gmra.mxu0 %v3732_v34  ;;  %1655 = vmatprep.subr.mxu1 %v781_v24  ;;  %v907_v24 = vunpack.c.h.bf16 %v409_v14  ;;  %v1949_v32 = vunpack.c.h.bf16 %v1751_v23  ;;  %v400_v34 = vld [vmem:[#allocation5 + $0x640] sm:$0xff]  ;;  %v1946_v61 = vunpack.c.h.bf16 %v1749_v30 }
 0x1a1   :  { %1664 = vmatprep.subr.mxu0 %v967_v25  ;;  %1656 = vmatpush2.msra.mxu1 %v780_v29  ;;  %v1952_v25 = vunpack.c.h.bf16 %v1753_v16  ;;  %v1951_v29 = vunpack.c.l.bf16 %v1753_v16  ;;  %v472_v16 = vld [vmem:[#allocation5 + $0x880] sm:$0xff] }
 0x1a2   :  { %1657 = vmatprep.mubr.f32.mxu1 %v4164_v22  ;;  %1665 = vmatpush1.msra.mxu0 %v966_v31  ;;  %v943_v22 = vunpack.c.h.bf16 %v427_v42  ;;  %v901_v31 = vunpack.c.h.bf16 %v406_v20 }
 0x1a3   :  { %1658 = vmatmul.mubr.f32.vlgmr.msra.gmra.mxu1 %v4167_v26  ;;  %1666 = vmatprep.subr.mxu0 %v961_v35  ;;  %v942_v26 = vunpack.c.l.bf16 %v427_v42  ;;  %v1948_v35 = vunpack.c.l.bf16 %v1751_v23  ;;  %v469_v23 = vld [vmem:[#allocation5 + $0x868] sm:$0xff] }
 0x1a4   :  { %2238 = vmatprep.subr.mxu1 %v1979_v36  ;;  %1667 = vmatpush1.msra.mxu0 %v960_v37  ;;  %v1747_v36 = vld [vmem:[#allocation8 + $0x24] sm:$0xff]  ;;  %v895_v37 = vunpack.c.h.bf16 %v403_v28 }
 0x1a5   :  { %2239 = vmatpush1.msra.mxu1 %v1978_v38  ;;  %1668 = vmatprep.subr.mxu0 %v955_v40  ;;  %v894_v38 = vunpack.c.l.bf16 %v403_v28  ;;  %v1945_v40 = vunpack.c.l.bf16 %v1749_v30  ;;  %v1943_v42 = vunpack.c.h.bf16 %v1747_v36  ;;  %v1032_v30 = vunpack.c.l.bf16 %v472_v16 }
 0x1a6   :  { %2240 = vmatprep.subr.mxu1 %v1976_v41  ;;  %1669 = vmatpush1.msra.mxu0 %v954_v4  ;;  %v1745_v41 = vld [vmem:[#allocation8 + $0x18] sm:$0xff]  ;;  %v889_v4 = vunpack.c.h.bf16 %v400_v34 }
 0x1a7   :  { %2241 = vmatpush1.msra.mxu1 %v1975_v9  ;;  %1670 = vmatprep.subr.mxu0 %v949_v11  ;;  %v888_v9 = vunpack.c.l.bf16 %v400_v34  ;;  %v1942_v11 = vunpack.c.l.bf16 %v1747_v36  ;;  %v1940_v46 = vunpack.c.h.bf16 %v1745_v41  ;;  %v1027_v34 = vunpack.c.h.bf16 %v469_v23 }
 0x1a8   :  { %2242 = vmatprep.subr.mxu1 %v1973_v44  ;;  %1671 = vmatpush1.msra.mxu0 %v948_v45  ;;  %v1743_v44 = vld [vmem:[#allocation8 + $0xc] sm:$0xff]  ;;  %v883_v45 = vunpack.c.h.bf16 %v397_v39  ;;  %v1026_v36 = vunpack.c.l.bf16 %v469_v23 }
 0x1a9   :  { %2243 = vmatpush1.msra.mxu1 %v1972_v47  ;;  %1672 = vmatprep.subr.mxu0 %v943_v22  ;;  %v882_v47 = vunpack.c.l.bf16 %v397_v39  ;;  %v1939_v22 = vunpack.c.l.bf16 %v1745_v41  ;;  %v1937_v50 = vunpack.c.h.bf16 %v1743_v44 }
 0x1aa   :  { %2244 = vmatprep.subr.mxu1 %v1970_v49  ;;  %1673 = vmatpush1.msra.mxu0 %v942_v26  ;;  %v1741_v49 = vld [vmem:[#allocation8] sm:$0xff]  ;;  %v877_v26 = vunpack.c.h.bf16 %v394_v43 }
 0x1ab   :  { %2245 = vmatpush1.msra.mxu1 %v1969_v51  ;;  %1674 = vmatprep.subr.mxu0 %v937_v53  ;;  %v876_v51 = vunpack.c.l.bf16 %v394_v43  ;;  %v1936_v53 = vunpack.c.l.bf16 %v1743_v44  ;;  %v1934_v56 = vunpack.c.h.bf16 %v1741_v49  ;;  %v1787_v43 = vld [vmem:[#allocation8 + $0x114] sm:$0xff] }
 0x1ac   :  { %2246 = vmatprep.subr.mxu1 %v1967_v54  ;;  %1675 = vmatpush1.msra.mxu0 %v936_v55  ;;  %v1803_v54 = vld [vmem:[#allocation8 + $0x174] sm:$0xff]  ;;  %v1063_v55 = vunpack.c.h.bf16 %v487_v48 }
 0x1ad   :  { %2247 = vmatpush1.msra.mxu1 %v1966_v57  ;;  %1676 = vmatprep.subr.mxu0 %v931_v59  ;;  %v1062_v57 = vunpack.c.l.bf16 %v487_v48  ;;  %v1933_v59 = vunpack.c.l.bf16 %v1741_v49  ;;  %v2027_v63 = vunpack.c.h.bf16 %v1803_v54  ;;  %v1785_v48 = vld [vmem:[#allocation8 + $0x108] sm:$0xff]  ;;  %v2003_v49 = vunpack.c.h.bf16 %v1787_v43 }
 0x1ae   :  { %2248 = vmatprep.subr.mxu1 %v1964_v60  ;;  %1677 = vmatpush1.msra.mxu0 %v930_v62  ;;  %v1801_v60 = vld [vmem:[#allocation8 + $0x168] sm:$0xff]  ;;  %v1057_v62 = vunpack.c.h.bf16 %v484_v52 }
 0x1af   :  { %2249 = vmatpush1.msra.mxu1 %v1963_v0  ;;  %1678 = vmatprep.subr.mxu0 %v925_v2  ;;  %v1056_v0 = vunpack.c.l.bf16 %v484_v52  ;;  %v2026_v2 = vunpack.c.l.bf16 %v1803_v54  ;;  %v2024_v6 = vunpack.c.h.bf16 %v1801_v60  ;;  %v454_v52 = vld [vmem:[#allocation5 + $0x7f0] sm:$0xff]  ;;  %v1783_v54 = vld [vmem:[#allocation8 + $0xfc] sm:$0xff] }
 0x1b0   :  { %2250 = vmatprep.subr.mxu1 %v1961_v3  ;;  %1679 = vmatpush1.msra.mxu0 %v924_v5  ;;  %v1799_v3 = vld [vmem:[#allocation8 + $0x15c] sm:$0xff]  ;;  %v1051_v5 = vunpack.c.h.bf16 %v481_v58 }
 0x1b1   :  { %2251 = vmatpush1.msra.mxu1 %v1960_v7  ;;  %1680 = vmatprep.subr.mxu0 %v919_v10  ;;  %v1050_v7 = vunpack.c.l.bf16 %v481_v58  ;;  %v2023_v10 = vunpack.c.l.bf16 %v1801_v60  ;;  %v2021_v14 = vunpack.c.h.bf16 %v1799_v3  ;;  %v2000_v58 = vunpack.c.h.bf16 %v1785_v48  ;;  %v451_v60 = vld [vmem:[#allocation5 + $0x7d8] sm:$0xff] }
 0x1b2   :  { %2252 = vmatprep.subr.mxu1 %v1958_v12  ;;  %1681 = vmatpush1.msra.mxu0 %v918_v13  ;;  %v1797_v12 = vld [vmem:[#allocation8 + $0x150] sm:$0xff]  ;;  %v1045_v13 = vunpack.c.h.bf16 %v478_v1 }
 0x1b3   :  { %2253 = vmatpush1.msra.mxu1 %v1957_v15  ;;  %1682 = vmatprep.subr.mxu0 %v913_v17  ;;  %v1044_v15 = vunpack.c.l.bf16 %v478_v1  ;;  %v2020_v17 = vunpack.c.l.bf16 %v1799_v3  ;;  %v2018_v20 = vunpack.c.h.bf16 %v1797_v12  ;;  %v1997_v1 = vunpack.c.h.bf16 %v1783_v54 }
 0x1b4   :  { %2254 = vmatprep.subr.mxu1 %v1955_v18  ;;  %1683 = vmatpush1.msra.mxu0 %v912_v19  ;;  %v1795_v18 = vld [vmem:[#allocation8 + $0x144] sm:$0xff]  ;;  %v1039_v19 = vunpack.c.h.bf16 %v475_v8 }
 0x1b5   :  { %2255 = vmatpush1.msra.mxu1 %v1954_v21  ;;  %1684 = vmatprep.subr.mxu0 %v907_v24  ;;  %v1038_v21 = vunpack.c.l.bf16 %v475_v8  ;;  %v2017_v24 = vunpack.c.l.bf16 %v1797_v12  ;;  %v2015_v28 = vunpack.c.h.bf16 %v1795_v18  ;;  %v991_v12 = vunpack.c.h.bf16 %v451_v60 }
 0x1b6   :  { %2256 = vmatprep.subr.mxu1 %v1952_v25  ;;  %1685 = vmatpush1.msra.mxu0 %v906_v27  ;;  %v1793_v25 = vld [vmem:[#allocation8 + $0x138] sm:$0xff]  ;;  %v1033_v27 = vunpack.c.h.bf16 %v472_v16  ;;  %v445_v16 = vld [vmem:[#allocation5 + $0x7a8] sm:$0xff] }
 0x1b7   :  { %2257 = vmatpush1.msra.mxu1 %v1951_v29  ;;  %1686 = vmatprep.subr.mxu0 %v901_v31  ;;  %v1066_v29 = vlaneseq  ;;  %v466_v31 = vld [vmem:[#allocation5 + $0x850] sm:$0xff] }
 0x1b8   :  { %2258 = vmatprep.subr.mxu1 %v1949_v32  ;;  %1687 = vmatpush1.msra.mxu0 %v900_v33  ;;  %v2014_v32 = vunpack.c.l.bf16 %v1795_v18  ;;  %v1791_v33 = vld [vmem:[#allocation8 + $0x12c] sm:$0xff]  ;;  %v1021_v39 = vunpack.c.h.bf16 %v466_v31 }
 0x1b9   :  { %2259 = vmatpush1.msra.mxu1 %v1948_v35  ;;  %1688 = vmatprep.subr.mxu0 %v895_v37  ;;  %v2012_v35 = vunpack.c.h.bf16 %v1793_v25  ;;  %v463_v37 = vld [vmem:[#allocation5 + $0x838] sm:$0xff]  ;;  %v4174_v41 = vshrl.u32 %v1066_v29, 7 }
 0x1ba   :  { %2260 = vmatprep.subr.mxu1 %v1946_v61  ;;  %1689 = vmatpush1.msra.mxu0 %v894_v38  ;;  %v2011_v61 = vunpack.c.l.bf16 %v1793_v25  ;;  %v1789_v38 = vld [vmem:[#allocation8 + $0x120] sm:$0xff] }
 0x1bb   :  { %2261 = vmatpush1.msra.mxu1 %v1945_v40  ;;  %1690 = vmatprep.subr.mxu0 %v889_v4  ;;  %v2009_v40 = vunpack.c.h.bf16 %v1791_v33  ;;  %v1020_v4 = vunpack.c.l.bf16 %v466_v31  ;;  %v2006_v44 = vunpack.c.h.bf16 %v1789_v38  ;;  %v978_v31 = vunpack.c.l.bf16 %v445_v16 }
 0x1bc   :  { %2262 = vmatprep.subr.mxu1 %v1943_v42  ;;  %1691 = vmatpush1.msra.mxu0 %v888_v9  ;;  %v460_v42 = vld [vmem:[#allocation5 + $0x820] sm:$0xff]  ;;  %v2008_v9 = vunpack.c.l.bf16 %v1791_v33 }
 0x1bd   :  { %2263 = vmatpush1.msra.mxu1 %v1942_v11  ;;  %1692 = vmatprep.subr.mxu0 %v883_v45  ;;  %v1015_v11 = vunpack.c.h.bf16 %v463_v37  ;;  %v1014_v45 = vunpack.c.l.bf16 %v463_v37  ;;  %v1773_v37 = vld [vmem:[#allocation8 + $0xc0] sm:$0xff] }
 0x1be   :  { %2264 = vmatprep.subr.mxu1 %v1940_v46  ;;  %1693 = vmatpush1.msra.mxu0 %v882_v47  ;;  %v457_v46 = vld [vmem:[#allocation5 + $0x808] sm:$0xff]  ;;  %v2005_v47 = vunpack.c.l.bf16 %v1789_v38 }
 0x1bf   :  { %2265 = vmatpush1.msra.mxu1 %v1939_v22  ;;  %1694 = vmatprep.subr.mxu0 %v877_v26  ;;  %v1009_v22 = vunpack.c.h.bf16 %v460_v42  ;;  %v4177_v26 = vsub.s32 0, %v4174_v41 }
 0x1c0   :  { %2266 = vmatprep.subr.mxu1 %v1937_v50  ;;  %1695 = vmatpush1.msra.mxu0 %v876_v51  ;;  %v4180_v50 = vsub.s32 1, %v4174_v41  ;;  %v1008_v51 = vunpack.c.l.bf16 %v460_v42 }
 0x1c1   :  { %2267 = vmatpush1.msra.mxu1 %v1936_v53  ;;  %1696 = vmatprep.subr.mxu0 %v1063_v55  ;;  %v2002_v53 = vunpack.c.l.bf16 %v1787_v43  ;;  %v4182_v55 = vld [vmem:[#allocation7] sm:$0x3f] }
 0x1c2   :  { %2268 = vmatprep.subr.mxu1 %v1934_v56  ;;  %1697 = vmatpush2.msra.mxu0 %v1062_v57  ;;  %v1162_v56 = vpop.f32.mrf.mxu0  ;;  %v1003_v57 = vunpack.c.h.bf16 %v457_v46  ;;  %v1073_v3 = vrot.slane %v4182_v55, %v4180_v50 }
 0x1c3   :  { %2269 = vmatpush1.msra.mxu1 %v1933_v59  ;;  %1698 = vmatprep.subr.mxu0 %v1057_v62  ;;  %v1002_v59 = vunpack.c.l.bf16 %v457_v46  ;;  %v1999_v62 = vunpack.c.l.bf16 %v1785_v48  ;;  %v1981_v46 = vunpack.c.l.bf16 %v1773_v37 }
 0x1c4   :  { %2270 = vmatprep.subr.mxu1 %v2027_v63  ;;  %1699 = vmatpush2.msra.mxu0 %v1056_v0  ;;  %v1781_v63 = vld [vmem:[#allocation8 + $0xf0] sm:$0xff]  ;;  %v997_v0 = vunpack.c.h.bf16 %v454_v52  ;;  %v1164_v8 = vpop.f32.mrf.mxu0 }
 0x1c5   :  { %2271 = vmatpush2.msra.mxu1 %v2026_v2  ;;  %1700 = vmatprep.subr.mxu0 %v1051_v5  ;;  %v1069_v2 = vrot.slane %v4182_v55, %v4177_v26  ;;  %v996_v5 = vunpack.c.l.bf16 %v454_v52  ;;  %v1993_v18 = vunpack.c.l.bf16 %v1781_v63 }
 0x1c6   :  { %2272 = vmatprep.subr.mxu1 %v2024_v6  ;;  %1701 = vmatpush2.msra.mxu0 %v1050_v7  ;;  %v448_v6 = vld [vmem:[#allocation5 + $0x7c0] sm:$0xff]  ;;  %v1996_v7 = vunpack.c.l.bf16 %v1783_v54 }
 0x1c7   :  { %2273 = vmatpush2.msra.mxu1 %v2023_v10  ;;  %1702 = vmatprep.subr.mxu0 %v1045_v13  ;;  %v1233_v10 = vpop.f32.mrf.mxu1  ;;  %v1994_v13 = vunpack.c.h.bf16 %v1781_v63  ;;  %v984_v23 = vunpack.c.l.bf16 %v448_v6  ;;  %v1897_v63 = vld [vmem:[#allocation8 + $0x3a8] sm:$0xff] }
 0x1c8   :  { %2274 = vmatprep.subr.mxu1 %v2021_v14  ;;  %1703 = vmatpush2.msra.mxu0 %v1044_v15  ;;  %v1779_v14 = vld [vmem:[#allocation8 + $0xe4] sm:$0xff]  ;;  %v990_v15 = vunpack.c.l.bf16 %v451_v60 }
 0x1c9   :  { %2275 = vmatpush2.msra.mxu1 %v2020_v17  ;;  %1704 = vmatprep.subr.mxu0 %v1039_v19  ;;  %v985_v17 = vunpack.c.h.bf16 %v448_v6  ;;  %v1777_v19 = vld [vmem:[#allocation8 + $0xd8] sm:$0xff]  ;;  %v1991_v25 = vunpack.c.h.bf16 %v1779_v14  ;;  %v1990_v29 = vunpack.c.l.bf16 %v1779_v14  ;;  %v2168_v6 = vunpack.c.h.bf16 %v1897_v63 }
 0x1ca   :  { %2276 = vmatprep.subr.mxu1 %v2018_v20  ;;  %1705 = vmatpush2.msra.mxu0 %v1038_v21  ;;  %v1163_v20 = vadd.f32 %v1162_v56, %v1069_v2  ;;  %v1165_v21 = vadd.f32 %v1164_v8, %v1073_v3  ;;  %v1988_v33 = vunpack.c.h.bf16 %v1777_v19  ;;  %v1829_v56 = vld [vmem:[#allocation8 + $0x210] sm:$0xff]  ;;  %v1825_v2 = vld [vmem:[#allocation8 + $0x1f8] sm:$0xff]  ;;  %v2167_v8 = vunpack.c.l.bf16 %v1897_v63 }
 0x1cb   :  { %2277 = vmatpush2.msra.mxu1 %v2017_v24  ;;  %1706 = vmatprep.subr.mxu0 %v1033_v27  ;;  %v442_v24 = vld [vmem:[#allocation5 + $0x790] sm:$0xff]  ;;  %v1235_v27 = vpop.f32.mrf.mxu1  ;;  %v2066_v60 = vunpack.c.h.bf16 %v1829_v56 }
 0x1cc   :  { %2278 = vmatprep.subr.mxu1 %v2015_v28  ;;  %1707 = vmatpush2.msra.mxu0 %v1032_v30  ;;  %v979_v28 = vunpack.c.h.bf16 %v445_v16  ;;  %v1775_v30 = vld [vmem:[#allocation8 + $0xcc] sm:$0xff]  ;;  %v1236_v38 = vadd.f32 %v1235_v27, %v1165_v21  ;;  %v1819_v27 = vld [vmem:[#allocation8 + $0x1d4] sm:$0xff] }
 0x1cd   :  { %2279 = vmatpush2.msra.mxu1 %v2014_v32  ;;  %1708 = vmatprep.subr.mxu0 %v1027_v34  ;;  %v3733_v32 = vld [vmem:[#allocation2 + $0x28] sm:$0xff]  ;;  %v973_v34 = vunpack.c.h.bf16 %v442_v24 }
 0x1ce   :  { %2280 = vmatprep.subr.mxu1 %v2012_v35  ;;  %1709 = vmatpush2.msra.mxu0 %v1026_v36  ;;  %v1987_v36 = vunpack.c.l.bf16 %v1777_v19  ;;  %v1821_v19 = vld [vmem:[#allocation8 + $0x1e0] sm:$0xff] }
 0x1cf   :  { %2281 = vmatpush2.msra.mxu1 %v2011_v61  ;;  %1710 = vmatprep.subr.mxu0 %v1021_v39  ;;  %v1234_v61 = vadd.f32 %v1233_v10, %v1163_v20  ;;  %v972_v39 = vunpack.c.l.bf16 %v442_v24  ;;  %v1893_v10 = vld [vmem:[#allocation8 + $0x390] sm:$0xff]  ;;  %v1889_v24 = vld [vmem:[#allocation8 + $0x378] sm:$0xff] }
 0x1d0   :  { %2282 = vmatprep.subr.mxu1 %v2009_v40  ;;  %1711 = vmatpush2.msra.mxu0 %v1020_v4  ;;  %v1985_v40 = vunpack.c.h.bf16 %v1775_v30  ;;  %v1835_v4 = vld [vmem:[#allocation8 + $0x234] sm:$0xff]  ;;  %v2162_v20 = vunpack.c.h.bf16 %v1893_v10 }
 0x1d1   :  { %2283 = vmatpush2.msra.mxu1 %v2008_v9  ;;  %1712 = vmatprep.subr.mxu0 %v1015_v11  ;;  %v1984_v9 = vunpack.c.l.bf16 %v1775_v30 }
 0x1d2   :  { %2284 = vmatprep.subr.mxu1 %v2006_v44  ;;  %1713 = vmatpush2.msra.mxu0 %v1014_v45  ;;  %v1982_v44 = vunpack.c.h.bf16 %v1773_v37  ;;  %v1833_v45 = vld [vmem:[#allocation8 + $0x228] sm:$0xff]  ;;  %v1885_v37 = vld [vmem:[#allocation8 + $0x360] sm:$0xff] }
 0x1d3   :  { %2285 = vmatpush2.msra.mxu1 %v2005_v47  ;;  %1714 = vmatprep.subr.mxu0 %v1009_v22  ;;  %v2075_v47 = vunpack.c.h.bf16 %v1835_v4  ;;  %v2074_v22 = vunpack.c.l.bf16 %v1835_v4  ;;  %v2072_v52 = vunpack.c.h.bf16 %v1833_v45  ;;  %v2071_v54 = vunpack.c.l.bf16 %v1833_v45 }
 0x1d4   :  { %2286 = vmatprep.subr.mxu1 %v2003_v49  ;;  %1715 = vmatpush2.msra.mxu0 %v1008_v51  ;;  %v1831_v49 = vld [vmem:[#allocation8 + $0x21c] sm:$0xff]  ;;  %v3734_v51 = vld [vmem:[#allocation2 + $0x20] sm:$0xff]  ;;  %v2150_v45 = vunpack.c.h.bf16 %v1885_v37 }
 0x1d5   :  { %2287 = vmatpush2.msra.mxu1 %v2002_v53  ;;  %1716 = vmatprep.subr.mxu0 %v1003_v57  ;;  %v2069_v57 = vunpack.c.h.bf16 %v1831_v49 }
 0x1d6   :  { %2288 = vmatprep.subr.mxu1 %v2000_v58  ;;  %1717 = vmatpush2.msra.mxu0 %v1002_v59  ;;  %v2068_v58 = vunpack.c.l.bf16 %v1831_v49  ;;  %v1827_v59 = vld [vmem:[#allocation8 + $0x204] sm:$0xff] }
 0x1d7   :  { %2289 = vmatpush2.msra.mxu1 %v1999_v62  ;;  %1718 = vmatprep.subr.mxu0 %v997_v0  ;;  %v1899_v62 = vld [vmem:[#allocation8 + $0x3b4] sm:$0xff]  ;;  %v1895_v0 = vld [vmem:[#allocation8 + $0x39c] sm:$0xff] }
 0x1d8   :  { %2290 = vmatprep.subr.mxu1 %v1997_v1  ;;  %1719 = vmatpush2.msra.mxu0 %v996_v5  ;;  %v2065_v1 = vunpack.c.l.bf16 %v1829_v56  ;;  %v2170_v3 = vunpack.c.l.bf16 %v1899_v62  ;;  %v2171_v5 = vunpack.c.h.bf16 %v1899_v62  ;;  %v2165_v14 = vunpack.c.h.bf16 %v1895_v0 }
 0x1d9   :  { %2291 = vmatpush2.msra.mxu1 %v1996_v7  ;;  %1720 = vmatprep.subr.mxu0 %v991_v12  ;;  %v2063_v7 = vunpack.c.h.bf16 %v1827_v59  ;;  %v2062_v12 = vunpack.c.l.bf16 %v1827_v59  ;;  %v2164_v16 = vunpack.c.l.bf16 %v1895_v0  ;;  %v1809_v59 = vld [vmem:[#allocation8 + $0x198] sm:$0xff]  ;;  %v1877_v0 = vld [vmem:[#allocation8 + $0x330] sm:$0xff] }
 0x1da   :  { %2292 = vmatprep.subr.mxu1 %v1994_v13  ;;  %1721 = vmatpush2.msra.mxu0 %v990_v15  ;;  %v1823_v13 = vld [vmem:[#allocation8 + $0x1ec] sm:$0xff]  ;;  %v2060_v15 = vunpack.c.h.bf16 %v1825_v2 }
 0x1db   :  { %1728 = vmatprep.mubr.f32.mxu0 %v3733_v32  ;;  %1722 = vmatprep.subr.mxu0 %v985_v17  ;;  %v1891_v17 = vld [vmem:[#allocation8 + $0x384] sm:$0xff]  ;;  %v2057_v21 = vunpack.c.h.bf16 %v1823_v13  ;;  %v2053_v32 = vunpack.c.l.bf16 %v1821_v19 }
 0x1dc   :  { %2293 = vmatpush2.msra.mxu1 %v1993_v18  ;;  %v1304_v35 = vpop.f32.mrf.mxu0  ;;  %1723 = vmatpush2.msra.mxu0 %v984_v23  ;;  %v2059_v18 = vunpack.c.l.bf16 %v1825_v2  ;;  %v2161_v23 = vunpack.c.l.bf16 %v1893_v10  ;;  %v2158_v30 = vunpack.c.l.bf16 %v1891_v17  ;;  %v1807_v2 = vld [vmem:[#allocation8 + $0x18c] sm:$0xff]  ;;  %v1805_v10 = vld [vmem:[#allocation8 + $0x180] sm:$0xff] }
 0x1dd   :  { %2294 = vmatprep.subr.mxu1 %v1991_v25  ;;  %1724 = vmatprep.subr.mxu0 %v979_v28  ;;  %v4188_v43 = vadd.f32 %v1304_v35, %v1234_v61  ;;  %v2056_v25 = vunpack.c.l.bf16 %v1823_v13  ;;  %v2159_v28 = vunpack.c.h.bf16 %v1891_v17  ;;  %v2051_v35 = vunpack.c.h.bf16 %v1819_v27  ;;  %v1867_v17 = vld [vmem:[#allocation8 + $0x2f4] sm:$0xff] }
 0x1de   :  { %2295 = vmatpush2.msra.mxu1 %v1990_v29  ;;  %v1306_v42 = vpop.f32.mrf.mxu0  ;;  %1725 = vmatpush2.msra.mxu0 %v978_v31  ;;  %v2054_v29 = vunpack.c.h.bf16 %v1821_v19  ;;  %v1887_v31 = vld [vmem:[#allocation8 + $0x36c] sm:$0xff]  ;;  %v2050_v61 = vunpack.c.l.bf16 %v1819_v27  ;;  %v2033_v13 = vunpack.c.h.bf16 %v1807_v2  ;;  %v2030_v19 = vunpack.c.h.bf16 %v1805_v10 }
 0x1df   :  { %v4190_v11 = vadd.f32 %v1306_v42, %v1236_v38  ;;  %2296 = vmatprep.subr.mxu1 %v1988_v33  ;;  %1726 = vmatprep.subr.mxu0 %v973_v34  ;;  %v1735_v53 = vmax.f32 %v4188_v43, 0.0  ;;  %v1817_v33 = vld [vmem:[#allocation8 + $0x1c8] sm:$0xff]  ;;  %v2156_v34 = vunpack.c.h.bf16 %v1889_v24  ;;  %v1815_v38 = vld [vmem:[#allocation8 + $0x1bc] sm:$0xff]  ;;  %v2152_v4 = vunpack.c.l.bf16 %v1887_v31  ;;  %v1883_v42 = vld [vmem:[#allocation8 + $0x354] sm:$0xff] }
 0x1e0   :  { %2297 = vmatpush2.msra.mxu1 %v1987_v36  ;;  %1727 = vmatpush2.msra.mxu0 %v972_v39  ;;  %v2155_v36 = vunpack.c.l.bf16 %v1889_v24  ;;  %v2153_v39 = vunpack.c.h.bf16 %v1887_v31  ;;  %v2044_v49 = vunpack.c.l.bf16 %v1815_v38  ;;  %v2146_v56 = vunpack.c.l.bf16 %v1883_v42  ;;  %v1865_v24 = vld [vmem:[#allocation8 + $0x2e8] sm:$0xff]  ;;  %v1863_v31 = vld [vmem:[#allocation8 + $0x2dc] sm:$0xff] }
 0x1e1   :  { %v1736_v48 = vmax.f32 %v4190_v11, 0.0  ;;  %2298 = vmatprep.subr.mxu1 %v1985_v40  ;;  %1729 = vmatmul.mubr.f32.vlgmr.msra.gmra.mxu0 %v3734_v51  ;;  %v2048_v40 = vunpack.c.h.bf16 %v1817_v33  ;;  %v1811_v51 = vld [vmem:[#allocation8 + $0x1a4] sm:$0xff]  ;;  %v2123_v27 = vunpack.c.h.bf16 %v1867_v17 }
 0x1e2   :  { %2299 = vmatpush2.msra.mxu1 %v1984_v9  ;;  %2309 = vmatprep.subr.mxu0 %v2075_v47  ;;  %v2047_v9 = vunpack.c.l.bf16 %v1817_v33  ;;  %v2149_v47 = vunpack.c.l.bf16 %v1885_v37  ;;  %v2039_v62 = vunpack.c.h.bf16 %v1811_v51  ;;  %v2120_v33 = vunpack.c.h.bf16 %v1865_v24  ;;  %v1861_v37 = vld [vmem:[#allocation8 + $0x2d0] sm:$0xff] }
 0x1e3   :  { %2300 = vmatprep.subr.mxu1 %v1982_v44  ;;  %2302 = vmatprep.mubr.f32.mxu1 %v1736_v48  ;;  %v1813_v44 = vld [vmem:[#allocation8 + $0x1b0] sm:$0xff] }
 0x1e4   :  { %2301 = vmatpush2.msra.mxu1 %v1981_v46  ;;  %2310 = vmatpush1.msra.mxu0 %v2074_v22  ;;  %v2045_v46 = vunpack.c.h.bf16 %v1815_v38  ;;  %v1881_v22 = vld [vmem:[#allocation8 + $0x348] sm:$0xff]  ;;  %v2117_v38 = vunpack.c.h.bf16 %v1863_v31 }
 0x1e5   :  { %2303 = vmatmul.mubr.f32.vlgmr.msra.gmra.mxu1 %v1735_v53  ;;  %2311 = vmatprep.subr.mxu0 %v2072_v52  ;;  %v2147_v52 = vunpack.c.h.bf16 %v1883_v42  ;;  %v2143_v63 = vunpack.c.l.bf16 %v1881_v22  ;;  %v1859_v42 = vld [vmem:[#allocation8 + $0x2c4] sm:$0xff] }
 0x1e6   :  { %2312 = vmatpush1.msra.mxu0 %v2071_v54  ;;  %2380 = vmatprep.subr.mxu1 %v2171_v5  ;;  %v2042_v54 = vunpack.c.h.bf16 %v1813_v44  ;;  %v2036_v5 = vunpack.c.h.bf16 %v1809_v59 }
 0x1e7   :  { %2313 = vmatprep.subr.mxu0 %v2069_v57  ;;  %2381 = vmatpush1.msra.mxu1 %v2170_v3  ;;  %v1879_v57 = vld [vmem:[#allocation8 + $0x33c] sm:$0xff] }
 0x1e8   :  { %2314 = vmatpush1.msra.mxu0 %v2068_v58  ;;  %2382 = vmatprep.subr.mxu1 %v2168_v6  ;;  %v2041_v58 = vunpack.c.l.bf16 %v1813_v44  ;;  %v2141_v3 = vunpack.c.h.bf16 %v1879_v57  ;;  %v2140_v6 = vunpack.c.l.bf16 %v1879_v57  ;;  %v2114_v44 = vunpack.c.h.bf16 %v1861_v37  ;;  %v1855_v57 = vld [vmem:[#allocation8 + $0x2ac] sm:$0xff] }
 0x1e9   :  { %2315 = vmatprep.subr.mxu0 %v2066_v60  ;;  %2383 = vmatpush1.msra.mxu1 %v2167_v8  ;;  %v2144_v60 = vunpack.c.h.bf16 %v1881_v22  ;;  %v2035_v8 = vunpack.c.l.bf16 %v1809_v59  ;;  %v1857_v22 = vld [vmem:[#allocation8 + $0x2b8] sm:$0xff] }
 0x1ea   :  { %2316 = vmatpush1.msra.mxu0 %v2065_v1  ;;  %2384 = vmatprep.subr.mxu1 %v2165_v14  ;;  %v2038_v1 = vunpack.c.l.bf16 %v1811_v51  ;;  %v2137_v14 = vunpack.c.l.bf16 %v1877_v0  ;;  %v2111_v51 = vunpack.c.h.bf16 %v1859_v42  ;;  %v2108_v59 = vunpack.c.h.bf16 %v1857_v22 }
 0x1eb   :  { %2317 = vmatprep.subr.mxu0 %v2063_v7  ;;  %2385 = vmatpush1.msra.mxu1 %v2164_v16  ;;  %v1875_v7 = vld [vmem:[#allocation8 + $0x324] sm:$0xff]  ;;  %v2032_v16 = vunpack.c.l.bf16 %v1807_v2  ;;  %v2105_v2 = vunpack.c.h.bf16 %v1855_v57 }
 0x1ec   :  { %2318 = vmatpush1.msra.mxu0 %v2062_v12  ;;  %2386 = vmatprep.subr.mxu1 %v2162_v20  ;;  %v2138_v12 = vunpack.c.h.bf16 %v1877_v0  ;;  %v2134_v20 = vunpack.c.l.bf16 %v1875_v7  ;;  %v1853_v0 = vld [vmem:[#allocation8 + $0x2a0] sm:$0xff] }
 0x1ed   :  { %2319 = vmatprep.subr.mxu0 %v2060_v15  ;;  %2387 = vmatpush1.msra.mxu1 %v2161_v23  ;;  %v1873_v15 = vld [vmem:[#allocation8 + $0x318] sm:$0xff]  ;;  %v2029_v23 = vunpack.c.l.bf16 %v1805_v10  ;;  %v2102_v10 = vunpack.c.h.bf16 %v1853_v0 }
 0x1ee   :  { %2320 = vmatpush1.msra.mxu0 %v2059_v18  ;;  %2388 = vmatprep.subr.mxu1 %v2159_v28  ;;  %v2135_v18 = vunpack.c.h.bf16 %v1875_v7  ;;  %v2131_v28 = vunpack.c.l.bf16 %v1873_v15  ;;  %v1851_v7 = vld [vmem:[#allocation8 + $0x294] sm:$0xff] }
 0x1ef   :  { %2321 = vmatprep.subr.mxu0 %v2057_v21  ;;  %2389 = vmatpush1.msra.mxu1 %v2158_v30  ;;  %v1871_v21 = vld [vmem:[#allocation8 + $0x30c] sm:$0xff]  ;;  %v2122_v30 = vunpack.c.l.bf16 %v1867_v17  ;;  %v2099_v17 = vunpack.c.h.bf16 %v1851_v7 }
 0x1f0   :  { %2322 = vmatpush1.msra.mxu0 %v2056_v25  ;;  %2390 = vmatprep.subr.mxu1 %v2156_v34  ;;  %v2132_v25 = vunpack.c.h.bf16 %v1873_v15  ;;  %v2128_v34 = vunpack.c.l.bf16 %v1871_v21  ;;  %v1849_v15 = vld [vmem:[#allocation8 + $0x288] sm:$0xff] }
 0x1f1   :  { %2323 = vmatprep.subr.mxu0 %v2054_v29  ;;  %2391 = vmatpush1.msra.mxu1 %v2155_v36  ;;  %v1869_v29 = vld [vmem:[#allocation8 + $0x300] sm:$0xff]  ;;  %v2119_v36 = vunpack.c.l.bf16 %v1865_v24  ;;  %v2096_v24 = vunpack.c.h.bf16 %v1849_v15 }
 0x1f2   :  { %2324 = vmatpush1.msra.mxu0 %v2053_v32  ;;  %2392 = vmatprep.subr.mxu1 %v2153_v39  ;;  %v2129_v32 = vunpack.c.h.bf16 %v1871_v21  ;;  %v2125_v39 = vunpack.c.l.bf16 %v1869_v29  ;;  %v1847_v21 = vld [vmem:[#allocation8 + $0x27c] sm:$0xff] }
 0x1f3   :  { %2325 = vmatprep.subr.mxu0 %v2051_v35  ;;  %2393 = vmatpush1.msra.mxu1 %v2152_v4  ;;  %v1931_v35 = vld [vmem:[#allocation8 + $0x474] sm:$0xff]  ;;  %v2116_v4 = vunpack.c.l.bf16 %v1863_v31 }
 0x1f4   :  { %2326 = vmatpush1.msra.mxu0 %v2050_v61  ;;  %2394 = vmatprep.subr.mxu1 %v2150_v45  ;;  %v2126_v61 = vunpack.c.h.bf16 %v1869_v29  ;;  %v2218_v45 = vunpack.c.l.bf16 %v1931_v35  ;;  %v1076_v29 = vsub.s32 2, %v4174_v41 }
 0x1f5   :  { %2327 = vmatprep.subr.mxu0 %v2048_v40  ;;  %2395 = vmatpush1.msra.mxu1 %v2149_v47  ;;  %v1929_v40 = vld [vmem:[#allocation8 + $0x468] sm:$0xff]  ;;  %v2113_v47 = vunpack.c.l.bf16 %v1861_v37 }
 0x1f6   :  { %2328 = vmatpush1.msra.mxu0 %v2047_v9  ;;  %2396 = vmatprep.subr.mxu1 %v2147_v52  ;;  %v2219_v9 = vunpack.c.h.bf16 %v1931_v35  ;;  %v2215_v52 = vunpack.c.l.bf16 %v1929_v40  ;;  %v2092_v35 = vunpack.c.l.bf16 %v1847_v21  ;;  %v1843_v37 = vld [vmem:[#allocation8 + $0x264] sm:$0xff] }
 0x1f7   :  { %2329 = vmatprep.subr.mxu0 %v2045_v46  ;;  %2397 = vmatpush1.msra.mxu1 %v2146_v56  ;;  %v1927_v46 = vld [vmem:[#allocation8 + $0x45c] sm:$0xff]  ;;  %v2110_v56 = vunpack.c.l.bf16 %v1859_v42  ;;  %v1077_v42 = vrot.slane %v4182_v55, %v1076_v29 }
 0x1f8   :  { %2330 = vmatpush1.msra.mxu0 %v2044_v49  ;;  %2398 = vmatprep.subr.mxu1 %v2144_v60  ;;  %v2216_v49 = vunpack.c.h.bf16 %v1929_v40  ;;  %v2212_v60 = vunpack.c.l.bf16 %v1927_v46 }
 0x1f9   :  { %2331 = vmatprep.subr.mxu0 %v2042_v54  ;;  %2399 = vmatpush1.msra.mxu1 %v2143_v63  ;;  %v1925_v54 = vld [vmem:[#allocation8 + $0x450] sm:$0xff]  ;;  %v2107_v63 = vunpack.c.l.bf16 %v1857_v22 }
 0x1fa   :  { %2332 = vmatpush1.msra.mxu0 %v2041_v58  ;;  %2400 = vmatprep.subr.mxu1 %v2141_v3  ;;  %v2213_v58 = vunpack.c.h.bf16 %v1927_v46  ;;  %v2209_v3 = vunpack.c.l.bf16 %v1925_v54  ;;  %v2087_v46 = vunpack.c.h.bf16 %v1843_v37  ;;  %v1909_v22 = vld [vmem:[#allocation8 + $0x3f0] sm:$0xff] }
 0x1fb   :  { %2333 = vmatprep.subr.mxu0 %v2039_v62  ;;  %2401 = vmatpush1.msra.mxu1 %v2140_v6  ;;  %v1923_v62 = vld [vmem:[#allocation8 + $0x444] sm:$0xff]  ;;  %v2104_v6 = vunpack.c.l.bf16 %v1855_v57 }
 0x1fc   :  { %2334 = vmatpush1.msra.mxu0 %v2038_v1  ;;  %2402 = vmatprep.subr.mxu1 %v2138_v12  ;;  %v2210_v1 = vunpack.c.h.bf16 %v1925_v54  ;;  %v2206_v12 = vunpack.c.l.bf16 %v1923_v62 }
 0x1fd   :  { %2335 = vmatprep.subr.mxu0 %v2036_v5  ;;  %2403 = vmatpush1.msra.mxu1 %v2137_v14  ;;  %v1921_v5 = vld [vmem:[#allocation8 + $0x438] sm:$0xff]  ;;  %v2101_v14 = vunpack.c.l.bf16 %v1853_v0  ;;  %v2186_v0 = vunpack.c.h.bf16 %v1909_v22 }
 0x1fe   :  { %2336 = vmatpush1.msra.mxu0 %v2035_v8  ;;  %2404 = vmatprep.subr.mxu1 %v2135_v18  ;;  %v2207_v8 = vunpack.c.h.bf16 %v1923_v62  ;;  %v2203_v18 = vunpack.c.l.bf16 %v1921_v5 }
 0x1ff   :  { %2337 = vmatprep.subr.mxu0 %v2033_v13  ;;  %2405 = vmatpush1.msra.mxu1 %v2134_v20  ;;  %v1919_v13 = vld [vmem:[#allocation8 + $0x42c] sm:$0xff]  ;;  %v2098_v20 = vunpack.c.l.bf16 %v1851_v7 }
 0x200   :  { %2338 = vmatpush1.msra.mxu0 %v2032_v16  ;;  %2406 = vmatprep.subr.mxu1 %v2132_v25  ;;  %v2204_v16 = vunpack.c.h.bf16 %v1921_v5  ;;  %v2200_v25 = vunpack.c.l.bf16 %v1919_v13  ;;  %v1804_v5 = vld [vmem:[#allocation8 + $0x170] ss:$12 sps:$4 sm:$0xff]  }
 0x201   :  { %2339 = vmatprep.subr.mxu0 %v2030_v19  ;;  %2407 = vmatpush1.msra.mxu1 %v2131_v28  ;;  %v1917_v19 = vld [vmem:[#allocation8 + $0x420] sm:$0xff]  ;;  %v2095_v28 = vunpack.c.l.bf16 %v1849_v15  ;;  %v2028_v15 = vunpack.c.h.bf16 %v1804_v5 }
 0x202   :  { %2340 = vmatpush1.msra.mxu0 %v2029_v23  ;;  %2408 = vmatprep.subr.mxu1 %v2129_v32  ;;  %v2201_v23 = vunpack.c.h.bf16 %v1919_v13  ;;  %v2198_v31 = vunpack.c.h.bf16 %v1917_v19  ;;  %v2093_v32 = vunpack.c.h.bf16 %v1847_v21  ;;  %v1903_v21 = vld [vmem:[#allocation8 + $0x3cc] sm:$0xff] }
 0x203   :  { %2341 = vmatprep.subr.mxu0 %v2123_v27  ;;  %2409 = vmatpush1.msra.mxu1 %v2128_v34  ;;  %v1915_v27 = vld [vmem:[#allocation8 + $0x414] sm:$0xff]  ;;  %v1913_v34 = vld [vmem:[#allocation8 + $0x408] sm:$0xff] }
 0x204   :  { %2342 = vmatpush2.msra.mxu0 %v2122_v30  ;;  %2410 = vmatprep.subr.mxu1 %v2126_v61  ;;  %v1845_v30 = vld [vmem:[#allocation8 + $0x270] sm:$0xff]  ;;  %v2195_v61 = vunpack.c.h.bf16 %v1915_v27  ;;  %v2194_v40 = vunpack.c.l.bf16 %v1915_v27  ;;  %v2177_v27 = vunpack.c.h.bf16 %v1903_v21 }
 0x205   :  { %2343 = vmatprep.subr.mxu0 %v2120_v33  ;;  %2411 = vmatpush1.msra.mxu1 %v2125_v39  ;;  %v2197_v33 = vunpack.c.l.bf16 %v1917_v19  ;;  %v2090_v39 = vunpack.c.h.bf16 %v1845_v30 }
 0x206   :  { %2344 = vmatpush2.msra.mxu0 %v2119_v36  ;;  %2412 = vmatprep.subr.mxu1 %v2219_v9  ;;  %v1080_v36 = vsub.s32 3, %v4174_v41  ;;  %v2089_v9 = vunpack.c.l.bf16 %v1845_v30  ;;  %v2176_v30 = vunpack.c.l.bf16 %v1903_v21 }
 0x207   :  { %2345 = vmatprep.subr.mxu0 %v2117_v38  ;;  %2413 = vmatpush2.msra.mxu1 %v2218_v45  ;;  %v1375_v38 = vpop.f32.mrf.mxu1  ;;  %v2192_v45 = vunpack.c.h.bf16 %v1913_v34 }
 0x208   :  { %2346 = vmatpush2.msra.mxu0 %v2116_v4  ;;  %2414 = vmatprep.subr.mxu1 %v2216_v49  ;;  %v1911_v4 = vld [vmem:[#allocation8 + $0x3fc] sm:$0xff]  ;;  %v1081_v49 = vrot.slane %v4182_v55, %v1080_v36  ;;  %v2185_v55 = vunpack.c.l.bf16 %v1909_v22 }
 0x209   :  { %2347 = vmatprep.subr.mxu0 %v2114_v44  ;;  %2415 = vmatpush2.msra.mxu1 %v2215_v52  ;;  %v1841_v44 = vld [vmem:[#allocation8 + $0x258] sm:$0xff]  ;;  %v1839_v52 = vld [vmem:[#allocation8 + $0x24c] sm:$0xff]  ;;  %v2189_v54 = vunpack.c.h.bf16 %v1911_v4 }
 0x20a   :  { %2348 = vmatpush2.msra.mxu0 %v2113_v47  ;;  %2416 = vmatprep.subr.mxu1 %v2213_v58  ;;  %v2191_v47 = vunpack.c.l.bf16 %v1913_v34  ;;  %v2084_v57 = vunpack.c.h.bf16 %v1841_v44  ;;  %v2188_v58 = vunpack.c.l.bf16 %v1911_v4  ;;  %v2083_v62 = vunpack.c.l.bf16 %v1841_v44  ;;  %v1796_v44 = vld [vmem:[#allocation8 + $0x140] ss:$12 sps:$4 sm:$0xff]  }
 0x20b   :  { %2349 = vmatprep.subr.mxu0 %v2111_v51  ;;  %2417 = vmatpush2.msra.mxu1 %v2212_v60  ;;  %v2086_v51 = vunpack.c.l.bf16 %v1843_v37  ;;  %v1376_v60 = vadd.f32 %v1375_v38, %v1077_v42  ;;  %v4209_v37 = vld [vmem:[#allocation8 + $0x2fc] ss:$24 sps:$4 sm:$0xff]   ;;  %v2025_v38 = vunpack.c.l.bf16 %v1804_v5  ;;  %v2016_v22 = vunpack.c.h.bf16 %v1796_v44 }
 0x20c   :  { %2350 = vmatpush2.msra.mxu0 %v2110_v56  ;;  %2418 = vmatprep.subr.mxu1 %v2210_v1  ;;  %v1377_v56 = vpop.f32.mrf.mxu1  ;;  %v2081_v1 = vunpack.c.h.bf16 %v1839_v52 }
 0x20d   :  { %2351 = vmatprep.subr.mxu0 %v2108_v59  ;;  %2419 = vmatpush2.msra.mxu1 %v2209_v3  ;;  %v1907_v59 = vld [vmem:[#allocation8 + $0x3e4] sm:$0xff]  ;;  %v2080_v3 = vunpack.c.l.bf16 %v1839_v52  ;;  %v2013_v52 = vunpack.c.l.bf16 %v1796_v44 }
 0x20e   :  { %2352 = vmatpush2.msra.mxu0 %v2107_v63  ;;  %2420 = vmatprep.subr.mxu1 %v2207_v8  ;;  %v1837_v63 = vld [vmem:[#allocation8 + $0x240] sm:$0xff] }
 0x20f   :  { %2353 = vmatprep.subr.mxu0 %v2105_v2  ;;  %2421 = vmatpush2.msra.mxu1 %v2206_v12  ;;  %v1378_v2 = vadd.f32 %v1377_v56, %v1081_v49  ;;  %v2078_v8 = vunpack.c.h.bf16 %v1837_v63  ;;  %v2077_v13 = vunpack.c.l.bf16 %v1837_v63 }
 0x210   :  { %2354 = vmatpush2.msra.mxu0 %v2104_v6  ;;  %2422 = vmatprep.subr.mxu1 %v2204_v16  ;;  %v2183_v6 = vunpack.c.h.bf16 %v1907_v59  ;;  %v1905_v16 = vld [vmem:[#allocation8 + $0x3d8] sm:$0xff] }
 0x211   :  { %2355 = vmatprep.subr.mxu0 %v2102_v10  ;;  %2423 = vmatpush2.msra.mxu1 %v2203_v18  ;;  %v2182_v10 = vunpack.c.l.bf16 %v1907_v59  ;;  %v2180_v19 = vunpack.c.h.bf16 %v1905_v16  ;;  %v1756_v59 = vld [vmem:[#allocation8 + $0x50] ss:$12 sps:$4 sm:$0xff]  }
 0x212   :  { %2356 = vmatpush2.msra.mxu0 %v2101_v14  ;;  %2424 = vmatprep.subr.mxu1 %v2201_v23  ;;  %v1956_v63 = vunpack.c.h.bf16 %v1756_v59 }
 0x213   :  { %2357 = vmatprep.subr.mxu0 %v2099_v17  ;;  %2425 = vmatpush2.msra.mxu1 %v2200_v25  ;;  %v1772_v25 = vld [vmem:[#allocation8 + $0xb0] ss:$12 sps:$4 sm:$0xff]  }
 0x214   :  { %2358 = vmatpush2.msra.mxu0 %v2098_v20  ;;  %2426 = vmatprep.subr.mxu1 %v2198_v31  ;;  %v2179_v20 = vunpack.c.l.bf16 %v1905_v16  ;;  %v1901_v31 = vld [vmem:[#allocation8 + $0x3c0] sm:$0xff]  ;;  %v1980_v34 = vunpack.c.h.bf16 %v1772_v25  ;;  %v1977_v4 = vunpack.c.l.bf16 %v1772_v25  ;;  %v1744_v16 = vld [vmem:[#allocation8 + $0x8] ss:$12 sps:$4 sm:$0xff]  }
 0x215   :  { %2359 = vmatprep.subr.mxu0 %v2096_v24  ;;  %2427 = vmatpush2.msra.mxu1 %v2197_v33  ;;  %v2173_v36 = vunpack.c.l.bf16 %v1901_v31  ;;  %v1935_v25 = vunpack.c.l.bf16 %v1744_v16 }
 0x216   :  { %2360 = vmatpush2.msra.mxu0 %v2095_v28  ;;  %2428 = vmatprep.subr.mxu1 %v2195_v61 }
 0x217   :  { %2361 = vmatprep.subr.mxu0 %v2093_v32  ;;  %2429 = vmatpush2.msra.mxu1 %v2194_v40  ;;  %v2174_v32 = vunpack.c.h.bf16 %v1901_v31  ;;  %v2124_v40 = vunpack.c.l.bf16 %v4209_v37  ;;  %v1928_v31 = vld [vmem:[#allocation8 + $0x458] ss:$12 sps:$4 sm:$0xff]  }
 0x218   :  { %2362 = vmatpush2.msra.mxu0 %v2092_v35  ;;  %2430 = vmatprep.subr.mxu1 %v2192_v45  ;;  %v1800_v35 = vld [vmem:[#allocation8 + $0x158] ss:$12 sps:$4 sm:$0xff]  }
 0x219   :  { %2363 = vmatprep.subr.mxu0 %v2090_v39  ;;  %2431 = vmatpush2.msra.mxu1 %v2191_v47  ;;  %v1768_v39 = vld [vmem:[#allocation8 + $0x98] ss:$12 sps:$4 sm:$0xff]   ;;  %v2022_v42 = vunpack.c.h.bf16 %v1800_v35  ;;  %v2019_v45 = vunpack.c.l.bf16 %v1800_v35 }
 0x21a   :  { %2364 = vmatpush2.msra.mxu0 %v2089_v9  ;;  %2432 = vmatprep.subr.mxu1 %v2189_v54  ;;  %v1974_v9 = vunpack.c.h.bf16 %v1768_v39  ;;  %v1971_v47 = vunpack.c.l.bf16 %v1768_v39  ;;  %v1760_v54 = vld [vmem:[#allocation8 + $0x68] ss:$12 sps:$4 sm:$0xff]   ;;  %v1924_v39 = vld [vmem:[#allocation8 + $0x440] ss:$12 sps:$4 sm:$0xff]  }
 0x21b   :  { %2365 = vmatprep.subr.mxu0 %v2087_v46  ;;  %2433 = vmatpush2.msra.mxu1 %v2188_v58  ;;  %v1764_v46 = vld [vmem:[#allocation8 + $0x80] ss:$12 sps:$4 sm:$0xff]  }
 0x21c   :  { %2366 = vmatpush2.msra.mxu0 %v2086_v51  ;;  %2434 = vmatprep.subr.mxu1 %v2186_v0  ;;  %v1968_v49 = vunpack.c.h.bf16 %v1764_v46  ;;  %v1792_v51 = vld [vmem:[#allocation8 + $0x128] ss:$12 sps:$4 sm:$0xff]   ;;  %v1965_v56 = vunpack.c.l.bf16 %v1764_v46  ;;  %v1784_v0 = vld [vmem:[#allocation8 + $0xf8] ss:$12 sps:$4 sm:$0xff]   ;;  %v2205_v46 = vunpack.c.l.bf16 %v1924_v39 }
 0x21d   :  { %2367 = vmatprep.subr.mxu0 %v2084_v57  ;;  %2435 = vmatpush2.msra.mxu1 %v2185_v55  ;;  %v2010_v11 = vunpack.c.h.bf16 %v1792_v51  ;;  %v1788_v57 = vld [vmem:[#allocation8 + $0x110] ss:$12 sps:$4 sm:$0xff]   ;;  %v2007_v58 = vunpack.c.l.bf16 %v1792_v51  ;;  %v1752_v55 = vld [vmem:[#allocation8 + $0x38] ss:$12 sps:$4 sm:$0xff]  }
 0x21e   :  { %v1446_v7 = vpop.f32.mrf.mxu0  ;;  %2368 = vmatpush2.msra.mxu0 %v2083_v62  ;;  %2436 = vmatprep.subr.mxu1 %v2183_v6  ;;  %v2004_v62 = vunpack.c.h.bf16 %v1788_v57  ;;  %v1950_v5 = vunpack.c.h.bf16 %v1752_v55  ;;  %v1780_v6 = vld [vmem:[#allocation8 + $0xe0] ss:$12 sps:$4 sm:$0xff]  }
 0x21f   :  { %v1447_v12 = vadd.f32 %v1446_v7, %v1376_v60  ;;  %2369 = vmatprep.subr.mxu0 %v2081_v1  ;;  %2437 = vmatpush2.msra.mxu1 %v2182_v10  ;;  %v1959_v60 = vunpack.c.l.bf16 %v1760_v54  ;;  %v2001_v1 = vunpack.c.l.bf16 %v1788_v57  ;;  %v1995_v7 = vunpack.c.l.bf16 %v1784_v0 }
 0x220   :  { %v1448_v14 = vpop.f32.mrf.mxu0  ;;  %2370 = vmatpush2.msra.mxu0 %v2080_v3  ;;  %2438 = vmatprep.subr.mxu1 %v2180_v19  ;;  %v1998_v3 = vunpack.c.h.bf16 %v1784_v0  ;;  %v1947_v10 = vunpack.c.l.bf16 %v1752_v55  ;;  %v1938_v19 = vunpack.c.h.bf16 %v1744_v16  ;;  %v1088_v16 = vsub.s32 5, %v4174_v41 }
 0x221   :  { %v1449_v17 = vadd.f32 %v1448_v14, %v1378_v2  ;;  %v1517_v18 = vpop.f32.mrf.mxu1  ;;  %2371 = vmatprep.subr.mxu0 %v2078_v8  ;;  %2439 = vmatpush2.msra.mxu1 %v2179_v20  ;;  %v1953_v2 = vunpack.c.l.bf16 %v1756_v59  ;;  %v1748_v8 = vld [vmem:[#allocation8 + $0x20] ss:$12 sps:$4 sm:$0xff]   ;;  %v1776_v14 = vld [vmem:[#allocation8 + $0xc8] ss:$12 sps:$4 sm:$0xff]   ;;  %v1932_v20 = vld [vmem:[#allocation8 + $0x470] ss:$12 sps:$4 sm:$0xff]  }
 0x222   :  { %v4204_v23 = vadd.f32 %v1517_v18, %v1447_v12  ;;  %2372 = vmatpush2.msra.mxu0 %v2077_v13  ;;  %2440 = vmatprep.subr.mxu1 %v2177_v27  ;;  %v1992_v12 = vunpack.c.h.bf16 %v1780_v6  ;;  %v1944_v13 = vunpack.c.h.bf16 %v1748_v8  ;;  %v1986_v18 = vunpack.c.h.bf16 %v1776_v14 }
 0x223   :  { %v1519_v24 = vpop.f32.mrf.mxu1  ;;  %3507 = vmatprep.subr.mxu0 %v2028_v15  ;;  %2441 = vmatpush2.msra.mxu1 %v2176_v30  ;;  %v1989_v15 = vunpack.c.l.bf16 %v1780_v6  ;;  %v1983_v21 = vunpack.c.l.bf16 %v1776_v14  ;;  %v2220_v27 = vunpack.c.h.bf16 %v1932_v20 }
 0x224   :  { %v4206_v28 = vadd.f32 %v1519_v24, %v1449_v17  ;;  %v1737_v61 = vmax.f32 %v4204_v23, 0.0  ;;  %2442 = vmatprep.subr.mxu1 %v2174_v32  ;;  %v1941_v17 = vunpack.c.l.bf16 %v1748_v8  ;;  %v1900_v24 = vld [vmem:[#allocation8 + $0x3b0] ss:$12 sps:$4 sm:$0xff]   ;;  %v2217_v32 = vunpack.c.l.bf16 %v1932_v20 }
 0x225   :  { %2443 = vmatpush2.msra.mxu1 %v2173_v36  ;;  %v2172_v30 = vunpack.c.h.bf16 %v1900_v24  ;;  %v2169_v35 = vunpack.c.l.bf16 %v1900_v24  ;;  %v2214_v36 = vunpack.c.h.bf16 %v1928_v31 }
 0x226   :  { %v1738_v33 = vmax.f32 %v4206_v28, 0.0  ;;  %3542 = vmatprep.subr.mxu1 %v2124_v40  ;;  %v2211_v40 = vunpack.c.l.bf16 %v1928_v31  ;;  %v1822_v28 = vld [vmem:[#allocation8 + $0x1dc] ss:$12 sps:$4 sm:$0xff]  }
 0x228   :  { %2373 = vmatprep.mubr.f32.mxu0 %v1738_v33 }
 0x229   :  { %2374 = vmatmul.mubr.f32.vlgmr.msra.gmra.mxu0 %v1737_v61 }
 0x22a   :  { %3508 = vmatpush3.msra.mxu0 %v1980_v34  ;;  %2515 = vmatprep.mubr.f32.mxu0 %v1736_v48  ;;  %v1962_v48 = vunpack.c.h.bf16 %v1760_v54  ;;  %v1896_v34 = vld [vmem:[#allocation8 + $0x398] ss:$12 sps:$4 sm:$0xff]  }
 0x22b   :  { %3509 = vmatprep.subr.mxu0 %v2025_v38  ;;  %v2166_v38 = vunpack.c.h.bf16 %v1896_v34 }
 0x22c   :  { %3510 = vmatpush3.msra.mxu0 %v1977_v4  ;;  %v1892_v4 = vld [vmem:[#allocation8 + $0x380] ss:$12 sps:$4 sm:$0xff]  }
 0x22d   :  { %3511 = vmatprep.subr.mxu0 %v2022_v42  ;;  %v2163_v42 = vunpack.c.l.bf16 %v1896_v34  ;;  %v2160_v44 = vunpack.c.h.bf16 %v1892_v4  ;;  %v2157_v43 = vunpack.c.l.bf16 %v1892_v4 }
 0x22e   :  { %3512 = vmatpush3.msra.mxu0 %v1974_v9  ;;  %v2208_v9 = vunpack.c.h.bf16 %v1924_v39  ;;  %v1834_v39 = vld [vmem:[#allocation8 + $0x224] ss:$12 sps:$4 sm:$0xff]  }
 0x22f   :  { %3513 = vmatprep.subr.mxu0 %v2019_v45  ;;  %v1920_v45 = vld [vmem:[#allocation8 + $0x428] ss:$12 sps:$4 sm:$0xff]  }
 0x230   :  { %3514 = vmatpush3.msra.mxu0 %v1971_v47  ;;  %v1888_v47 = vld [vmem:[#allocation8 + $0x368] ss:$12 sps:$4 sm:$0xff]   ;;  %v2199_v51 = vunpack.c.l.bf16 %v1920_v45 }
 0x231   :  { %3515 = vmatprep.subr.mxu0 %v2016_v22  ;;  %v2154_v22 = vunpack.c.h.bf16 %v1888_v47  ;;  %v2151_v54 = vunpack.c.l.bf16 %v1888_v47  ;;  %v1830_v47 = vld [vmem:[#allocation8 + $0x20c] ss:$12 sps:$4 sm:$0xff]  }
 0x232   :  { %3516 = vmatpush3.msra.mxu0 %v1968_v49  ;;  %v1916_v49 = vld [vmem:[#allocation8 + $0x410] ss:$12 sps:$4 sm:$0xff]  }
 0x233   :  { %3517 = vmatprep.subr.mxu0 %v2013_v52  ;;  %v1884_v52 = vld [vmem:[#allocation8 + $0x350] ss:$12 sps:$4 sm:$0xff]   ;;  %v2193_v57 = vunpack.c.l.bf16 %v1916_v49 }
 0x234   :  { %3518 = vmatpush3.msra.mxu0 %v1965_v56  ;;  %v2196_v56 = vunpack.c.h.bf16 %v1916_v49  ;;  %v2145_v59 = vunpack.c.l.bf16 %v1884_v52  ;;  %v1858_v49 = vld [vmem:[#allocation8 + $0x2b4] ss:$12 sps:$4 sm:$0xff]  }
 0x235   :  { %3519 = vmatprep.subr.mxu0 %v2010_v11  ;;  %v2148_v11 = vunpack.c.h.bf16 %v1884_v52  ;;  %v1826_v52 = vld [vmem:[#allocation8 + $0x1f4] ss:$12 sps:$4 sm:$0xff]  }
 0x236   :  { %3520 = vmatpush3.msra.mxu0 %v1962_v48  ;;  %v1912_v48 = vld [vmem:[#allocation8 + $0x3f8] ss:$12 sps:$4 sm:$0xff]  }
 0x237   :  { %3521 = vmatprep.subr.mxu0 %v2007_v58  ;;  %v1880_v58 = vld [vmem:[#allocation8 + $0x338] ss:$12 sps:$4 sm:$0xff]   ;;  %v2187_v0 = vunpack.c.l.bf16 %v1912_v48 }
 0x238   :  { %3522 = vmatpush3.msra.mxu0 %v1959_v60  ;;  %v2190_v60 = vunpack.c.h.bf16 %v1912_v48  ;;  %v2139_v55 = vunpack.c.l.bf16 %v1880_v58  ;;  %v1854_v48 = vld [vmem:[#allocation8 + $0x29c] ss:$12 sps:$4 sm:$0xff]  }
 0x239   :  { %3523 = vmatprep.subr.mxu0 %v2004_v62  ;;  %v2142_v62 = vunpack.c.h.bf16 %v1880_v58  ;;  %v2103_v58 = vunpack.c.h.bf16 %v1854_v48 }
 0x23a   :  { %3524 = vmatpush3.msra.mxu0 %v1956_v63  ;;  %v1908_v63 = vld [vmem:[#allocation8 + $0x3e0] ss:$12 sps:$4 sm:$0xff]  }
 0x23b   :  { %3525 = vmatprep.subr.mxu0 %v2001_v1  ;;  %v1876_v1 = vld [vmem:[#allocation8 + $0x320] ss:$12 sps:$4 sm:$0xff]   ;;  %v2181_v6 = vunpack.c.l.bf16 %v1908_v63 }
 0x23c   :  { %3526 = vmatpush3.msra.mxu0 %v1953_v2  ;;  %v2184_v2 = vunpack.c.h.bf16 %v1908_v63  ;;  %v1818_v63 = vld [vmem:[#allocation8 + $0x1c4] ss:$12 sps:$4 sm:$0xff]  }
 0x23d   :  { %3527 = vmatprep.subr.mxu0 %v1998_v3  ;;  %v2136_v3 = vunpack.c.h.bf16 %v1876_v1 }
 0x23e   :  { %3528 = vmatpush3.msra.mxu0 %v1950_v5  ;;  %v1904_v5 = vld [vmem:[#allocation8 + $0x3c8] ss:$12 sps:$4 sm:$0xff]  }
 0x23f   :  { %3529 = vmatprep.subr.mxu0 %v1995_v7  ;;  %v2133_v7 = vunpack.c.l.bf16 %v1876_v1  ;;  %v2178_v8 = vunpack.c.h.bf16 %v1904_v5 }
 0x240   :  { %3530 = vmatpush3.msra.mxu0 %v1947_v10  ;;  %v1870_v10 = vld [vmem:[#allocation8 + $0x23c] ss:$204 sps:$4 sm:$0xff]  }
 0x241   :  { %3531 = vmatprep.subr.mxu0 %v1992_v12  ;;  %v2130_v12 = vunpack.c.h.bf16 %v4209_v37  ;;  %v2127_v14 = vunpack.c.h.bf16 %v1870_v10  ;;  %v2076_v4 = vunpack.c.l.bf16 %v1870_v10  ;;  %v1842_v10 = vld [vmem:[#allocation8 + $0x254] ss:$12 sps:$4 sm:$0xff]  }
 0x242   :  { %3532 = vmatpush3.msra.mxu0 %v1944_v13  ;;  %v2175_v13 = vunpack.c.l.bf16 %v1904_v5  ;;  %v1814_v5 = vld [vmem:[#allocation8 + $0x1ac] ss:$12 sps:$4 sm:$0xff]  }
 0x243   :  { %3533 = vmatprep.subr.mxu0 %v1989_v15  ;;  %v1084_v15 = vsub.s32 4, %v4174_v41 }
 0x244   :  { %3534 = vmatpush3.msra.mxu0 %v1941_v17 }
 0x245   :  { %3535 = vmatprep.subr.mxu0 %v1986_v18  ;;  %v3735_v18 = vld [vmem:[#allocation7] sm:$0x3f] }
 0x246   :  { %3536 = vmatpush3.msra.mxu0 %v1938_v19  ;;  %v1085_v19 = vrot.slane %v3735_v18, %v1084_v15  ;;  %v1089_v20 = vrot.slane %v3735_v18, %v1088_v16  ;;  %v2085_v15 = vunpack.c.h.bf16 %v1842_v10  ;;  %v2082_v18 = vunpack.c.l.bf16 %v1842_v10 }
 0x247   :  { %3537 = vmatprep.subr.mxu0 %v1983_v21 }
 0x248   :  { %3538 = vmatpush3.msra.mxu0 %v1935_v25 }
 0x249   :  { %2516 = vmatmul.mubr.f32.vlgmr.msra.gmra.mxu0 %v1735_v53  ;;  %3577 = vmatprep.subr.mxu0 %v2220_v27  ;;  %v2202_v53 = vunpack.c.h.bf16 %v1920_v45  ;;  %v1862_v45 = vld [vmem:[#allocation8 + $0x2cc] ss:$12 sps:$4 sm:$0xff]  }
 0x24a   :  { %3578 = vmatpush3.msra.mxu0 %v2172_v30 }
 0x24b   :  { %3579 = vmatprep.subr.mxu0 %v2217_v32 }
 0x24c   :  { %3580 = vmatpush3.msra.mxu0 %v2169_v35 }
 0x24d   :  { %3581 = vmatprep.subr.mxu0 %v2214_v36 }
 0x24e   :  { %3582 = vmatpush3.msra.mxu0 %v2166_v38  ;;  %v1866_v38 = vld [vmem:[#allocation8 + $0x2e4] ss:$12 sps:$4 sm:$0xff]  }
 0x24f   :  { %3583 = vmatprep.subr.mxu0 %v2211_v40 }
 0x250   :  { %3584 = vmatpush3.msra.mxu0 %v2163_v42 }
 0x251   :  { %3585 = vmatprep.subr.mxu0 %v2208_v9  ;;  %v2121_v9 = vunpack.c.h.bf16 %v1866_v38 }
 0x252   :  { %3586 = vmatpush3.msra.mxu0 %v2160_v44  ;;  %v2073_v44 = vunpack.c.h.bf16 %v1834_v39 }
 0x253   :  { %3587 = vmatprep.subr.mxu0 %v2205_v46  ;;  %v2118_v46 = vunpack.c.l.bf16 %v1866_v38 }
 0x254   :  { %3588 = vmatpush3.msra.mxu0 %v2157_v43  ;;  %v2070_v43 = vunpack.c.l.bf16 %v1834_v39  ;;  %v2675_v39 = vld [vmem:[#allocation11 + $0x58] sm:$0xff] }
 0x255   :  { %3589 = vmatprep.subr.mxu0 %v2202_v53  ;;  %v2115_v53 = vunpack.c.h.bf16 %v1862_v45 }
 0x256   :  { %3590 = vmatpush3.msra.mxu0 %v2154_v22  ;;  %v2067_v22 = vunpack.c.h.bf16 %v1830_v47 }
 0x257   :  { %3591 = vmatprep.subr.mxu0 %v2199_v51  ;;  %v2112_v51 = vunpack.c.l.bf16 %v1862_v45  ;;  %v2673_v45 = vld [vmem:[#allocation11 + $0x48] sm:$0xff] }
 0x258   :  { %3592 = vmatpush3.msra.mxu0 %v2151_v54  ;;  %v2064_v54 = vunpack.c.l.bf16 %v1830_v47  ;;  %v2731_v47 = vunpack.c.h.bf16 %v2673_v45 }
 0x259   :  { %3593 = vmatprep.subr.mxu0 %v2196_v56  ;;  %v2109_v56 = vunpack.c.h.bf16 %v1858_v49 }
 0x25a   :  { %3594 = vmatpush3.msra.mxu0 %v2148_v11  ;;  %v2061_v11 = vunpack.c.h.bf16 %v1826_v52 }
 0x25b   :  { %3595 = vmatprep.subr.mxu0 %v2193_v57  ;;  %v2106_v57 = vunpack.c.l.bf16 %v1858_v49 }
 0x25c   :  { %3596 = vmatpush3.msra.mxu0 %v2145_v59  ;;  %v2055_v59 = vunpack.c.h.bf16 %v1822_v28 }
 0x25d   :  { %3597 = vmatprep.subr.mxu0 %v2190_v60  ;;  %v1850_v60 = vld [vmem:[#allocation8 + $0x284] ss:$12 sps:$4 sm:$0xff]  }
 0x25e   :  { %3598 = vmatpush3.msra.mxu0 %v2142_v62  ;;  %v2100_v62 = vunpack.c.l.bf16 %v1854_v48  ;;  %v2097_v1 = vunpack.c.h.bf16 %v1850_v60 }
 0x25f   :  { %3599 = vmatprep.subr.mxu0 %v2187_v0  ;;  %v2052_v0 = vunpack.c.l.bf16 %v1822_v28 }
 0x260   :  { %3600 = vmatpush3.msra.mxu0 %v2139_v55  ;;  %v1588_v17 = vpop.f32.mrf.mxu0  ;;  %v2049_v55 = vunpack.c.h.bf16 %v1818_v63 }
 0x261   :  { %3601 = vmatprep.subr.mxu0 %v2184_v2  ;;  %v1589_v25 = vadd.f32 %v1588_v17, %v1085_v19  ;;  %v1846_v2 = vld [vmem:[#allocation8 + $0x26c] ss:$12 sps:$4 sm:$0xff]   ;;  %v1838_v17 = vld [vmem:[#allocation8 + $0x248] sm:$0xf] }
 0x262   :  { %3602 = vmatpush3.msra.mxu0 %v2136_v3  ;;  %v1590_v21 = vpop.f32.mrf.mxu0  ;;  %v2094_v3 = vunpack.c.l.bf16 %v1850_v60  ;;  %v1806_v19 = vld [vmem:[#allocation8 + $0x188] sm:$0xf] }
 0x263   :  { %3603 = vmatprep.subr.mxu0 %v2181_v6  ;;  %v1659_v24 = vpop.f32.mrf.mxu1  ;;  %v1591_v37 = vadd.f32 %v1590_v21, %v1089_v20  ;;  %v2046_v6 = vunpack.c.l.bf16 %v1818_v63  ;;  %v2679_v21 = vld [vmem:[#allocation11 + $0x78] sm:$0xff] }
 0x264   :  { %3604 = vmatpush3.msra.mxu0 %v2133_v7  ;;  %v1660_v30 = vadd.f32 %v1659_v24, %v1589_v25  ;;  %v2091_v7 = vunpack.c.h.bf16 %v1846_v2  ;;  %v2079_v24 = vunpack.c.l.bf16 %v1838_v17  ;;  %v2031_v25 = vunpack.c.l.bf16 %v1806_v19 }
 0x265   :  { %3605 = vmatprep.subr.mxu0 %v2178_v8  ;;  %v1661_v27 = vpop.f32.mrf.mxu1  ;;  %v2043_v8 = vunpack.c.h.bf16 %v1814_v5 }
 0x266   :  { %3606 = vmatpush3.msra.mxu0 %v2130_v12  ;;  %v1662_v32 = vadd.f32 %v1661_v27, %v1591_v37  ;;  %v2088_v12 = vunpack.c.l.bf16 %v1846_v2  ;;  %v2678_v37 = vld [vmem:[#allocation11 + $0x70] sm:$0xff]  ;;  %v2743_v27 = vunpack.c.h.bf16 %v2679_v21 }
 0x267   :  { %3607 = vmatprep.subr.mxu0 %v2175_v13  ;;  %v1810_v13 = vld [vmem:[#allocation8 + $0x194] ss:$12 sps:$4 sm:$0xff]  }
 0x268   :  { %3608 = vmatpush3.msra.mxu0 %v2127_v14  ;;  %v2040_v14 = vunpack.c.l.bf16 %v1814_v5  ;;  %v2037_v16 = vunpack.c.h.bf16 %v1810_v13  ;;  %v2034_v20 = vunpack.c.l.bf16 %v1810_v13 }
 0x2a1   :  { %v1730_v31 = vpop.f32.mrf.mxu0 }
 0x2a2   :  { %v1731_v34 = vadd.f32 %v1730_v31, %v1660_v30  ;;  %v2742_v30 = vunpack.c.l.bf16 %v2679_v21  ;;  %v2677_v31 = vld [vmem:[#allocation11 + $0x68] sm:$0xff]  ;;  %v2691_v21 = vld [vmem:[#allocation11 + $0xd8] sm:$0xff] }
 0x2a3   :  { %v1732_v35 = vpop.f32.mrf.mxu0  ;;  %v2738_v38 = vunpack.c.l.bf16 %v2677_v31 }
 0x2a4   :  { %v1733_v36 = vadd.f32 %v1732_v35, %v1662_v32  ;;  %v1739_v42 = vmax.f32 %v1731_v34, 0.0  ;;  %v2741_v32 = vunpack.c.h.bf16 %v2678_v37  ;;  %v2740_v34 = vunpack.c.l.bf16 %v2678_v37  ;;  %v2676_v35 = vld [vmem:[#allocation11 + $0x60] sm:$0xff]  ;;  %v2690_v37 = vld [vmem:[#allocation11 + $0xd0] sm:$0xff] }
 0x2a6   :  { %v1740_v40 = vmax.f32 %v1733_v36, 0.0  ;;  %v2739_v36 = vunpack.c.h.bf16 %v2677_v31  ;;  %v2689_v31 = vld [vmem:[#allocation11 + $0xc8] sm:$0xff] }
 0x2a8   :  { %2444 = vmatprep.mubr.f32.mxu1 %v1740_v40  ;;  %2655 = vmatprep.mubr.f32.mxu0 %v1740_v40  ;;  %v2737_v40 = vunpack.c.h.bf16 %v2676_v35 }
 0x2a9   :  { %2445 = vmatmul.mubr.f32.vlgmr.msra.gmra.mxu1 %v1739_v42  ;;  %2656 = vmatmul.mubr.f32.vlgmr.msra.gmra.mxu0 %v1739_v42  ;;  %v2674_v42 = vld [vmem:[#allocation11 + $0x50] sm:$0xff] }
 0x2aa   :  { %3543 = vmatpush3.msra.mxu1 %v2076_v4  ;;  %2585 = vmatprep.mubr.f32.mxu1 %v1738_v33  ;;  %v2058_v33 = vunpack.c.l.bf16 %v1826_v52  ;;  %v2736_v4 = vunpack.c.l.bf16 %v2676_v35  ;;  %v2732_v23 = vunpack.c.l.bf16 %v2674_v42  ;;  %v2688_v35 = vld [vmem:[#allocation11 + $0xc0] sm:$0xff] }
 0x2ab   :  { %3544 = vmatprep.subr.mxu1 %v2121_v9  ;;  %v2735_v9 = vunpack.c.h.bf16 %v2675_v39 }
 0x2ac   :  { %3545 = vmatpush3.msra.mxu1 %v2073_v44  ;;  %v2734_v44 = vunpack.c.l.bf16 %v2675_v39  ;;  %v2710_v39 = vld [vmem:[#allocation11 + $0x170] sm:$0xff] }
 0x2ad   :  { %3546 = vmatprep.subr.mxu1 %v2118_v46  ;;  %v2733_v46 = vunpack.c.h.bf16 %v2674_v42  ;;  %v2687_v42 = vld [vmem:[#allocation11 + $0xb8] sm:$0xff] }
 0x2ae   :  { %3547 = vmatpush3.msra.mxu1 %v2070_v43  ;;  %v2730_v43 = vunpack.c.l.bf16 %v2673_v45  ;;  %v2805_v45 = vunpack.c.h.bf16 %v2710_v39 }
 0x2af   :  { %3548 = vmatprep.subr.mxu1 %v2115_v53  ;;  %v2671_v53 = vld [vmem:[#allocation11 + $0x38] sm:$0xff] }
 0x2b0   :  { %3549 = vmatpush3.msra.mxu1 %v2067_v22  ;;  %v2727_v52 = vunpack.c.h.bf16 %v2671_v53 }
 0x2b1   :  { %3550 = vmatprep.subr.mxu1 %v2112_v51  ;;  %v2670_v51 = vld [vmem:[#allocation11 + $0x30] sm:$0xff] }
 0x2b2   :  { %3551 = vmatpush3.msra.mxu1 %v2064_v54  ;;  %v2726_v54 = vunpack.c.l.bf16 %v2671_v53  ;;  %v2724_v48 = vunpack.c.l.bf16 %v2670_v51 }
 0x2b3   :  { %3552 = vmatprep.subr.mxu1 %v2109_v56  ;;  %v2669_v56 = vld [vmem:[#allocation11 + $0x28] sm:$0xff] }
 0x2b4   :  { %3553 = vmatpush3.msra.mxu1 %v2061_v11  ;;  %v2725_v11 = vunpack.c.h.bf16 %v2670_v51  ;;  %v2723_v28 = vunpack.c.h.bf16 %v2669_v56  ;;  %v2707_v51 = vld [vmem:[#allocation11 + $0x158] sm:$0xff] }
 0x2b5   :  { %3554 = vmatprep.subr.mxu1 %v2106_v57  ;;  %v2668_v57 = vld [vmem:[#allocation11 + $0x20] sm:$0xff] }
 0x2b6   :  { %3555 = vmatpush3.msra.mxu1 %v2058_v33  ;;  %v2722_v33 = vunpack.c.l.bf16 %v2669_v56  ;;  %v2720_v60 = vunpack.c.l.bf16 %v2668_v57 }
 0x2b7   :  { %3556 = vmatprep.subr.mxu1 %v2103_v58  ;;  %v2667_v58 = vld [vmem:[#allocation11 + $0x18] sm:$0xff] }
 0x2b8   :  { %3557 = vmatpush3.msra.mxu1 %v2055_v59  ;;  %v2721_v59 = vunpack.c.h.bf16 %v2668_v57  ;;  %v2719_v63 = vunpack.c.h.bf16 %v2667_v58  ;;  %v2706_v57 = vld [vmem:[#allocation11 + $0x150] sm:$0xff] }
 0x2b9   :  { %3558 = vmatprep.subr.mxu1 %v2100_v62  ;;  %v2666_v62 = vld [vmem:[#allocation11 + $0x10] sm:$0xff] }
 0x2ba   :  { %3559 = vmatpush3.msra.mxu1 %v2052_v0  ;;  %v2718_v0 = vunpack.c.l.bf16 %v2667_v58  ;;  %v2716_v2 = vunpack.c.l.bf16 %v2666_v62  ;;  %v2799_v58 = vunpack.c.h.bf16 %v2707_v51 }
 0x2bb   :  { %3560 = vmatprep.subr.mxu1 %v2097_v1  ;;  %v2665_v1 = vld [vmem:[#allocation11 + $0x8] sm:$0xff] }
 0x2bc   :  { %3561 = vmatpush3.msra.mxu1 %v2049_v55  ;;  %v2717_v55 = vunpack.c.h.bf16 %v2666_v62  ;;  %v2715_v5 = vunpack.c.h.bf16 %v2665_v1  ;;  %v2705_v62 = vld [vmem:[#allocation11 + $0x148] sm:$0xff] }
 0x2bd   :  { %3562 = vmatprep.subr.mxu1 %v2094_v3  ;;  %v2664_v3 = vld [vmem:[#allocation11] sm:$0xff] }
 0x2be   :  { %3563 = vmatpush3.msra.mxu1 %v2046_v6  ;;  %v2714_v6 = vunpack.c.l.bf16 %v2665_v1  ;;  %v2712_v10 = vunpack.c.l.bf16 %v2664_v3  ;;  %v2797_v1 = vunpack.c.h.bf16 %v2706_v57 }
 0x2bf   :  { %3564 = vmatprep.subr.mxu1 %v2091_v7  ;;  %v2695_v7 = vld [vmem:[#allocation11 + $0xf8] sm:$0xff] }
 0x2c0   :  { %3565 = vmatpush3.msra.mxu1 %v2043_v8  ;;  %v2713_v8 = vunpack.c.h.bf16 %v2664_v3  ;;  %v2775_v13 = vunpack.c.h.bf16 %v2695_v7  ;;  %v2704_v3 = vld [vmem:[#allocation11 + $0x140] sm:$0xff] }
 0x2c1   :  { %3566 = vmatprep.subr.mxu1 %v2088_v12  ;;  %v2694_v12 = vld [vmem:[#allocation11 + $0xf0] sm:$0xff] }
 0x2c2   :  { %3567 = vmatpush3.msra.mxu1 %v2040_v14  ;;  %v2774_v14 = vunpack.c.l.bf16 %v2695_v7  ;;  %v2772_v17 = vunpack.c.l.bf16 %v2694_v12  ;;  %v2795_v7 = vunpack.c.h.bf16 %v2705_v62 }
 0x2c3   :  { %3568 = vmatprep.subr.mxu1 %v2085_v15  ;;  %v2693_v15 = vld [vmem:[#allocation11 + $0xe8] sm:$0xff] }
 0x2c4   :  { %3569 = vmatpush3.msra.mxu1 %v2037_v16  ;;  %v2773_v16 = vunpack.c.h.bf16 %v2694_v12  ;;  %v2771_v19 = vunpack.c.h.bf16 %v2693_v15  ;;  %v2703_v12 = vld [vmem:[#allocation11 + $0x138] sm:$0xff] }
 0x2c5   :  { %3570 = vmatprep.subr.mxu1 %v2082_v18  ;;  %v2692_v18 = vld [vmem:[#allocation11 + $0xe0] sm:$0xff] }
 0x2c6   :  { %3571 = vmatpush3.msra.mxu1 %v2034_v20  ;;  %v2770_v20 = vunpack.c.l.bf16 %v2693_v15  ;;  %v2793_v15 = vunpack.c.h.bf16 %v2704_v3 }
 0x2c7   :  { %3572 = vmatprep.subr.mxu1 %v2079_v24  ;;  %v2769_v24 = vunpack.c.h.bf16 %v2692_v18 }
 0x2c8   :  { %3573 = vmatpush3.msra.mxu1 %v2031_v25  ;;  %v2768_v25 = vunpack.c.l.bf16 %v2692_v18  ;;  %v2702_v18 = vld [vmem:[#allocation11 + $0x130] sm:$0xff] }
 0x2c9   :  { %2586 = vmatmul.mubr.f32.vlgmr.msra.gmra.mxu1 %v1737_v61  ;;  %2820 = vmatprep.subr.mxu1 %v2743_v27  ;;  %v2672_v61 = vld [vmem:[#allocation11 + $0x40] sm:$0xff]  ;;  %v2767_v27 = vunpack.c.h.bf16 %v2691_v21 }
 0x2ca   :  { %2821 = vmatpush1.msra.mxu1 %v2742_v30  ;;  %v2729_v22 = vunpack.c.h.bf16 %v2672_v61  ;;  %v2728_v49 = vunpack.c.l.bf16 %v2672_v61  ;;  %v2766_v30 = vunpack.c.l.bf16 %v2691_v21  ;;  %v2708_v61 = vld [vmem:[#allocation11 + $0x160] sm:$0xff]  ;;  %v2791_v21 = vunpack.c.h.bf16 %v2703_v12 }
 0x2cb   :  { %2822 = vmatprep.subr.mxu1 %v2741_v32  ;;  %v2765_v32 = vunpack.c.h.bf16 %v2690_v37  ;;  %v2801_v56 = vunpack.c.h.bf16 %v2708_v61 }
 0x2cc   :  { %2823 = vmatpush1.msra.mxu1 %v2740_v34  ;;  %v2764_v34 = vunpack.c.l.bf16 %v2690_v37  ;;  %v2701_v37 = vld [vmem:[#allocation11 + $0x128] sm:$0xff] }
 0x2cd   :  { %2824 = vmatprep.subr.mxu1 %v2739_v36  ;;  %v2763_v36 = vunpack.c.h.bf16 %v2689_v31 }
 0x2ce   :  { %2825 = vmatpush1.msra.mxu1 %v2738_v38  ;;  %v2711_v38 = vld [vmem:[#allocation11 + $0x178] sm:$0xff] }
 0x2cf   :  { %2826 = vmatprep.subr.mxu1 %v2737_v40  ;;  %v2709_v40 = vld [vmem:[#allocation11 + $0x168] sm:$0xff] }
 0x2d0   :  { %2827 = vmatpush1.msra.mxu1 %v2736_v4  ;;  %v2762_v4 = vunpack.c.l.bf16 %v2689_v31  ;;  %v2803_v53 = vunpack.c.h.bf16 %v2709_v40 }
 0x2d1   :  { %2828 = vmatprep.subr.mxu1 %v2735_v9  ;;  %v2806_v9 = vunpack.c.l.bf16 %v2711_v38 }
 0x2d2   :  { %2829 = vmatpush1.msra.mxu1 %v2734_v44  ;;  %v2807_v44 = vunpack.c.h.bf16 %v2711_v38  ;;  %v2700_v38 = vld [vmem:[#allocation11 + $0x120] sm:$0xff] }
 0x2d3   :  { %2830 = vmatprep.subr.mxu1 %v2733_v46  ;;  %v2761_v46 = vunpack.c.h.bf16 %v2688_v35 }
 0x2d4   :  { %2831 = vmatpush1.msra.mxu1 %v2732_v23  ;;  %v2804_v23 = vunpack.c.l.bf16 %v2710_v39  ;;  %2891 = vmatprep.subr.mxu0 %v2807_v44  ;;  %v2785_v39 = vunpack.c.h.bf16 %v2700_v38  ;;  %v2698_v44 = vld [vmem:[#allocation11 + $0x110] sm:$0xff] }
 0x2d5   :  { %2832 = vmatprep.subr.mxu1 %v2731_v47  ;;  %v2760_v47 = vunpack.c.l.bf16 %v2688_v35  ;;  %2892 = vmatpush1.msra.mxu0 %v2806_v9  ;;  %v2787_v35 = vunpack.c.h.bf16 %v2701_v37 }
 0x2d6   :  { %2833 = vmatpush1.msra.mxu1 %v2730_v43  ;;  %v2686_v43 = vld [vmem:[#allocation11 + $0xb0] sm:$0xff]  ;;  %2893 = vmatprep.subr.mxu0 %v2805_v45  ;;  %v2781_v45 = vunpack.c.h.bf16 %v2698_v44 }
 0x2d7   :  { %2834 = vmatprep.subr.mxu1 %v2729_v22  ;;  %v2759_v22 = vunpack.c.h.bf16 %v2687_v42  ;;  %2894 = vmatpush1.msra.mxu0 %v2804_v23  ;;  %v2697_v23 = vld [vmem:[#allocation11 + $0x108] sm:$0xff] }
 0x2d8   :  { %2835 = vmatpush1.msra.mxu1 %v2728_v49  ;;  %v2802_v49 = vunpack.c.l.bf16 %v2709_v40  ;;  %2895 = vmatprep.subr.mxu0 %v2803_v53  ;;  %v2784_v40 = vunpack.c.l.bf16 %v2700_v38 }
 0x2d9   :  { %2836 = vmatprep.subr.mxu1 %v2727_v52  ;;  %v2758_v52 = vunpack.c.l.bf16 %v2687_v42 }
 0x2da   :  { %2837 = vmatpush1.msra.mxu1 %v2726_v54  ;;  %v2685_v54 = vld [vmem:[#allocation11 + $0xa8] sm:$0xff]  ;;  %2896 = vmatpush1.msra.mxu0 %v2802_v49  ;;  %v4032_v49 = vmov 0.0  }
 0x2db   :  { %2838 = vmatprep.subr.mxu1 %v2725_v11  ;;  %v2757_v11 = vunpack.c.h.bf16 %v2686_v43  ;;  %2897 = vmatprep.subr.mxu0 %v2801_v56 }
 0x2dc   :  { %2839 = vmatpush1.msra.mxu1 %v2724_v48  ;;  %v2800_v48 = vunpack.c.l.bf16 %v2708_v61  ;;  %v2779_v61 = vunpack.c.h.bf16 %v2697_v23  ;;  %2955 = vmatprep.mubr.f32.mxu0 %v4032_v49 }
 0x2dd   :  { %2840 = vmatprep.subr.mxu1 %v2723_v28  ;;  %v2756_v28 = vunpack.c.l.bf16 %v2686_v43  ;;  %v2696_v43 = vld [vmem:[#allocation11 + $0x100] sm:$0xff] }
 0x2de   :  { %2841 = vmatpush1.msra.mxu1 %v2722_v33  ;;  %v2684_v33 = vld [vmem:[#allocation11 + $0xa0] sm:$0xff]  ;;  %2898 = vmatpush1.msra.mxu0 %v2800_v48  ;;  %v2777_v53 = vunpack.c.h.bf16 %v2696_v43 }
 0x2df   :  { %2842 = vmatprep.subr.mxu1 %v2721_v59  ;;  %v2755_v59 = vunpack.c.h.bf16 %v2685_v54  ;;  %2899 = vmatprep.subr.mxu0 %v2799_v58 }
 0x2e0   :  { %2843 = vmatpush1.msra.mxu1 %v2720_v60  ;;  %v2798_v60 = vunpack.c.l.bf16 %v2707_v51  ;;  %v2221_v51 = vld [vmem:[#allocation10] sm:$0x7] }
 0x2e1   :  { %2844 = vmatprep.subr.mxu1 %v2719_v63  ;;  %v2754_v63 = vunpack.c.l.bf16 %v2685_v54  ;;  %v2226_v54 = vrot.slane %v2221_v51, %v4177_v26 }
 0x2e2   :  { %2845 = vmatpush1.msra.mxu1 %v2718_v0  ;;  %v2683_v0 = vld [vmem:[#allocation11 + $0x98] sm:$0xff]  ;;  %2900 = vmatpush1.msra.mxu0 %v2798_v60 }
 0x2e3   :  { %2846 = vmatprep.subr.mxu1 %v2717_v55  ;;  %v2753_v55 = vunpack.c.h.bf16 %v2684_v33  ;;  %2901 = vmatprep.subr.mxu0 %v2797_v1 }
 0x2e4   :  { %2847 = vmatpush1.msra.mxu1 %v2716_v2  ;;  %v2796_v2 = vunpack.c.l.bf16 %v2706_v57 }
 0x2e5   :  { %2848 = vmatprep.subr.mxu1 %v2715_v5  ;;  %v2752_v5 = vunpack.c.l.bf16 %v2684_v33 }
 0x2e6   :  { %2849 = vmatpush1.msra.mxu1 %v2714_v6  ;;  %v2682_v6 = vld [vmem:[#allocation11 + $0x90] sm:$0xff]  ;;  %2902 = vmatpush1.msra.mxu0 %v2796_v2 }
 0x2e7   :  { %2850 = vmatprep.subr.mxu1 %v2713_v8  ;;  %v2751_v8 = vunpack.c.h.bf16 %v2683_v0  ;;  %2903 = vmatprep.subr.mxu0 %v2795_v7 }
 0x2e8   :  { %2851 = vmatpush1.msra.mxu1 %v2712_v10  ;;  %v2794_v10 = vunpack.c.l.bf16 %v2705_v62 }
 0x2e9   :  { %2852 = vmatprep.subr.mxu1 %v2775_v13  ;;  %v2750_v13 = vunpack.c.l.bf16 %v2683_v0  ;;  %v2375_v56 = vpop.f32.mrf.mxu0 }
 0x2ea   :  { %2853 = vmatpush2.msra.mxu1 %v2774_v14  ;;  %v2681_v14 = vld [vmem:[#allocation11 + $0x88] sm:$0xff]  ;;  %2904 = vmatpush1.msra.mxu0 %v2794_v10 }
 0x2eb   :  { %2854 = vmatprep.subr.mxu1 %v2773_v16  ;;  %v2749_v16 = vunpack.c.h.bf16 %v2682_v6  ;;  %2905 = vmatprep.subr.mxu0 %v2793_v15 }
 0x2ec   :  { %2855 = vmatpush2.msra.mxu1 %v2772_v17  ;;  %v2792_v17 = vunpack.c.l.bf16 %v2704_v3 }
 0x2ed   :  { %2856 = vmatprep.subr.mxu1 %v2771_v19  ;;  %v2748_v19 = vunpack.c.l.bf16 %v2682_v6  ;;  %v2234_v6 = vrot.slane %v2221_v51, %v1076_v29 }
 0x2ee   :  { %2857 = vmatpush2.msra.mxu1 %v2770_v20  ;;  %v2680_v20 = vld [vmem:[#allocation11 + $0x80] sm:$0xff]  ;;  %2906 = vmatpush1.msra.mxu0 %v2792_v17 }
 0x2ef   :  { %2858 = vmatprep.subr.mxu1 %v2769_v24  ;;  %v2747_v24 = vunpack.c.h.bf16 %v2681_v14  ;;  %v2745_v31 = vunpack.c.h.bf16 %v2680_v20  ;;  %2907 = vmatprep.subr.mxu0 %v2791_v21  ;;  %v3498_v21 = vld [vmem:[#allocation14 + $0x70] sm:$0xff]  }
 0x2f0   :  { %2859 = vmatpush2.msra.mxu1 %v2768_v25  ;;  %v2790_v25 = vunpack.c.l.bf16 %v2703_v12 }
 0x2f1   :  { %2860 = vmatprep.subr.mxu1 %v2767_v27  ;;  %v2746_v27 = vunpack.c.l.bf16 %v2681_v14 }
 0x2f2   :  { %2861 = vmatpush2.msra.mxu1 %v2766_v30  ;;  %v2789_v30 = vunpack.c.h.bf16 %v2702_v18  ;;  %2908 = vmatpush1.msra.mxu0 %v2790_v25  ;;  %v3490_v25 = vld [vmem:[#allocation14 + $0x30] sm:$0xff]  }
 0x2f3   :  { %2862 = vmatprep.subr.mxu1 %v2765_v32  ;;  %v2788_v32 = vunpack.c.l.bf16 %v2702_v18 }
 0x2f4   :  { %2863 = vmatpush2.msra.mxu1 %v2764_v34  ;;  %v2744_v34 = vunpack.c.l.bf16 %v2680_v20  ;;  %2909 = vmatprep.subr.mxu0 %v2789_v30  ;;  %v3491_v20 = vld [vmem:[#allocation14 + $0x38] sm:$0xff]   ;;  %v3416_v30 = vunpack.c.h.bf16 %v3490_v25 }
 0x2f5   :  { %2864 = vmatprep.subr.mxu1 %v2763_v36  ;;  %v2786_v36 = vunpack.c.l.bf16 %v2701_v37  ;;  %2910 = vmatpush1.msra.mxu0 %v2788_v32  ;;  %v3420_v29 = vunpack.c.h.bf16 %v3491_v20  ;;  %v3419_v37 = vunpack.c.l.bf16 %v3491_v20  ;;  %v3447_v32 = vunpack.c.l.bf16 %v3498_v21  ;;  %v3503_v20 = vld [vmem:[%s4314_s9 + $0x20] sm:$0xff]  }
 0x2f6   :  { %2865 = vmatpush2.msra.mxu1 %v2762_v4  ;;  %2911 = vmatprep.subr.mxu0 %v2787_v35  ;;  %v2699_v4 = vld [vmem:[#allocation11 + $0x118] sm:$0xff]  ;;  %v3415_v35 = vunpack.c.l.bf16 %v3490_v25 }
 0x2f7   :  { %2866 = vmatprep.subr.mxu1 %v2761_v46  ;;  %2912 = vmatpush1.msra.mxu0 %v2786_v36  ;;  %v2783_v42 = vunpack.c.h.bf16 %v2699_v4  ;;  %v2782_v9 = vunpack.c.l.bf16 %v2699_v4  ;;  %v2780_v46 = vunpack.c.l.bf16 %v2698_v44  ;;  %v3488_v4 = vld [vmem:[#allocation14 + $0x20] sm:$0xff]  }
 0x2f8   :  { %2867 = vmatpush2.msra.mxu1 %v2760_v47  ;;  %2913 = vmatprep.subr.mxu0 %v2785_v39  ;;  %v2778_v47 = vunpack.c.l.bf16 %v2697_v23  ;;  %v3496_v39 = vld [vmem:[#allocation14 + $0x60] sm:$0xff]   ;;  %v3408_v44 = vunpack.c.h.bf16 %v3488_v4  ;;  %v3487_v23 = vld [vmem:[#allocation14 + $0x18] sm:$0xff]  }
 0x2f9   :  { %2868 = vmatprep.subr.mxu1 %v2759_v22  ;;  %2914 = vmatpush1.msra.mxu0 %v2784_v40  ;;  %v2776_v22 = vunpack.c.l.bf16 %v2696_v43  ;;  %v3404_v43 = vunpack.c.h.bf16 %v3487_v23 }
 0x2fa   :  { %2869 = vmatpush2.msra.mxu1 %v2758_v52  ;;  %2915 = vmatprep.subr.mxu0 %v2783_v42  ;;  %v2304_v52 = vpop.f32.mrf.mxu1 }
 0x2fb   :  { %2870 = vmatprep.subr.mxu1 %v2757_v11  ;;  %2916 = vmatpush1.msra.mxu0 %v2782_v9  ;;  %v2230_v11 = vrot.slane %v2221_v51, %v4180_v50  ;;  %v2305_v57 = vadd.f32 %v2304_v52, %v2226_v54  ;;  %v3440_v9 = vunpack.c.h.bf16 %v3496_v39  ;;  %v3486_v51 = vld [vmem:[#allocation14 + $0x10] sm:$0xff]   ;;  %v3403_v52 = vunpack.c.l.bf16 %v3487_v23 }
 0x2fc   :  { %2871 = vmatpush2.msra.mxu1 %v2756_v28  ;;  %2917 = vmatprep.subr.mxu0 %v2781_v45  ;;  %v2306_v48 = vpop.f32.mrf.mxu1  ;;  %v2377_v28 = vpop.f32.mrf.mxu0  ;;  %v3495_v45 = vld [vmem:[#allocation14 + $0x58] sm:$0xff]   ;;  %v3500_v23 = vld [vmem:[%s4314_s9 + $0x8] sm:$0xff]  }
 0x2fd   :  { %2872 = vmatprep.subr.mxu1 %v2755_v59  ;;  %2918 = vmatpush1.msra.mxu0 %v2780_v46  ;;  %v2307_v33 = vadd.f32 %v2306_v48, %v2230_v11  ;;  %v2376_v58 = vadd.f32 %v2375_v56, %v2305_v57  ;;  %v3439_v46 = vunpack.c.l.bf16 %v3496_v39  ;;  %v3400_v56 = vunpack.c.h.bf16 %v3486_v51  ;;  %v3493_v57 = vld [vmem:[#allocation14 + $0x48] sm:$0xff]  }
 0x2fe   :  { %2873 = vmatpush2.msra.mxu1 %v2754_v63  ;;  %2919 = vmatprep.subr.mxu0 %v2779_v61  ;;  %v3407_v61 = vunpack.c.l.bf16 %v3488_v4  ;;  %v3399_v48 = vunpack.c.l.bf16 %v3486_v51 }
 0x2ff   :  { %2874 = vmatprep.subr.mxu1 %v2753_v55  ;;  %2920 = vmatpush1.msra.mxu0 %v2778_v47  ;;  %v2378_v60 = vadd.f32 %v2377_v28, %v2307_v33  ;;  %v3436_v47 = vunpack.c.h.bf16 %v3495_v45  ;;  %v3428_v28 = vunpack.c.h.bf16 %v3493_v57  ;;  %v3485_v33 = vld [vmem:[#allocation14 + $0x8] sm:$0xff]  }
 0x300   :  { %2875 = vmatpush2.msra.mxu1 %v2752_v5  ;;  %2921 = vmatprep.subr.mxu0 %v2777_v53  ;;  %v3494_v53 = vld [vmem:[#allocation14 + $0x50] sm:$0xff]  }
 0x301   :  { %2876 = vmatprep.subr.mxu1 %v2751_v8  ;;  %2922 = vmatpush1.msra.mxu0 %v2776_v22  ;;  %v3435_v22 = vunpack.c.l.bf16 %v3495_v45  ;;  %v3432_v54 = vunpack.c.h.bf16 %v3494_v53  ;;  %v3431_v11 = vunpack.c.l.bf16 %v3494_v53 }
 0x302   :  { %2877 = vmatpush2.msra.mxu1 %v2750_v13 }
 0x303   :  { %2878 = vmatprep.subr.mxu1 %v2749_v16 }
 0x304   :  { %2879 = vmatpush2.msra.mxu1 %v2748_v19  ;;  %v3499_v19 = vld [vmem:[#allocation14 + $0x78] sm:$0xff]  }
 0x305   :  { %2880 = vmatprep.subr.mxu1 %v2747_v24  ;;  %v3452_v41 = vunpack.c.h.bf16 %v3499_v19  ;;  %v3451_v24 = vunpack.c.l.bf16 %v3499_v19 }
 0x306   :  { %2881 = vmatpush2.msra.mxu1 %v2746_v27  ;;  %v3448_v27 = vunpack.c.h.bf16 %v3498_v21 }
 0x307   :  { %2882 = vmatprep.subr.mxu1 %v2745_v31  ;;  %3612 = vmatprep.subr.mxu0 %v3452_v41  ;;  %v3497_v31 = vld [vmem:[#allocation14 + $0x68] sm:$0xff]   ;;  %v3472_v41 = vunpack.c.h.bf16 %v3503_v20 }
 0x308   :  { %2883 = vmatpush2.msra.mxu1 %v2744_v34  ;;  %v3489_v34 = vld [vmem:[#allocation14 + $0x28] sm:$0xff]   ;;  %v3444_v36 = vunpack.c.h.bf16 %v3497_v31  ;;  %v3443_v40 = vunpack.c.l.bf16 %v3497_v31  ;;  %v2808_v31 = vld [vmem:[#allocation13] sm:$0x3] }
 0x309   :  { %3664 = vmatprep.subr.mxu1 %v4032_v49  ;;  %v3539_v2 = vpop.f32.mrf.mxu0  ;;  %v3412_v38 = vunpack.c.h.bf16 %v3489_v34  ;;  %v3411_v42 = vunpack.c.l.bf16 %v3489_v34  ;;  %v2813_v34 = vrot.slane %v2808_v31, %v4177_v26 }
 0x30b   :  { %v3540_v3 = vpop.f32.mrf.mxu0 }
 0x30c   :  { %v3541_v7 = vadd.f32 %v3540_v3, %v3539_v2  ;;  %v3390_v3 = vld [vmem:[#allocation14] sm:$0xff]  }
 0x30e   :  { %v2518_v13 = vadd.f32 %v3541_v7, %v2234_v6  ;;  %v3391_v7 = vunpack.c.l.bf16 %v3390_v3 }
 0x369   :  { %v2446_v59 = vpop.f32.mrf.mxu1  ;;  %v3609_v5 = vpop.f32.mrf.mxu0 }
 0x36a   :  { %v4232_v62 = vadd.f32 %v2446_v59, %v2376_v58  ;;  %v3396_v58 = vunpack.c.h.bf16 %v3485_v33  ;;  %v3427_v59 = vunpack.c.l.bf16 %v3493_v57  ;;  %v4034_v57 = vmov 2  }
 0x36b   :  { %v2448_v63 = vpop.f32.mrf.mxu1  ;;  %v3610_v10 = vpop.f32.mrf.mxu0  ;;  %3727 = vset.pattern.permute.xlu1 %v4034_v57 }
 0x36c   :  { %v4234_v0 = vadd.f32 %v2448_v63, %v2378_v60  ;;  %v2661_v55 = vmax.f32 %v4232_v62, 0.0  ;;  %v3611_v15 = vadd.f32 %v3610_v10, %v3609_v5  ;;  %v3395_v60 = vunpack.c.l.bf16 %v3485_v33  ;;  %v3492_v63 = vld [vmem:[#allocation14 + $0x40] sm:$0xff]   ;;  %v3505_v10 = vld [vmem:[%s4314_s9 + $0x30] sm:$0xff]  }
 0x36d   :  { %v3424_v2 = vunpack.c.h.bf16 %v3492_v63  ;;  %v3392_v5 = vunpack.c.h.bf16 %v3390_v3  ;;  %v3423_v6 = vunpack.c.l.bf16 %v3492_v63  ;;  %v3248_v33 = vld [vmem:[#allocation19 + $0x78] sm:$0xff] }
 0x36e   :  { %v2662_v1 = vmax.f32 %v4234_v0, 0.0  ;;  %v3280_v63 = vunpack.c.h.bf16 %v3248_v33 }
 0x370   :  { %2884 = vmatprep.mubr.f32.mxu1 %v2662_v1 }
 0x371   :  { %2885 = vmatmul.mubr.f32.vlgmr.msra.gmra.mxu1 %v2661_v55 }
 0x372   :  { %3696 = vmatprep.mubr.msk.f32.mxu1 %vm4033_vm0, %v4032_v49 }
 0x389   :  { %v3574_v8 = vpop.f32.mrf.mxu1 }
 0x38b   :  { %v3575_v12 = vpop.f32.mrf.mxu1 }
 0x38c   :  { %v3576_v14 = vadd.f32 %v3575_v12, %v3574_v8  ;;  %v3506_v8 = vld [vmem:[%s4314_s9 + $0x38] sm:$0xff]  }
 0x38d   :  { %v3484_v12 = vunpack.c.h.bf16 %v3506_v8 }
 0x38e   :  { %v2588_v16 = vadd.f32 %v3576_v14, %v2518_v13  ;;  %v3483_v13 = vunpack.c.l.bf16 %v3506_v8  ;;  %v3480_v14 = vunpack.c.h.bf16 %v3505_v10 }
 0x38f   :  { %3665 = vmatpush3.msra.mxu1 %v3484_v12  ;;  %v3243_v12 = vld [vmem:[#allocation19 + $0x50] sm:$0xff] }
 0x390   :  { %v4244_v17 = vadd.f32 %v3611_v15, %v2588_v16  ;;  %3666 = vmatprep.subr.mxu1 %v4032_v49  ;;  %v3504_v15 = vld [vmem:[%s4314_s9 + $0x28] sm:$0xff]   ;;  %v3479_v16 = vunpack.c.l.bf16 %v3505_v10 }
 0x391   :  { %3667 = vmatpush3.msra.mxu1 %v3483_v13  ;;  %v3476_v19 = vunpack.c.h.bf16 %v3504_v15  ;;  %v3475_v21 = vunpack.c.l.bf16 %v3504_v15  ;;  %v3242_v15 = vld [vmem:[#allocation19 + $0x48] sm:$0xff] }
 0x392   :  { %v2663_v18 = vmax.f32 %v4244_v17, 0.0  ;;  %3668 = vmatprep.subr.mxu1 %v4032_v49 }
 0x393   :  { %3669 = vmatpush3.msra.mxu1 %v3480_v14 }
 0x394   :  { %2956 = vmatmul.mubr.f32.vlgmr.msra.gmra.mxu0 %v2663_v18  ;;  %3670 = vmatprep.subr.mxu1 %v4032_v49 }
 0x395   :  { %3613 = vmatpush3.msra.mxu0 %v3420_v29  ;;  %3671 = vmatpush3.msra.mxu1 %v3479_v16  ;;  %v3502_v29 = vld [vmem:[%s4314_s9 + $0x18] sm:$0xff]   ;;  %v3270_v16 = vunpack.c.h.bf16 %v3243_v12 }
 0x396   :  { %3614 = vmatprep.subr.mxu0 %v3451_v24  ;;  %3672 = vmatprep.subr.mxu1 %v4032_v49  ;;  %v3471_v24 = vunpack.c.l.bf16 %v3503_v20  ;;  %v3468_v25 = vunpack.c.h.bf16 %v3502_v29  ;;  %v3241_v20 = vld [vmem:[#allocation19 + $0x40] sm:$0xff] }
 0x397   :  { %3615 = vmatpush3.msra.mxu0 %v3419_v37  ;;  %3673 = vmatpush3.msra.mxu1 %v3476_v19  ;;  %v3501_v37 = vld [vmem:[%s4314_s9 + $0x10] sm:$0xff]   ;;  %v3269_v19 = vunpack.c.l.bf16 %v3243_v12 }
 0x398   :  { %3616 = vmatprep.subr.mxu0 %v3448_v27  ;;  %3674 = vmatprep.subr.mxu1 %v4032_v49  ;;  %v3467_v27 = vunpack.c.l.bf16 %v3502_v29  ;;  %v3240_v29 = vld [vmem:[#allocation19 + $0x38] sm:$0xff] }
 0x399   :  { %3617 = vmatpush3.msra.mxu0 %v3416_v30  ;;  %3675 = vmatpush3.msra.mxu1 %v3475_v21  ;;  %v3464_v30 = vunpack.c.h.bf16 %v3501_v37  ;;  %v3268_v21 = vunpack.c.h.bf16 %v3242_v15 }
 0x39a   :  { %3618 = vmatprep.subr.mxu0 %v3447_v32  ;;  %3676 = vmatprep.subr.mxu1 %v4032_v49 }
 0x39b   :  { %3619 = vmatpush3.msra.mxu0 %v3415_v35  ;;  %3677 = vmatpush3.msra.mxu1 %v3472_v41  ;;  %v2817_v35 = vrot.slane %v2808_v31, %v4180_v50  ;;  %v3267_v41 = vunpack.c.l.bf16 %v3242_v15  ;;  %v3238_v31 = vld [vmem:[#allocation19 + $0x28] sm:$0xff] }
 0x39c   :  { %3620 = vmatprep.subr.mxu0 %v3444_v36  ;;  %3678 = vmatprep.subr.mxu1 %v4032_v49 }
 0x39d   :  { %3621 = vmatpush3.msra.mxu0 %v3412_v38  ;;  %3679 = vmatpush3.msra.mxu1 %v3471_v24  ;;  %v3266_v24 = vunpack.c.h.bf16 %v3241_v20 }
 0x39e   :  { %3622 = vmatprep.subr.mxu0 %v3443_v40  ;;  %3680 = vmatprep.subr.mxu1 %v4032_v49 }
 0x39f   :  { %3623 = vmatpush3.msra.mxu0 %v3411_v42  ;;  %3681 = vmatpush3.msra.mxu1 %v3468_v25  ;;  %v3265_v25 = vunpack.c.l.bf16 %v3241_v20 }
 0x3a0   :  { %3624 = vmatprep.subr.mxu0 %v3440_v9  ;;  %3682 = vmatprep.subr.mxu1 %v4032_v49 }
 0x3a1   :  { %3625 = vmatpush3.msra.mxu0 %v3408_v44  ;;  %3683 = vmatpush3.msra.mxu1 %v3467_v27  ;;  %v3264_v27 = vunpack.c.h.bf16 %v3240_v29 }
 0x3a2   :  { %3626 = vmatprep.subr.mxu0 %v3439_v46  ;;  %3684 = vmatprep.subr.mxu1 %v4032_v49  ;;  %v3463_v46 = vunpack.c.l.bf16 %v3501_v37  ;;  %v3239_v37 = vld [vmem:[#allocation19 + $0x30] sm:$0xff] }
 0x3a3   :  { %3627 = vmatpush3.msra.mxu0 %v3407_v61  ;;  %3685 = vmatpush3.msra.mxu1 %v3464_v30  ;;  %v3460_v61 = vunpack.c.h.bf16 %v3500_v23  ;;  %v3263_v30 = vunpack.c.l.bf16 %v3240_v29 }
 0x3a4   :  { %3628 = vmatprep.subr.mxu0 %v3436_v47  ;;  %3686 = vmatprep.subr.mxu1 %v4032_v49  ;;  %v3459_v47 = vunpack.c.l.bf16 %v3500_v23  ;;  %v3235_v23 = vld [vmem:[#allocation19 + $0x10] sm:$0xff] }
 0x3a5   :  { %3629 = vmatpush3.msra.mxu0 %v3404_v43  ;;  %3687 = vmatpush3.msra.mxu1 %v3463_v46  ;;  %v3454_v43 = vld [vmem:[%s4314_s9] sm:$0xff]   ;;  %s4037_s9 = smov [#allocation22]  }
 0x3a6   :  { %3630 = vmatprep.subr.mxu0 %v3435_v22  ;;  %3688 = vmatprep.subr.mxu1 %v4032_v49  ;;  %v3456_v53 = vunpack.c.h.bf16 %v3454_v43  ;;  %v3455_v22 = vunpack.c.l.bf16 %v3454_v43  ;;  %v3253_v43 = vunpack.c.l.bf16 %v3235_v23  ;;  %s3372_s4 = sshll.u32 %s4037_s9, 4  ;;  %s3373_s4 = int_to_ptr.vmem [resolvable:$true] %s3372_s4 }
 0x3a7   :  { %3631 = vmatpush3.msra.mxu0 %v3403_v52  ;;  %3689 = vmatpush3.msra.mxu1 %v3460_v61  ;;  %v3387_v52 = vld [vmem:[#allocation16] ss:$0 sm:$0xff]  ;;  %s3976_s1 = scalar_lea.vmem %s3373_s4, 256  ;;  %p3981_p5 = scmp.lt.s32.totalorder %s3373_s4, %s3373_s4 }
 0x3a8   :  { %3632 = vmatprep.subr.mxu0 %v3432_v54  ;;  %3690 = vmatprep.subr.mxu1 %v4032_v49  ;;  %p3977_p4 = scmp.ne.s32.totalorder %s3373_s4, %s3976_s1  ;;  %p3982_p6 = scmp.lt.s32.totalorder %s3976_s1, %s3976_s1 }
 0x3a9   :  { %3633 = vmatpush3.msra.mxu0 %v3400_v56  ;;  %3691 = vmatpush3.msra.mxu1 %v3459_v47  ;;  %v3254_v47 = vunpack.c.h.bf16 %v3235_v23 }
 0x3aa   :  { %3634 = vmatprep.subr.mxu0 %v3431_v11  ;;  %3692 = vmatprep.subr.mxu1 %v4032_v49  ;;  %p3983_p7 = por %p3982_p6, %p3981_p5 }
 0x3ab   :  { %3635 = vmatpush3.msra.mxu0 %v3399_v48  ;;  %3693 = vmatpush3.msra.mxu1 %v3456_v53  ;;  %v3234_v53 = vld [vmem:[#allocation19 + $0x8] sm:$0xff] }
 0x3ac   :  { %3636 = vmatprep.subr.mxu0 %v3428_v28  ;;  %3694 = vmatprep.subr.mxu1 %v4032_v49  ;;  %v4035_v28 = vmov 0   ;;  %p3984_p8 = pnand %p3983_p7, %p3977_p4 }
 0x3ad   :  { %3637 = vmatpush3.msra.mxu0 %v3396_v58  ;;  %3695 = vmatpush3.msra.mxu1 %v3455_v22  ;;  %v3247_v58 = vld [vmem:[#allocation19 + $0x70] sm:$0xff]  ;;  %v3252_v22 = vunpack.c.h.bf16 %v3234_v53 }
 0x3ae   :  { %3638 = vmatprep.subr.mxu0 %v3427_v59  ;;  %3725 = vset.pattern.permute.xlu0 %v4035_v28  ;;  %v3246_v59 = vld [vmem:[#allocation19 + $0x68] sm:$0xff]  ;;  %v3277_v3 = vunpack.c.l.bf16 %v3247_v58 }
 0x3af   :  { %3639 = vmatpush3.msra.mxu0 %v3395_v60  ;;  %v3279_v60 = vunpack.c.l.bf16 %v3248_v33 }
 0x3b0   :  { %3640 = vmatprep.subr.mxu0 %v3424_v2  ;;  %v3278_v2 = vunpack.c.h.bf16 %v3247_v58 }
 0x3b1   :  { %3641 = vmatpush3.msra.mxu0 %v3392_v5  ;;  %v3276_v5 = vunpack.c.h.bf16 %v3246_v59 }
 0x3b2   :  { %3642 = vmatprep.subr.mxu0 %v3423_v6  ;;  %v3275_v6 = vunpack.c.l.bf16 %v3246_v59 }
 0x3b3   :  { %3643 = vmatpush3.msra.mxu0 %v3391_v7  ;;  %v3244_v7 = vld [vmem:[#allocation19 + $0x58] sm:$0xff] }
 0x3b4   :  { %3293 = vmatprep.subr.mxu0 %v3280_v63  ;;  %v3272_v13 = vunpack.c.h.bf16 %v3244_v7  ;;  %v3271_v14 = vunpack.c.l.bf16 %v3244_v7 }
 0x431   :  { %v2886_v32 = vpop.f32.mrf.mxu1 }
 0x432   :  { %v2887_v38 = vadd.f32 %v2886_v32, %v2813_v34  ;;  %v3262_v32 = vunpack.c.h.bf16 %v3239_v37  ;;  %v3261_v34 = vunpack.c.l.bf16 %v3239_v37 }
 0x433   :  { %v2888_v36 = vpop.f32.mrf.mxu1 }
 0x434   :  { %v2889_v40 = vadd.f32 %v2888_v36, %v2817_v35  ;;  %v3260_v35 = vunpack.c.h.bf16 %v3238_v31  ;;  %v3259_v36 = vunpack.c.l.bf16 %v3238_v31 }
 0x454   :  { %v2957_v39 = vpop.f32.mrf.mxu0 }
 0x455   :  { %v2958_v4 = vadd.f32 %v2957_v39, %v2887_v38  ;;  %v3237_v38 = vld [vmem:[#allocation19 + $0x20] sm:$0xff]  ;;  %v3388_v39 = vld [vmem:[#allocation17] ss:$0 sm:$0xff] }
 0x456   :  { %v2959_v42 = vpop.f32.mrf.mxu0 }
 0x457   :  { %v2960_v9 = vadd.f32 %v2959_v42, %v2889_v40  ;;  %v2962_v45 = vmax.f32 %v2958_v4, 0.0  ;;  %v3258_v40 = vunpack.c.h.bf16 %v3237_v38  ;;  %v3257_v4 = vunpack.c.l.bf16 %v3237_v38  ;;  %v3236_v42 = vld [vmem:[#allocation19 + $0x18] sm:$0xff] }
 0x459   :  { %v2963_v44 = vmax.f32 %v2960_v9, 0.0 }
 0x45b   :  { %3099 = vmatprep.mubr.f32.mxu0 %v2963_v44  ;;  %v3255_v44 = vunpack.c.l.bf16 %v3236_v42 }
 0x45c   :  { %3100 = vmatmul.mubr.f32.vlgmr.msra.gmra.mxu0 %v2962_v45  ;;  %v3256_v45 = vunpack.c.h.bf16 %v3236_v42 }
 0x45d   :  { %3357 = vmatprep.mubr.f32.mxu0 %v4032_v49  ;;  %v3245_v49 = vld [vmem:[#allocation19 + $0x60] sm:$0xff]  ;;  %3294 = vmatpush1.msra.mxu0 %v3279_v60 }
 0x45e   :  { %3295 = vmatprep.subr.mxu0 %v3278_v2  ;;  %v3274_v8 = vunpack.c.h.bf16 %v3245_v49  ;;  %v3273_v10 = vunpack.c.l.bf16 %v3245_v49 }
 0x45f   :  { %3296 = vmatpush1.msra.mxu0 %v3277_v3  ;;  %v3281_v3 = vld [vmem:[#allocation20] sm:$0x3] }
 0x460   :  { %3297 = vmatprep.subr.mxu0 %v3276_v5  ;;  %v3286_v49 = vrot.slane %v3281_v3, %v4177_v26 }
 0x461   :  { %3298 = vmatpush1.msra.mxu0 %v3275_v6 }
 0x462   :  { %3299 = vmatprep.subr.mxu0 %v3274_v8 }
 0x463   :  { %3300 = vmatpush1.msra.mxu0 %v3273_v10 }
 0x464   :  { %3301 = vmatprep.subr.mxu0 %v3272_v13 }
 0x465   :  { %3302 = vmatpush1.msra.mxu0 %v3271_v14 }
 0x466   :  { %3303 = vmatprep.subr.mxu0 %v3270_v16 }
 0x467   :  { %3304 = vmatpush1.msra.mxu0 %v3269_v19 }
 0x468   :  { %3305 = vmatprep.subr.mxu0 %v3268_v21 }
 0x469   :  { %3306 = vmatpush1.msra.mxu0 %v3267_v41 }
 0x46a   :  { %3307 = vmatprep.subr.mxu0 %v3266_v24 }
 0x46b   :  { %3308 = vmatpush1.msra.mxu0 %v3265_v25 }
 0x46c   :  { %3309 = vmatprep.subr.mxu0 %v3264_v27 }
 0x46d   :  { %3310 = vmatpush1.msra.mxu0 %v3263_v30 }
 0x46e   :  { %3311 = vmatprep.subr.mxu0 %v3262_v32 }
 0x46f   :  { %3312 = vmatpush1.msra.mxu0 %v3261_v34 }
 0x470   :  { %3313 = vmatprep.subr.mxu0 %v3260_v35 }
 0x471   :  { %3314 = vmatpush1.msra.mxu0 %v3259_v36 }
 0x472   :  { %3315 = vmatprep.subr.mxu0 %v3258_v40 }
 0x473   :  { %3316 = vmatpush1.msra.mxu0 %v3257_v4 }
 0x474   :  { %3317 = vmatprep.subr.mxu0 %v3256_v45 }
 0x475   :  { %3318 = vmatpush1.msra.mxu0 %v3255_v44 }
 0x476   :  { %3319 = vmatprep.subr.mxu0 %v3254_v47 }
 0x477   :  { %3320 = vmatpush1.msra.mxu0 %v3253_v43 }
 0x478   :  { %3321 = vmatprep.subr.mxu0 %v3252_v22 }
 0x51c   :  { %v3644_v51 = vpop.f32.mrf.mxu0 }
 0x51e   :  { %v3645_v54 = vpop.f32.mrf.mxu0 }
 0x51f   :  { %v3646_v56 = vadd.f32 %v3645_v54, %v3644_v51  ;;  %v3251_v51 = vunpack.c.l.bf16 %v3234_v53 }
 0x521   :  { %v3102_v11 = vadd.f32 %v3646_v56, %v3387_v52  ;;  %v3233_v52 = vld [vmem:[#allocation19] sm:$0xff]  ;;  %v4036_v56 = vmov 1   ;;  %3322 = vmatpush1.msra.mxu0 %v3251_v51 }
 0x522   :  { %v3250_v54 = vunpack.c.h.bf16 %v3233_v52 }
 0x523   :  { %v3105_v48 = vmax.f32 %v3102_v11, 0.0  ;;  %v3249_v11 = vunpack.c.l.bf16 %v3233_v52 }
 0x524   :  { %3323 = vmatprep.subr.mxu0 %v3250_v54 }
 0x525   :  { %3697 = vmatmul.mubr.f32.vlgmr.msra.gmra.mxu1 %v3105_v48  ;;  %3324 = vmatpush1.msra.mxu0 %v3249_v11 }
 0x5e5   :  { %v3211_v9 = vpop.f32.mrf.mxu1 }
 0x5e6   :  { %v3212_v46 = vadd.f32 %v3388_v39, %v3211_v9 }
 0x5e7   :  { %v3698_v61 = vpop.f32.mrf.mxu1 }
 0x5e8   :  { %3228 = vperm.xlu1 %3727, %v3212_v46   ;;  %3217 = vperm.xlu0 %3725, %v3212_v46  }
 0x5ec   :  { %3726 = vset.pattern.permute.xlu0 %v4036_v56 }
 0x5ed   :  { %3222 = vperm.xlu0 %3726, %v3212_v46  }
 0x5f1   :  { %3728 = vset.pattern.permute.xlu0 %v4034_v57  ;;  %v3290_v57 = vrot.slane %v3281_v3, %v4180_v50 }
 0x663   :  { %v3218_v48 = vpop.permute.xlu0 %3217  ;;  %v3229_v28 = vpop.permute.xlu1 %3228 }
 0x664   :  { %v3220_v58 = vmul.f32 %v3218_v48, %v2661_v55  ;;  %v3231_v60 = vmul.f32 %v3229_v28, %v2663_v18 }
 0x668   :  { %v3223_v33 = vpop.permute.xlu0 %3222 }
 0x669   :  { %v3225_v59 = vmul.f32 %v3223_v33, %v2662_v1 }
 0x66b   :  { %v3226_v63 = vadd.f32 %v3225_v59, %v3220_v58 }
 0x66d   :  { %v3232_v2 = vadd.f32 %v3231_v60, %v3226_v63 }
 0x66f   :  { %3358 = vmatmul.mubr.f32.vlgmr.msra.gmra.mxu0 %v3232_v2 }
 0x72f   :  { %v3359_v5 = vpop.f32.mrf.mxu0 }
 0x730   :  { %v3360_v6 = vadd.f32 %v3359_v5, %v3286_v49 }
 0x731   :  { %v3361_v62 = vpop.f32.mrf.mxu0 }
 0x732   :  { %3364 = vst [vmem:[#allocation22] sm:$0xff] %v3360_v6  ;;  %v3362_v55 = vadd.f32 %v3361_v62, %v3290_v57 }
 0x734   :  { %3365 = vst [vmem:[#allocation22 + $0x8] sm:$0xff] %v3362_v55 }
 0x735   :  { %3987 = shalt.err (!%p3984_p8)
}
 0x736   :  { %3375 = dma.vmem_to_hbm [thread:$0]  %s3373_s4, 256, %s4318_s13, [#allocation4]  }
 0x737   :  { %4010 = dma.done.wait [#allocation4], 256  }
 0x738   :  { %4011 = vsyncadd [#allocation4], 4294967040 }
 0x739   :  { %3379 = vsyncpa [#allocation3], 1 }
 0x73a   :  { %3380 = vsyncpa [#allocation6], 1 }
 0x73b   :  { %3381 = vsyncpa [#allocation9], 1 }
 0x73c   :  { %3382 = vsyncpa [#allocation12], 1 }
 0x73d   :  { %3383 = vsyncpa [#allocation15], 1 }
 0x73e   :  { %3384 = vsyncpa [#allocation18], 1 }
 0x73f   :  { %3385 = vsyncpa [#allocation21], 1 }
 0x740   :  { %3386 = vsyncpa [#allocation4], 1 }

</bundles_post_ra>
